<compile_context>
chip_gen: v7x
topology: tpu7x:2x2x1
jax: 0.10.0
libtpu: 0.0.40
codegen_flags: <defaults>
</compile_context>

<pallas_src>
import functools

import jax
import jax.numpy as jnp
from jax.experimental import pallas as pl
from jax.experimental.pallas import tpu as pltpu

LANE = 128


def _round_up(n, m):
    return ((n + m - 1) // m) * m


def _keep_mask(shape, seed_u32, salt):
    """Bernoulli(0.5) keep-mask from a counter-based hash (pure VPU ops)."""
    rows = jax.lax.broadcasted_iota(jnp.int32, shape, 0).astype(jnp.uint32)
    cols = jax.lax.broadcasted_iota(jnp.int32, shape, 1).astype(jnp.uint32)
    x = rows * jnp.uint32(shape[1]) + cols
    x = x + jnp.uint32((0x9E3779B9 * salt) & 0xFFFFFFFF)
    x = x ^ seed_u32
    # murmur3 fmix32 finalizer
    x = x ^ (x >> 16)
    x = x * jnp.uint32(0x85EBCA6B)
    x = x ^ (x >> 13)
    x = x * jnp.uint32(0xC2B2AE35)
    x = x ^ (x >> 16)
    return (x >> 31) == jnp.uint32(0)          # top-bit threshold -> p = 0.5


def mlp_kernel(seed_ref,                        # scalar-prefetch (SMEM)
               x_ref, w1_ref, b1_ref, w2_ref, b2_ref, w3_ref, b3_ref,
               o_ref, *, apply_dropout=True):
    # Per-tile PRNG stream: mix the grid index into the seed so batch tiles
    # don't replay the same dropout mask.
    tile = pl.program_id(0)
    seed = (seed_ref[0] + tile * jnp.int32(1000003)).astype(jnp.uint32)

    x = x_ref[...]                              # (TB, Dp) bf16

    # linear1 -> relu -> dropout   (dropout scale folded into w2)
    h = jnp.dot(x, w1_ref[...], preferred_element_type=jnp.float32) + b1_ref[...]
    h = jnp.maximum(h, 0.0)
    if apply_dropout:
        h = jnp.where(_keep_mask(h.shape, seed, 1), h, 0.0)

    # linear2 -> relu -> dropout   (dropout scale folded into w3)
    h = jnp.dot(h.astype(jnp.bfloat16), w2_ref[...],
                preferred_element_type=jnp.float32) + b2_ref[...]
    h = jnp.maximum(h, 0.0)
    if apply_dropout:
        h = jnp.where(_keep_mask(h.shape, seed, 2), h, 0.0)

    # linear3 (logits)
    out = jnp.dot(h.astype(jnp.bfloat16), w3_ref[...],
                  preferred_element_type=jnp.float32) + b3_ref[...]
    o_ref[...] = out.astype(o_ref.dtype)


def init_params(key, input_size, H1, H2, output_size):
    """nn.Linear-style init; weights stored (in, out), biases (1, out), f32."""
    ks = jax.random.split(key, 6)

    def linear(kw, kb, fan_in, fan_out):
        bound = 1.0 / (fan_in ** 0.5)
        w = jax.random.uniform(kw, (fan_in, fan_out), jnp.float32, -bound, bound)
        b = jax.random.uniform(kb, (1, fan_out), jnp.float32, -bound, bound)
        return w, b

    w1, b1 = linear(ks[0], ks[1], input_size, H1)
    w2, b2 = linear(ks[2], ks[3], H1, H2)
    w3, b3 = linear(ks[4], ks[5], H2, output_size)
    return {"w1": w1, "b1": b1, "w2": w2, "b2": b2, "w3": w3, "b3": b3}


def prepare_params(params):
    """Fold dropout scale into w2/w3, zero-pad features to 128 lanes, cast."""
    w1, b1 = params["w1"], params["b1"]
    w2, b2 = params["w2"] * 2.0, params["b2"]   # 1/(1-p) for layer-1 dropout
    w3, b3 = params["w3"] * 2.0, params["b3"]   # 1/(1-p) for layer-2 dropout

    D, H1 = w1.shape
    H2, O = w2.shape[1], w3.shape[1]
    Dp, H1p, H2p, Op = (_round_up(n, LANE) for n in (D, H1, H2, O))

    def pad2(a, r, c):
        return jnp.pad(a, ((0, r - a.shape[0]), (0, c - a.shape[1])))

    return {
        "w1": pad2(w1, Dp, H1p).astype(jnp.bfloat16),
        "b1": pad2(b1, 1, H1p).astype(jnp.float32),
        "w2": pad2(w2, H1p, H2p).astype(jnp.bfloat16),
        "b2": pad2(b2, 1, H2p).astype(jnp.float32),
        "w3": pad2(w3, H2p, Op).astype(jnp.bfloat16),
        "b3": pad2(b3, 1, Op).astype(jnp.float32),
    }


@functools.partial(jax.jit, static_argnames=("output_size", "tb", "training"))
def classify_mnist_forward(x, params, seed, output_size, tb=256, training=True):
    """x: (B, input_size) f32. params: prepared (padded, bf16) params."""
    B, D = x.shape
    Dp, H1p = params["w1"].shape
    H2p = params["w2"].shape[1]
    Op = params["w3"].shape[1]
    Bp = _round_up(B, tb)

    xp = jnp.pad(x, ((0, Bp - B), (0, Dp - D))).astype(jnp.bfloat16)

    grid_spec = pltpu.PrefetchScalarGridSpec(
        num_scalar_prefetch=1,                  # seed -> SMEM before the grid
        grid=(Bp // tb,),
        in_specs=[
            pl.BlockSpec((tb, Dp), lambda i, s: (i, 0)),      # x tile (streams)
            pl.BlockSpec((Dp, H1p), lambda i, s: (0, 0)),     # weights resident
            pl.BlockSpec((1, H1p), lambda i, s: (0, 0)),
            pl.BlockSpec((H1p, H2p), lambda i, s: (0, 0)),
            pl.BlockSpec((1, H2p), lambda i, s: (0, 0)),
            pl.BlockSpec((H2p, Op), lambda i, s: (0, 0)),
            pl.BlockSpec((1, Op), lambda i, s: (0, 0)),
        ],
        out_specs=pl.BlockSpec((tb, Op), lambda i, s: (i, 0)),  # lane-dense out
    )

    out_padded = pl.pallas_call(
        functools.partial(mlp_kernel, apply_dropout=training),
        out_shape=jax.ShapeDtypeStruct((Bp, Op), jnp.float32),
        grid_spec=grid_spec,
        compiler_params=pltpu.CompilerParams(
            dimension_semantics=("parallel",)),   # batch tiles independent
    )(seed, xp, params["w1"], params["b1"], params["w2"], params["b2"],
      params["w3"], params["b3"])

    return out_padded[:B, :output_size]


if __name__ == "__main__":
    # MNIST-like shapes: batch=512, input=784, H1=128, H2=64, classes=10
    B, input_size, H1, H2, output_size = 512, 784, 128, 64, 10

    key = jax.random.PRNGKey(0)
    kx, kp = jax.random.split(key)

    x = jax.random.normal(kx, (B, input_size), jnp.float32)
    params = prepare_params(init_params(kp, input_size, H1, H2, output_size))
    seed = jnp.array([42], dtype=jnp.int32)

    out = classify_mnist_forward(x, params, seed, output_size=output_size,
                                 tb=256, training=True)
    jax.block_until_ready(out)

    assert out.shape == (B, output_size), out.shape
    assert out.dtype == jnp.float32
    assert bool(jnp.all(jnp.isfinite(out)))
    print("KERNEL_OK")
</pallas_src>

<mosaic_0001>
module attributes {stable_mosaic.version = 11 : i64} {
  func.func @mlp_kernel(%arg0: i32, %arg1: memref<1xi32, #tpu.memory_space<smem>>, %arg2: memref<256x896xbf16, #tpu.memory_space<vmem>>, %arg3: memref<896x128xbf16, #tpu.memory_space<vmem>>, %arg4: memref<1x128xf32, #tpu.memory_space<vmem>>, %arg5: memref<128x128xbf16, #tpu.memory_space<vmem>>, %arg6: memref<1x128xf32, #tpu.memory_space<vmem>>, %arg7: memref<128x128xbf16, #tpu.memory_space<vmem>>, %arg8: memref<1x128xf32, #tpu.memory_space<vmem>>, %arg9: memref<256x128xf32, #tpu.memory_space<vmem>>) attributes {dimension_semantics = [#tpu.dimension_semantics<parallel>], iteration_bounds = array<i64: 2>, scalar_prefetch = 1 : i64, scratch_operands = 0 : i64, tpu.core_type = #tpu.core_type<tc>, window_params = [{transform_indices = @transform_0, window_bounds = array<i64: 256, 896>}, {pipeline_mode = #tpu.pipeline_mode<synchronous>, transform_indices = @transform_1, window_bounds = array<i64: 896, 128>}, {pipeline_mode = #tpu.pipeline_mode<synchronous>, transform_indices = @transform_2, window_bounds = array<i64: 1, 128>}, {pipeline_mode = #tpu.pipeline_mode<synchronous>, transform_indices = @transform_3, window_bounds = array<i64: 128, 128>}, {pipeline_mode = #tpu.pipeline_mode<synchronous>, transform_indices = @transform_4, window_bounds = array<i64: 1, 128>}, {pipeline_mode = #tpu.pipeline_mode<synchronous>, transform_indices = @transform_5, window_bounds = array<i64: 128, 128>}, {pipeline_mode = #tpu.pipeline_mode<synchronous>, transform_indices = @transform_6, window_bounds = array<i64: 1, 128>}, {transform_indices = @transform_7, window_bounds = array<i64: 256, 128>}]} {
    %c0 = arith.constant 0 : index
    %0 = memref.load %arg1[%c0] : memref<1xi32, #tpu.memory_space<smem>>
    %c1000003_i32 = arith.constant 1000003 : i32
    %1 = arith.muli %arg0, %c1000003_i32 : i32
    %2 = arith.addi %0, %1 : i32
    %c0_0 = arith.constant 0 : index
    %c0_1 = arith.constant 0 : index
    %3 = vector.load %arg2[%c0_0, %c0_1] : memref<256x896xbf16, #tpu.memory_space<vmem>>, vector<256x896xbf16>
    %c0_2 = arith.constant 0 : index
    %c0_3 = arith.constant 0 : index
    %4 = vector.load %arg3[%c0_2, %c0_3] : memref<896x128xbf16, #tpu.memory_space<vmem>>, vector<896x128xbf16>
    %cst = arith.constant dense<0.000000e+00> : vector<256x128xf32>
    %5 = tpu.matmul %3, %4, %cst {dimension_numbers = #tpu.dot_dimension_numbers<[1], [0], [0], [1], [0, 0, 1, 1], [], []>} : vector<256x896xbf16>, vector<896x128xbf16>, vector<256x128xf32> -> vector<256x128xf32>
    %c0_4 = arith.constant 0 : index
    %c0_5 = arith.constant 0 : index
    %6 = vector.load %arg4[%c0_4, %c0_5] : memref<1x128xf32, #tpu.memory_space<vmem>>, vector<1x128xf32>
    %7 = vector.broadcast %6 : vector<1x128xf32> to vector<256x128xf32>
    %8 = arith.addf %5, %7 : vector<256x128xf32>
    %cst_6 = arith.constant 0.000000e+00 : f32
    %9 = vector.broadcast %cst_6 : f32 to vector<256x128xf32>
    %10 = arith.maximumf %8, %9 : vector<256x128xf32>
    %11 = tpu.iota {dimensions = array<i32: 0>} : vector<256x128xi32>
    %12 = tpu.iota {dimensions = array<i32: 1>} : vector<256x128xi32>
    %c128_i32 = arith.constant 128 : i32
    %13 = vector.broadcast %c128_i32 : i32 to vector<256x128xi32>
    %14 = arith.muli %11, %13 : vector<256x128xi32>
    %15 = arith.addi %14, %12 : vector<256x128xi32>
    %c-1640531527_i32 = arith.constant -1640531527 : i32
    %16 = vector.broadcast %c-1640531527_i32 : i32 to vector<256x128xi32>
    %17 = arith.addi %15, %16 : vector<256x128xi32>
    %18 = vector.broadcast %2 : i32 to vector<256x128xi32>
    %19 = arith.xori %17, %18 : vector<256x128xi32>
    %c16_i32 = arith.constant 16 : i32
    %20 = vector.broadcast %c16_i32 : i32 to vector<256x128xi32>
    %21 = arith.shrui %19, %20 : vector<256x128xi32>
    %22 = arith.xori %19, %21 : vector<256x128xi32>
    %c-2048144789_i32 = arith.constant -2048144789 : i32
    %23 = vector.broadcast %c-2048144789_i32 : i32 to vector<256x128xi32>
    %24 = arith.muli %22, %23 : vector<256x128xi32>
    %c13_i32 = arith.constant 13 : i32
    %25 = vector.broadcast %c13_i32 : i32 to vector<256x128xi32>
    %26 = arith.shrui %24, %25 : vector<256x128xi32>
    %27 = arith.xori %24, %26 : vector<256x128xi32>
    %c-1028477387_i32 = arith.constant -1028477387 : i32
    %28 = vector.broadcast %c-1028477387_i32 : i32 to vector<256x128xi32>
    %29 = arith.muli %27, %28 : vector<256x128xi32>
    %c16_i32_7 = arith.constant 16 : i32
    %30 = vector.broadcast %c16_i32_7 : i32 to vector<256x128xi32>
    %31 = arith.shrui %29, %30 : vector<256x128xi32>
    %32 = arith.xori %29, %31 : vector<256x128xi32>
    %c31_i32 = arith.constant 31 : i32
    %33 = vector.broadcast %c31_i32 : i32 to vector<256x128xi32>
    %34 = arith.shrui %32, %33 : vector<256x128xi32>
    %c0_i32 = arith.constant 0 : i32
    %35 = vector.broadcast %c0_i32 : i32 to vector<256x128xi32>
    %36 = arith.cmpi eq, %34, %35 : vector<256x128xi32>
    %cst_8 = arith.constant 0.000000e+00 : f32
    %37 = vector.broadcast %cst_8 : f32 to vector<256x128xf32>
    %38 = arith.select %36, %10, %37 : vector<256x128xi1>, vector<256x128xf32>
    %39 = arith.truncf %38 : vector<256x128xf32> to vector<256x128xbf16>
    %c0_9 = arith.constant 0 : index
    %c0_10 = arith.constant 0 : index
    %40 = vector.load %arg5[%c0_9, %c0_10] : memref<128x128xbf16, #tpu.memory_space<vmem>>, vector<128x128xbf16>
    %cst_11 = arith.constant dense<0.000000e+00> : vector<256x128xf32>
    %41 = tpu.matmul %39, %40, %cst_11 {dimension_numbers = #tpu.dot_dimension_numbers<[1], [0], [0], [1], [0, 0, 1, 1], [], []>} : vector<256x128xbf16>, vector<128x128xbf16>, vector<256x128xf32> -> vector<256x128xf32>
    %c0_12 = arith.constant 0 : index
    %c0_13 = arith.constant 0 : index
    %42 = vector.load %arg6[%c0_12, %c0_13] : memref<1x128xf32, #tpu.memory_space<vmem>>, vector<1x128xf32>
    %43 = vector.broadcast %42 : vector<1x128xf32> to vector<256x128xf32>
    %44 = arith.addf %41, %43 : vector<256x128xf32>
    %cst_14 = arith.constant 0.000000e+00 : f32
    %45 = vector.broadcast %cst_14 : f32 to vector<256x128xf32>
    %46 = arith.maximumf %44, %45 : vector<256x128xf32>
    %47 = tpu.iota {dimensions = array<i32: 0>} : vector<256x128xi32>
    %48 = tpu.iota {dimensions = array<i32: 1>} : vector<256x128xi32>
    %c128_i32_15 = arith.constant 128 : i32
    %49 = vector.broadcast %c128_i32_15 : i32 to vector<256x128xi32>
    %50 = arith.muli %47, %49 : vector<256x128xi32>
    %51 = arith.addi %50, %48 : vector<256x128xi32>
    %c1013904242_i32 = arith.constant 1013904242 : i32
    %52 = vector.broadcast %c1013904242_i32 : i32 to vector<256x128xi32>
    %53 = arith.addi %51, %52 : vector<256x128xi32>
    %54 = vector.broadcast %2 : i32 to vector<256x128xi32>
    %55 = arith.xori %53, %54 : vector<256x128xi32>
    %c16_i32_16 = arith.constant 16 : i32
    %56 = vector.broadcast %c16_i32_16 : i32 to vector<256x128xi32>
    %57 = arith.shrui %55, %56 : vector<256x128xi32>
    %58 = arith.xori %55, %57 : vector<256x128xi32>
    %c-2048144789_i32_17 = arith.constant -2048144789 : i32
    %59 = vector.broadcast %c-2048144789_i32_17 : i32 to vector<256x128xi32>
    %60 = arith.muli %58, %59 : vector<256x128xi32>
    %c13_i32_18 = arith.constant 13 : i32
    %61 = vector.broadcast %c13_i32_18 : i32 to vector<256x128xi32>
    %62 = arith.shrui %60, %61 : vector<256x128xi32>
    %63 = arith.xori %60, %62 : vector<256x128xi32>
    %c-1028477387_i32_19 = arith.constant -1028477387 : i32
    %64 = vector.broadcast %c-1028477387_i32_19 : i32 to vector<256x128xi32>
    %65 = arith.muli %63, %64 : vector<256x128xi32>
    %c16_i32_20 = arith.constant 16 : i32
    %66 = vector.broadcast %c16_i32_20 : i32 to vector<256x128xi32>
    %67 = arith.shrui %65, %66 : vector<256x128xi32>
    %68 = arith.xori %65, %67 : vector<256x128xi32>
    %c31_i32_21 = arith.constant 31 : i32
    %69 = vector.broadcast %c31_i32_21 : i32 to vector<256x128xi32>
    %70 = arith.shrui %68, %69 : vector<256x128xi32>
    %c0_i32_22 = arith.constant 0 : i32
    %71 = vector.broadcast %c0_i32_22 : i32 to vector<256x128xi32>
    %72 = arith.cmpi eq, %70, %71 : vector<256x128xi32>
    %cst_23 = arith.constant 0.000000e+00 : f32
    %73 = vector.broadcast %cst_23 : f32 to vector<256x128xf32>
    %74 = arith.select %72, %46, %73 : vector<256x128xi1>, vector<256x128xf32>
    %75 = arith.truncf %74 : vector<256x128xf32> to vector<256x128xbf16>
    %c0_24 = arith.constant 0 : index
    %c0_25 = arith.constant 0 : index
    %76 = vector.load %arg7[%c0_24, %c0_25] : memref<128x128xbf16, #tpu.memory_space<vmem>>, vector<128x128xbf16>
    %cst_26 = arith.constant dense<0.000000e+00> : vector<256x128xf32>
    %77 = tpu.matmul %75, %76, %cst_26 {dimension_numbers = #tpu.dot_dimension_numbers<[1], [0], [0], [1], [0, 0, 1, 1], [], []>} : vector<256x128xbf16>, vector<128x128xbf16>, vector<256x128xf32> -> vector<256x128xf32>
    %c0_27 = arith.constant 0 : index
    %c0_28 = arith.constant 0 : index
    %78 = vector.load %arg8[%c0_27, %c0_28] : memref<1x128xf32, #tpu.memory_space<vmem>>, vector<1x128xf32>
    %79 = vector.broadcast %78 : vector<1x128xf32> to vector<256x128xf32>
    %80 = arith.addf %77, %79 : vector<256x128xf32>
    %c0_29 = arith.constant 0 : index
    %c0_30 = arith.constant 0 : index
    %81 = vector.load %arg9[%c0_29, %c0_30] : memref<256x128xf32, #tpu.memory_space<vmem>>, vector<256x128xf32>
    tpu.vector_store %arg9[%c0_29, %c0_30], %80 {strides = array<i32>} : memref<256x128xf32, #tpu.memory_space<vmem>>, vector<256x128xf32>,
    return
  }
  func.func @transform_0(%arg0: i32, %arg1: memref<1xi32, #tpu.memory_space<smem>>) -> (i32, i32) {
    %c0_i32 = arith.constant 0 : i32
    %c0_i32_0 = arith.constant 0 : i32
    return %arg0, %c0_i32 : i32, i32
  }
  func.func @transform_1(%arg0: i32, %arg1: memref<1xi32, #tpu.memory_space<smem>>) -> (i32, i32) {
    %c0_i32 = arith.constant 0 : i32
    %c0_i32_0 = arith.constant 0 : i32
    %c0_i32_1 = arith.constant 0 : i32
    return %c0_i32, %c0_i32_0 : i32, i32
  }
  func.func @transform_2(%arg0: i32, %arg1: memref<1xi32, #tpu.memory_space<smem>>) -> (i32, i32) {
    %c0_i32 = arith.constant 0 : i32
    %c0_i32_0 = arith.constant 0 : i32
    %c0_i32_1 = arith.constant 0 : i32
    return %c0_i32, %c0_i32_0 : i32, i32
  }
  func.func @transform_3(%arg0: i32, %arg1: memref<1xi32, #tpu.memory_space<smem>>) -> (i32, i32) {
    %c0_i32 = arith.constant 0 : i32
    %c0_i32_0 = arith.constant 0 : i32
    %c0_i32_1 = arith.constant 0 : i32
    return %c0_i32, %c0_i32_0 : i32, i32
  }
  func.func @transform_4(%arg0: i32, %arg1: memref<1xi32, #tpu.memory_space<smem>>) -> (i32, i32) {
    %c0_i32 = arith.constant 0 : i32
    %c0_i32_0 = arith.constant 0 : i32
    %c0_i32_1 = arith.constant 0 : i32
    return %c0_i32, %c0_i32_0 : i32, i32
  }
  func.func @transform_5(%arg0: i32, %arg1: memref<1xi32, #tpu.memory_space<smem>>) -> (i32, i32) {
    %c0_i32 = arith.constant 0 : i32
    %c0_i32_0 = arith.constant 0 : i32
    %c0_i32_1 = arith.constant 0 : i32
    return %c0_i32, %c0_i32_0 : i32, i32
  }
  func.func @transform_6(%arg0: i32, %arg1: memref<1xi32, #tpu.memory_space<smem>>) -> (i32, i32) {
    %c0_i32 = arith.constant 0 : i32
    %c0_i32_0 = arith.constant 0 : i32
    %c0_i32_1 = arith.constant 0 : i32
    return %c0_i32, %c0_i32_0 : i32, i32
  }
  func.func @transform_7(%arg0: i32, %arg1: memref<1xi32, #tpu.memory_space<smem>>) -> (i32, i32) {
    %c0_i32 = arith.constant 0 : i32
    %c0_i32_0 = arith.constant 0 : i32
    return %arg0, %c0_i32 : i32, i32
  }
}

</mosaic_0001>

<bundles_post_ra>
// kernel: classify_mnist_forward.1
= control target key start
LH: loop header
LB: loop body
LE: loop exit
PB: predicated region body
PF: predicated region fallthrough
CT: control target
= control target key end

     0   :  { %s4834_s29 = smov 0   ;;  %s6873_s0 = inlined_call_operand.<no memory space> [shape: s32[1], index: 0, kind: input, shape index: {}]   ;;  %s6874_s1 = inlined_call_operand.vmem [shape: bf16[512,896], index: 1, kind: input, shape index: {}]   ;;  %s6875_s2 = inlined_call_operand.vmem [shape: bf16[896,128], index: 2, kind: input, shape index: {}]   ;;  %s6876_s3 = inlined_call_operand.vmem [shape: f32[1,128], index: 3, kind: input, shape index: {}]   ;;  %s6877_s4 = inlined_call_operand.vmem [shape: bf16[128,128], index: 4, kind: input, shape index: {}]   ;;  %s6878_s5 = inlined_call_operand.vmem [shape: f32[1,128], index: 5, kind: input, shape index: {}]   ;;  %s6879_s6 = inlined_call_operand.vmem [shape: bf16[128,128], index: 6, kind: input, shape index: {}]   ;;  %s6880_s7 = inlined_call_operand.vmem [shape: f32[1,128], index: 7, kind: input, shape index: {}]   ;;  %s6881_s8 = inlined_call_operand.vmem [shape: f32[512,128], index: 8, kind: output, shape index: {}]  }
   0x1   :  { %13 = sst [smem:[#allocation3]] %s6873_s0 }
   0x2 LB: > { %s3674_s30 = sadd.s32 4294967295, %s4784_s29   ;;  %p3678_p0 = scmp.ge.s32.totalorder %s4784_s29, 1  ;;  %s4784_s29 = sphi %s4834_s29, %s19_s29  }
   0x3   : > { %p241_p1 = scmp.lt.s32.totalorder %s4784_s29, 3 }
   0x5   : > { %p242_p2 = pnand %p3678_p0, %p241_p1 }
   0x7   : > { %245 = sbr.rel (%p242_p2) target bundleno = 935 (0x3a7), region = 48 }
   0xe   : > { %v4545_v0 = vld [vmem:[%s6875_s2 + $0x40] sm:$0xff]   ;;  %s3679_s0 = sshll.u32 %s3674_s30, 5  ;;  %v4547_v2 = vld [vmem:[%s6875_s2 + $0x48] sm:$0xff]   ;;  %v4549_v4 = vld [vmem:[%s6875_s2 + $0x50] sm:$0xff]   ;;  %s5177_s21 = sld [smem:[#allocation3]] }
   0xf   : > { %v4546_v1 = vld [vmem:[%s6875_s2] sm:$0xff]   ;;  %3968 = vmatprep.subr.bf16.mxu0 %v4545_v0  ;;  %4520 = vmatprep.subr.bf16.mxu1 %v4545_v0  ;;  %p275_p3 = scmp.lt.s32.totalorder %s3679_s0, 63  ;;  %v4548_v3 = vld [vmem:[%s6875_s2 + $0x8] sm:$0xff]   ;;  %v4550_v5 = vld [vmem:[%s6875_s2 + $0x10] sm:$0xff]   ;;  %s5192_s22 = smul.u32 1000003, %s3674_s30 }
  0x10   : > { %3969 = vmatpush3.bf16.msra.mxu0 %v4546_v1  ;;  %4528 = vmatpush3.bf16.msra.mxu1 %v4546_v1  ;;  %v4551_v6 = vld [vmem:[%s6875_s2 + $0x58] sm:$0xff]   ;;  %v4553_v8 = vld [vmem:[%s6875_s2 + $0x60] sm:$0xff]   ;;  %v4555_v10 = vld [vmem:[%s6875_s2 + $0x68] sm:$0xff]  }
  0x11   : > { %3970 = vmatprep.subr.bf16.mxu0 %v4547_v2  ;;  %4521 = vmatprep.subr.bf16.mxu1 %v4547_v2  ;;  %s7194_s0 = smov (!%p275_p3, %s3679_s0), 63  ;;  %v4552_v7 = vld [vmem:[%s6875_s2 + $0x18] sm:$0xff]   ;;  %v4554_v9 = vld [vmem:[%s6875_s2 + $0x20] sm:$0xff]   ;;  %v4556_v13 = vld [vmem:[%s6875_s2 + $0x28] sm:$0xff]  }
  0x12   : > { %s4536_s23 = smul.u32 28, %s7194_s0  ;;  %v4557_v14 = vld [vmem:[%s6875_s2 + $0x70] sm:$0xff]   ;;  %v4559_v16 = vld [vmem:[%s6875_s2 + $0x78] sm:$0xff]   ;;  %v4567_v18 = vld [vmem:[%s6875_s2 + $0xc0] sm:$0xff]   ;;  %s3682_s28 = sshll.u32 %s7194_s0, 3 }
  0x13   : > { %v4558_v15 = vld [vmem:[%s6875_s2 + $0x30] sm:$0xff]   ;;  %v4560_v17 = vld [vmem:[%s6875_s2 + $0x38] sm:$0xff]   ;;  %v4568_v21 = vld [vmem:[%s6875_s2 + $0x140] sm:$0xff]   ;;  %s6804_s14 = scalar_lea.vmem %s6881_s8, %s3682_s28 }
  0x14   : > { %3971 = vmatpush3.bf16.msra.mxu0 %v4548_v3  ;;  %4529 = vmatpush3.bf16.msra.mxu1 %v4548_v3  ;;  %s4877_s10 = scalar_lea.vmem %s6874_s1, %s4536_s23  ;;  %v4569_v22 = vld [vmem:[%s6875_s2 + $0x80] sm:$0xff]   ;;  %v4571_v24 = vld [vmem:[%s6875_s2 + $0xc8] sm:$0xff]   ;;  %v4579_v32 = vld [vmem:[%s6875_s2 + $0xd0] sm:$0xff]   ;;  %s290_s30 = sadd.s32 %s5192_s22, %s5177_s21 }
  0x15   : > { %3972 = vmatprep.subr.bf16.mxu0 %v4549_v4  ;;  %4522 = vmatprep.subr.bf16.mxu1 %v4549_v4  ;;  %v4563_v11 = vld [vmem:[%s4877_s10 + $0x4] ss:$28 sps:$4 sm:$0xff]   ;;  %v4573_v25 = vld [vmem:[%s4877_s10 + $0x3c] ss:$28 sps:$4 sm:$0xff]   ;;  %v4582_v27 = vld [vmem:[%s6875_s2 + $0x148] sm:$0xff]  }
  0x16   : > { %v4566_v12 = vld [vmem:[%s4877_s10 + $0x2a4] ss:$28 sps:$4 sm:$0xff]   ;;  %1482 = vmatprep.mubr.bf16.mxu0 %v4563_v11  ;;  %v4575_v26 = vld [vmem:[%s4877_s10 + $0x2dc] ss:$28 sps:$4 sm:$0xff]   ;;  %v4572_v28 = vld [vmem:[%s6875_s2 + $0x88] sm:$0xff]  }
  0x17   : > { %1578 = vmatprep.mubr.bf16.mxu1 %v4566_v12  ;;  %v4561_v19 = vld [vmem:[%s4877_s10] ss:$28 sps:$4 sm:$0xff]   ;;  %v4584_v29 = vld [vmem:[%s6875_s2 + $0x108] sm:$0xff]   ;;  %v4577_v30 = vld [vmem:[%s4877_s10 + $0x38] ss:$28 sps:$4 sm:$0xff]  }
  0x18   : > { %3973 = vmatpush3.bf16.msra.mxu0 %v4550_v5  ;;  %4530 = vmatpush3.bf16.msra.mxu1 %v4550_v5  ;;  %v4564_v20 = vld [vmem:[%s4877_s10 + $0x2a0] ss:$28 sps:$4 sm:$0xff]   ;;  %v4578_v31 = vld [vmem:[%s4877_s10 + $0x2d8] ss:$28 sps:$4 sm:$0xff]   ;;  %v4589_v39 = vld [vmem:[%s4877_s10 + $0x70] ss:$28 sps:$4 sm:$0xff]  }
  0x19   : > { %3974 = vmatprep.subr.bf16.mxu0 %v4551_v6  ;;  %4523 = vmatprep.subr.bf16.mxu1 %v4551_v6  ;;  %v4570_v23 = vld [vmem:[%s6875_s2 + $0x100] sm:$0xff]   ;;  %v4580_v33 = vld [vmem:[%s6875_s2 + $0x90] sm:$0xff]   ;;  %v4581_v34 = vld [vmem:[%s6875_s2 + $0xd8] sm:$0xff]  }
  0x1a   : > { %v4585_v35 = vld [vmem:[%s4877_s10 + $0x74] ss:$28 sps:$4 sm:$0xff]   ;;  %v4583_v37 = vld [vmem:[%s6875_s2 + $0x98] sm:$0xff]   ;;  %v4591_v38 = vld [vmem:[%s6875_s2 + $0xe0] sm:$0xff]  }
  0x1b   : > { %v4587_v36 = vld [vmem:[%s4877_s10 + $0x314] ss:$28 sps:$4 sm:$0xff]   ;;  %v4592_v42 = vld [vmem:[%s6875_s2 + $0xa0] sm:$0xff]   ;;  %v4593_v43 = vld [vmem:[%s6875_s2 + $0xe8] sm:$0xff]  }
  0x1c   : > { %3975 = vmatpush3.bf16.msra.mxu0 %v4552_v7  ;;  %4531 = vmatpush3.bf16.msra.mxu1 %v4552_v7  ;;  %v4590_v40 = vld [vmem:[%s4877_s10 + $0x310] ss:$28 sps:$4 sm:$0xff]   ;;  %v4599_v48 = vld [vmem:[%s4877_s10 + $0xa8] ss:$28 sps:$4 sm:$0xff]   ;;  %v4614_v52 = vld [vmem:[%s6875_s2 + $0x158] sm:$0xff]  }
  0x1d   : > { %3976 = vmatprep.subr.bf16.mxu0 %v4553_v8  ;;  %4524 = vmatprep.subr.bf16.mxu1 %v4553_v8  ;;  %v4602_v41 = vld [vmem:[%s6875_s2 + $0x150] sm:$0xff]   ;;  %v4595_v45 = vld [vmem:[%s4877_s10 + $0xac] ss:$28 sps:$4 sm:$0xff]   ;;  %v4615_v53 = vld [vmem:[%s6875_s2 + $0x118] sm:$0xff]  }
  0x1e   : > { %v4604_v44 = vld [vmem:[%s6875_s2 + $0x110] sm:$0xff]   ;;  %v4597_v46 = vld [vmem:[%s4877_s10 + $0x34c] ss:$28 sps:$4 sm:$0xff]   ;;  %v4607_v54 = vld [vmem:[%s4877_s10 + $0xe4] ss:$28 sps:$4 sm:$0xff]  }
  0x1f   : > { %v4594_v47 = vld [vmem:[%s6875_s2 + $0xa8] sm:$0xff]   ;;  %v4601_v50 = vld [vmem:[%s6875_s2 + $0xf0] sm:$0xff]   ;;  %v4605_v55 = vld [vmem:[%s6875_s2 + $0xf8] sm:$0xff]  }
  0x20   : > { %3977 = vmatpush3.bf16.msra.mxu0 %v4554_v9  ;;  %4532 = vmatpush3.bf16.msra.mxu1 %v4554_v9  ;;  %v4600_v49 = vld [vmem:[%s4877_s10 + $0x348] ss:$28 sps:$4 sm:$0xff]   ;;  %v4603_v51 = vld [vmem:[%s6875_s2 + $0xb0] sm:$0xff]   ;;  %v4606_v57 = vld [vmem:[%s6875_s2 + $0xb8] sm:$0xff]  }
  0x21   : > { %3978 = vmatprep.subr.bf16.mxu0 %v4555_v10  ;;  %4525 = vmatprep.subr.bf16.mxu1 %v4555_v10  ;;  %v4611_v56 = vld [vmem:[%s4877_s10 + $0xc] ss:$28 sps:$4 sm:$0xff]   ;;  %v4613_v58 = vld [vmem:[%s6875_s2 + $0x180] sm:$0xff]   ;;  %v4616_v63 = vld [vmem:[%s4877_s10 + $0x11c] ss:$28 sps:$4 sm:$0xff]  }
  0x22   : > { %v4609_v59 = vld [vmem:[%s4877_s10 + $0x8] ss:$28 sps:$4 sm:$0xff]   ;;  %v4612_v62 = vld [vmem:[%s4877_s10 + $0xe0] ss:$28 sps:$4 sm:$0xff]   ;;  %v4620_v4 = vld [vmem:[%s4877_s10 + $0x118] ss:$28 sps:$4 sm:$0xff]  }
  0x23   : > { %v4628_v60 = vld [vmem:[%s6875_s2 + $0x160] sm:$0xff]   ;;  %v4630_v1 = vld [vmem:[%s6875_s2 + $0x188] sm:$0xff]   ;;  %v4622_v6 = vld [vmem:[%s4877_s10 + $0x154] ss:$28 sps:$4 sm:$0xff]  }
  0x24   : > { %3979 = vmatpush3.bf16.msra.mxu0 %v4556_v13  ;;  %4533 = vmatpush3.bf16.msra.mxu1 %v4556_v13  ;;  %v4629_v61 = vld [vmem:[%s6875_s2 + $0x120] sm:$0xff]   ;;  %v4637_v2 = vld [vmem:[%s6875_s2 + $0x168] sm:$0xff]   ;;  %v4645_v7 = vld [vmem:[%s6875_s2 + $0x190] sm:$0xff]  }
  0x25   : > { %3980 = vmatprep.subr.bf16.mxu0 %v4557_v14  ;;  %4526 = vmatprep.subr.bf16.mxu1 %v4557_v14  ;;  %v4618_v0 = vld [vmem:[%s4877_s10 + $0x44] ss:$28 sps:$4 sm:$0xff]   ;;  %v4638_v3 = vld [vmem:[%s6875_s2 + $0x128] sm:$0xff]   ;;  %v4624_v8 = vld [vmem:[%s4877_s10 + $0x7c] ss:$28 sps:$4 sm:$0xff]  }
  0x26   : > { %v4621_v5 = vld [vmem:[%s4877_s10 + $0x40] ss:$28 sps:$4 sm:$0xff]   ;;  %v4652_v9 = vld [vmem:[%s6875_s2 + $0x170] sm:$0xff]   ;;  %v4631_v13 = vld [vmem:[%s4877_s10 + $0x18c] ss:$28 sps:$4 sm:$0xff]  }
  0x27   : > { %v4653_v10 = vld [vmem:[%s6875_s2 + $0x130] sm:$0xff]  }
  0x28   : > { %3981 = vmatpush3.bf16.msra.mxu0 %v4558_v15  ;;  %4534 = vmatpush3.bf16.msra.mxu1 %v4558_v15  ;;  %v4626_v11 = vld [vmem:[%s4877_s10 + $0x150] ss:$28 sps:$4 sm:$0xff]   ;;  %v4627_v12 = vld [vmem:[%s4877_s10 + $0x78] ss:$28 sps:$4 sm:$0xff]  }
  0x29   : > { %3982 = vmatprep.subr.bf16.mxu0 %v4559_v16  ;;  %4527 = vmatprep.subr.bf16.mxu1 %v4559_v16  ;;  %v4633_v14 = vld [vmem:[%s4877_s10 + $0xb4] ss:$28 sps:$4 sm:$0xff]   ;;  %v4660_v15 = vld [vmem:[%s6875_s2 + $0x198] sm:$0xff]  }
  0x2a   : > { %v4661_v16 = vld [vmem:[%s6875_s2 + $0x178] sm:$0xff]  }
  0x2c   : > { %3983 = vmatpush3.bf16.msra.mxu0 %v4560_v17  ;;  %4535 = vmatpush3.bf16.msra.mxu1 %v4560_v17  ;;  %v4662_v17 = vld [vmem:[%s6875_s2 + $0x138] sm:$0xff]  }
  0x2d   : > { %4080 = vmatprep.subr.bf16.mxu1 %v4567_v18  ;;  %4192 = vmatprep.subr.bf16.mxu0 %v4568_v21  ;;  %v4635_v18 = vld [vmem:[%s4877_s10 + $0x188] ss:$28 sps:$4 sm:$0xff]  }
  0x2e   : > { %v4641_v21 = vld [vmem:[%s4877_s10 + $0xec] ss:$28 sps:$4 sm:$0xff]  }
  0x2f   : > { %1483 = vmatmul.mubr.bf16.vlgmr.msra.gmra.mrb[0].mxu0 %v4561_v19  ;;  %1579 = vmatmul.mubr.bf16.vlgmr.msra.gmra.mrb[0].mxu1 %v4564_v20  ;;  %v4636_v19 = vld [vmem:[%s4877_s10 + $0xb0] ss:$28 sps:$4 sm:$0xff]   ;;  %v4639_v20 = vld [vmem:[%s4877_s10 + $0x1c4] ss:$28 sps:$4 sm:$0xff]  }
  0x30   : > { %4081 = vmatpush3.bf16.msra.mxu1 %v4569_v22  ;;  %4193 = vmatpush3.bf16.msra.mxu0 %v4570_v23  ;;  %v4675_v22 = vld [vmem:[%s6875_s2 + $0x1a0] sm:$0xff]  }
  0x31   : > { %4082 = vmatprep.subr.bf16.mxu1 %v4571_v24  ;;  %1490 = vmatprep.mubr.bf16.mxu0 %v4573_v25  ;;  %v4643_v23 = vld [vmem:[%s4877_s10 + $0x1c0] ss:$28 sps:$4 sm:$0xff]   ;;  %v4644_v24 = vld [vmem:[%s4877_s10 + $0xe8] ss:$28 sps:$4 sm:$0xff]  }
  0x32   : > { %1586 = vmatprep.mubr.bf16.mxu1 %v4575_v26  ;;  %4194 = vmatprep.subr.bf16.mxu0 %v4582_v27  ;;  %v4688_v25 = vld [vmem:[%s6875_s2 + $0x1a8] sm:$0xff]   ;;  %v4646_v26 = vld [vmem:[%s4877_s10 + $0x1fc] ss:$28 sps:$4 sm:$0xff]   ;;  %v4648_v27 = vld [vmem:[%s4877_s10 + $0x124] ss:$28 sps:$4 sm:$0xff]  }
  0x34   : > { %4083 = vmatpush3.bf16.msra.mxu1 %v4572_v28  ;;  %4195 = vmatpush3.bf16.msra.mxu0 %v4584_v29  ;;  %v4701_v28 = vld [vmem:[%s6875_s2 + $0x1b0] sm:$0xff]  }
  0x35   : > { %4084 = vmatprep.subr.bf16.mxu1 %v4579_v32  ;;  %4196 = vmatprep.subr.bf16.mxu0 %v4602_v41  ;;  %v4650_v29 = vld [vmem:[%s4877_s10 + $0x1f8] ss:$28 sps:$4 sm:$0xff]  }
  0x36   : > { %v4656_v32 = vld [vmem:[%s4877_s10 + $0x15c] ss:$28 sps:$4 sm:$0xff]   ;;  %v4673_v41 = vld [vmem:[%s4877_s10 + $0x14] ss:$28 sps:$4 sm:$0xff]  }
  0x37   : > { %1491 = vmatmul.mubr.bf16.gmra.mrb[4].mxu0 %v4577_v30  ;;  %1587 = vmatmul.mubr.bf16.gmra.mrb[4].mxu1 %v4578_v31  ;;  %v4651_v30 = vld [vmem:[%s4877_s10 + $0x120] ss:$28 sps:$4 sm:$0xff]   ;;  %v4654_v31 = vld [vmem:[%s4877_s10 + $0x234] ss:$28 sps:$4 sm:$0xff]  }
  0x38   : > { %4085 = vmatpush3.bf16.msra.mxu1 %v4580_v33  ;;  %1498 = vmatprep.mubr.bf16.mxu0 %v4585_v35  ;;  %v4714_v33 = vld [vmem:[%s6875_s2 + $0x1b8] sm:$0xff]  }
  0x39   : > { %4086 = vmatprep.subr.bf16.mxu1 %v4581_v34  ;;  %1594 = vmatprep.mubr.bf16.mxu1 %v4587_v36  ;;  %v4658_v34 = vld [vmem:[%s4877_s10 + $0x230] ss:$28 sps:$4 sm:$0xff]   ;;  %v4659_v35 = vld [vmem:[%s4877_s10 + $0x158] ss:$28 sps:$4 sm:$0xff]  }
  0x3a   : > { %4197 = vmatpush3.bf16.msra.mxu0 %v4604_v44  ;;  %v4663_v36 = vld [vmem:[%s4877_s10 + $0x26c] ss:$28 sps:$4 sm:$0xff]   ;;  %v4676_v44 = vld [vmem:[%s4877_s10 + $0x204] ss:$28 sps:$4 sm:$0xff]  }
  0x3b   : > { %4198 = vmatprep.subr.bf16.mxu0 %v4614_v52  ;;  %v4689_v52 = vld [vmem:[%s4877_s10 + $0x274] ss:$28 sps:$4 sm:$0xff]  }
  0x3c   : > { %4087 = vmatpush3.bf16.msra.mxu1 %v4583_v37  ;;  %v4665_v37 = vld [vmem:[%s4877_s10 + $0x194] ss:$28 sps:$4 sm:$0xff]  }
  0x3d   : > { %4088 = vmatprep.subr.bf16.mxu1 %v4591_v38  ;;  %v4667_v38 = vld [vmem:[%s4877_s10 + $0x268] ss:$28 sps:$4 sm:$0xff]  }
  0x3e   : > { %4199 = vmatpush3.bf16.msra.mxu0 %v4615_v53  ;;  %v4691_v53 = vld [vmem:[%s4877_s10 + $0xbc] ss:$28 sps:$4 sm:$0xff]  }
  0x3f   : > { %1499 = vmatmul.mubr.bf16.gmra.mrb[8].mxu0 %v4589_v39  ;;  %1595 = vmatmul.mubr.bf16.gmra.mrb[8].mxu1 %v4590_v40  ;;  %v4668_v39 = vld [vmem:[%s4877_s10 + $0x190] ss:$28 sps:$4 sm:$0xff]  }
  0x40   : > { %4089 = vmatpush3.bf16.msra.mxu1 %v4592_v42  ;;  %1506 = vmatprep.mubr.bf16.mxu0 %v4595_v45  ;;  %v4669_v40 = vld [vmem:[%s4877_s10 + $0x1cc] ss:$28 sps:$4 sm:$0xff]  }
  0x41   : > { %4090 = vmatprep.subr.bf16.mxu1 %v4593_v43  ;;  %1602 = vmatprep.mubr.bf16.mxu1 %v4597_v46  ;;  %v4671_v42 = vld [vmem:[%s4877_s10 + $0x10] ss:$28 sps:$4 sm:$0xff]   ;;  %v4674_v43 = vld [vmem:[%s4877_s10 + $0x1c8] ss:$28 sps:$4 sm:$0xff]   ;;  %v4680_v46 = vld [vmem:[%s4877_s10 + $0x200] ss:$28 sps:$4 sm:$0xff]  }
  0x42   : > { %4200 = vmatprep.subr.bf16.mxu0 %v4628_v60  ;;  %v4678_v45 = vld [vmem:[%s4877_s10 + $0x4c] ss:$28 sps:$4 sm:$0xff]   ;;  %v4702_v60 = vld [vmem:[%s4877_s10 + $0x2e4] ss:$28 sps:$4 sm:$0xff]  }
  0x43   : > { %4201 = vmatpush3.bf16.msra.mxu0 %v4629_v61  ;;  %v4704_v61 = vld [vmem:[%s4877_s10 + $0x12c] ss:$28 sps:$4 sm:$0xff]  }
  0x44   : > { %4091 = vmatpush3.bf16.msra.mxu1 %v4594_v47  ;;  %4202 = vmatprep.subr.bf16.mxu0 %v4637_v2  ;;  %v4681_v47 = vld [vmem:[%s4877_s10 + $0x48] ss:$28 sps:$4 sm:$0xff]   ;;  %v4712_v2 = vld [vmem:[%s4877_s10 + $0x318] ss:$28 sps:$4 sm:$0xff]  }
  0x45   : > { %4092 = vmatprep.subr.bf16.mxu1 %v4601_v50  ;;  %v4686_v50 = vld [vmem:[%s4877_s10 + $0x238] ss:$28 sps:$4 sm:$0xff]  }
  0x47   : > { %1507 = vmatmul.mubr.bf16.gmra.mrb[12].mxu0 %v4599_v48  ;;  %1603 = vmatmul.mubr.bf16.gmra.mrb[12].mxu1 %v4600_v49  ;;  %v4682_v48 = vld [vmem:[%s4877_s10 + $0x23c] ss:$28 sps:$4 sm:$0xff]   ;;  %v4684_v49 = vld [vmem:[%s4877_s10 + $0x84] ss:$28 sps:$4 sm:$0xff]  }
  0x48   : > { %4093 = vmatpush3.bf16.msra.mxu1 %v4603_v51  ;;  %1514 = vmatprep.mubr.bf16.mxu0 %v4607_v54  ;;  %v4687_v51 = vld [vmem:[%s4877_s10 + $0x80] ss:$28 sps:$4 sm:$0xff]   ;;  %v4693_v54 = vld [vmem:[%s4877_s10 + $0x270] ss:$28 sps:$4 sm:$0xff]  }
  0x49   : > { %4094 = vmatprep.subr.bf16.mxu1 %v4605_v55  ;;  %1643 = vmatprep.mubr.bf16.mxu1 %v4611_v56  ;;  %v4694_v55 = vld [vmem:[%s4877_s10 + $0xb8] ss:$28 sps:$4 sm:$0xff]   ;;  %v4695_v56 = vld [vmem:[%s4877_s10 + $0x2ac] ss:$28 sps:$4 sm:$0xff]  }
  0x4a   : > { %4203 = vmatpush3.bf16.msra.mxu0 %v4638_v3  ;;  %v4713_v3 = vld [vmem:[%s4877_s10 + $0x160] ss:$28 sps:$4 sm:$0xff]  }
  0x4b   : > { %4204 = vmatprep.subr.bf16.mxu0 %v4652_v9  ;;  %v4723_v9 = vld [vmem:[%s4877_s10 + $0x18] ss:$28 sps:$4 sm:$0xff]  }
  0x4c   : > { %4095 = vmatpush3.bf16.msra.mxu1 %v4606_v57  ;;  %v4697_v57 = vld [vmem:[%s4877_s10 + $0xf4] ss:$28 sps:$4 sm:$0xff]  }
  0x4d   : > { %4376 = vmatprep.subr.bf16.mxu1 %v4613_v58 }
  0x4e   : > { %4205 = vmatpush3.bf16.msra.mxu0 %v4653_v10  ;;  %v4724_v10 = vld [vmem:[%s4877_s10 + $0x1d0] ss:$28 sps:$4 sm:$0xff]  }
  0x4f   : > { %1515 = vmatmul.mubr.bf16.gmra.mrb[16].mxu0 %v4612_v62  ;;  %1644 = vmatmul.mubr.bf16.vlgmr.msra.gmra.mrb[16].mxu1 %v4609_v59  ;;  %v4700_v59 = vld [vmem:[%s4877_s10 + $0xf0] ss:$28 sps:$4 sm:$0xff]   ;;  %v4706_v62 = vld [vmem:[%s4877_s10 + $0x2e0] ss:$28 sps:$4 sm:$0xff]  }
  0x50   : > { %4377 = vmatpush3.bf16.msra.mxu1 %v4613_v58  ;;  %1522 = vmatprep.mubr.bf16.mxu0 %v4616_v63  ;;  %v4699_v58 = vld [vmem:[%s4877_s10 + $0x2a8] ss:$28 sps:$4 sm:$0xff]  }
  0x51   : > { %1651 = vmatprep.mubr.bf16.mxu1 %v4618_v0  ;;  %4378 = vmatprep.subr.bf16.mxu1 %v4630_v1  ;;  %v4707_v63 = vld [vmem:[%s4877_s10 + $0x128] ss:$28 sps:$4 sm:$0xff]   ;;  %v4708_v0 = vld [vmem:[%s4877_s10 + $0x31c] ss:$28 sps:$4 sm:$0xff]  }
  0x52   : > { %4206 = vmatprep.subr.bf16.mxu0 %v4661_v16  ;;  %v4731_v16 = vld [vmem:[%s4877_s10 + $0x244] ss:$28 sps:$4 sm:$0xff]  }
  0x53   : > { %4207 = vmatpush3.bf16.msra.mxu0 %v4662_v17  ;;  %v4733_v17 = vld [vmem:[%s4877_s10 + $0xf8] ss:$28 sps:$4 sm:$0xff]  }
  0x54   : > { %4379 = vmatpush3.bf16.msra.mxu1 %v4630_v1  ;;  %v4710_v1 = vld [vmem:[%s4877_s10 + $0x164] ss:$28 sps:$4 sm:$0xff]  }
  0x55   : > { %4380 = vmatprep.subr.bf16.mxu1 %v4645_v7 }
  0x57   : > { %1523 = vmatmul.mubr.bf16.gmra.mrb[20].mxu0 %v4620_v4  ;;  %1652 = vmatmul.mubr.bf16.gmra.mrb[20].mxu1 %v4621_v5  ;;  %v4715_v4 = vld [vmem:[%s4877_s10 + $0x354] ss:$28 sps:$4 sm:$0xff]   ;;  %v4717_v5 = vld [vmem:[%s4877_s10 + $0x19c] ss:$28 sps:$4 sm:$0xff]  }
  0x58   : > { %1530 = vmatprep.mubr.bf16.mxu0 %v4622_v6  ;;  %1659 = vmatprep.mubr.bf16.mxu1 %v4624_v8  ;;  %v4719_v6 = vld [vmem:[%s4877_s10 + $0x350] ss:$28 sps:$4 sm:$0xff]  }
  0x59   : > { %4381 = vmatpush3.bf16.msra.mxu1 %v4645_v7  ;;  %v4720_v7 = vld [vmem:[%s4877_s10 + $0x198] ss:$28 sps:$4 sm:$0xff]  }
  0x5a   : > { %4382 = vmatprep.subr.bf16.mxu1 %v4660_v15  ;;  %v4721_v8 = vld [vmem:[%s4877_s10 + $0x1d4] ss:$28 sps:$4 sm:$0xff]  }
  0x5d   : > { %4383 = vmatpush3.bf16.msra.mxu1 %v4660_v15  ;;  %v4730_v15 = vld [vmem:[%s4877_s10 + $0xc0] ss:$28 sps:$4 sm:$0xff]  }
  0x5e   : > { %4384 = vmatprep.subr.bf16.mxu1 %v4675_v22 }
  0x5f   : > { %1531 = vmatmul.mubr.bf16.gmra.mrb[24].mxu0 %v4626_v11  ;;  %1660 = vmatmul.mubr.bf16.gmra.mrb[24].mxu1 %v4627_v12  ;;  %v4725_v11 = vld [vmem:[%s4877_s10 + $0x50] ss:$28 sps:$4 sm:$0xff]  }
  0x60   : > { %1538 = vmatprep.mubr.bf16.mxu0 %v4631_v13  ;;  %1667 = vmatprep.mubr.bf16.mxu1 %v4633_v14  ;;  %v4726_v12 = vld [vmem:[%s4877_s10 + $0x20c] ss:$28 sps:$4 sm:$0xff]  }
  0x61   : > { %4385 = vmatpush3.bf16.msra.mxu1 %v4675_v22  ;;  %v4728_v13 = vld [vmem:[%s4877_s10 + $0x88] ss:$28 sps:$4 sm:$0xff]   ;;  %v4739_v22 = vld [vmem:[%s4877_s10 + $0x278] ss:$28 sps:$4 sm:$0xff]  }
  0x62   : > { %4386 = vmatprep.subr.bf16.mxu1 %v4688_v25  ;;  %v4729_v14 = vld [vmem:[%s4877_s10 + $0x208] ss:$28 sps:$4 sm:$0xff]  }
  0x65   : > { %4387 = vmatpush3.bf16.msra.mxu1 %v4688_v25  ;;  %v4743_v25 = vld [vmem:[%s4877_s10 + $0x1d8] ss:$28 sps:$4 sm:$0xff]  }
  0x66   : > { %4388 = vmatprep.subr.bf16.mxu1 %v4701_v28 }
  0x67   : > { %1539 = vmatmul.mubr.bf16.gmra.mrb[28].mxu0 %v4635_v18  ;;  %1668 = vmatmul.mubr.bf16.gmra.mrb[28].mxu1 %v4636_v19  ;;  %v4734_v18 = vld [vmem:[%s4877_s10 + $0x240] ss:$28 sps:$4 sm:$0xff]   ;;  %v4735_v19 = vld [vmem:[%s4877_s10 + $0x130] ss:$28 sps:$4 sm:$0xff]  }
  0x68   : > { %1546 = vmatprep.mubr.bf16.mxu0 %v4639_v20  ;;  %1675 = vmatprep.mubr.bf16.mxu1 %v4641_v21  ;;  %v4736_v20 = vld [vmem:[%s4877_s10 + $0x27c] ss:$28 sps:$4 sm:$0xff]   ;;  %v4738_v21 = vld [vmem:[%s4877_s10 + $0x168] ss:$28 sps:$4 sm:$0xff]  }
  0x69   : > { %4389 = vmatpush3.bf16.msra.mxu1 %v4701_v28  ;;  %v4746_v28 = vld [vmem:[%s4877_s10 + $0x2ec] ss:$28 sps:$4 sm:$0xff]  }
  0x6a   : > { %4390 = vmatprep.subr.bf16.mxu1 %v4714_v33 }
  0x6d   : > { %4391 = vmatpush3.bf16.msra.mxu1 %v4714_v33  ;;  %v4751_v33 = vld [vmem:[%s4877_s10 + $0x324] ss:$28 sps:$4 sm:$0xff]  }
  0x6f   : > { %1547 = vmatmul.mubr.bf16.gmra.mrb[32].mxu0 %v4643_v23  ;;  %1676 = vmatmul.mubr.bf16.gmra.mrb[32].mxu1 %v4644_v24  ;;  %v4740_v23 = vld [vmem:[%s4877_s10 + $0x1a0] ss:$28 sps:$4 sm:$0xff]   ;;  %v4741_v24 = vld [vmem:[%s4877_s10 + $0x2b4] ss:$28 sps:$4 sm:$0xff]  }
  0x70   : > { %1554 = vmatprep.mubr.bf16.mxu0 %v4646_v26  ;;  %1683 = vmatprep.mubr.bf16.mxu1 %v4648_v27  ;;  %v4744_v26 = vld [vmem:[%s4877_s10 + $0x2b0] ss:$28 sps:$4 sm:$0xff]  }
  0x71   : > { %v4745_v27 = vld [vmem:[%s4877_s10 + $0x210] ss:$28 sps:$4 sm:$0xff]  }
  0x77   : > { %1555 = vmatmul.mubr.bf16.gmra.mrb[36].mxu0 %v4650_v29  ;;  %1684 = vmatmul.mubr.bf16.gmra.mrb[36].mxu1 %v4651_v30  ;;  %v4748_v29 = vld [vmem:[%s4877_s10 + $0x248] ss:$28 sps:$4 sm:$0xff]  }
  0x78   : > { %1562 = vmatprep.mubr.bf16.mxu0 %v4654_v31  ;;  %1691 = vmatprep.mubr.bf16.mxu1 %v4656_v32  ;;  %v4761_v30 = vld [vmem:[%s6877_s4] sm:$0xff]  }
  0x79   : > { %4424 = vmatprep.subr.bf16.mxu1 %v4761_v30  ;;  %v4749_v31 = vld [vmem:[%s4877_s10 + $0x2e8] ss:$28 sps:$4 sm:$0xff]   ;;  %v4750_v32 = vld [vmem:[%s4877_s10 + $0x280] ss:$28 sps:$4 sm:$0xff]  }
  0x7f   : > { %1563 = vmatmul.mubr.bf16.gmra.mrb[40].mxu0 %v4658_v34  ;;  %1692 = vmatmul.mubr.bf16.gmra.mrb[40].mxu1 %v4659_v35  ;;  %v4753_v34 = vld [vmem:[%s4877_s10 + $0x2b8] ss:$28 sps:$4 sm:$0xff]   ;;  %v4762_v35 = vld [vmem:[%s6877_s4 + $0x8] sm:$0xff]  }
  0x80   : > { %1570 = vmatprep.mubr.bf16.mxu0 %v4663_v36  ;;  %1699 = vmatprep.mubr.bf16.mxu1 %v4665_v37  ;;  %v4754_v36 = vld [vmem:[%s4877_s10 + $0x320] ss:$28 sps:$4 sm:$0xff]   ;;  %v4755_v37 = vld [vmem:[%s4877_s10 + $0x2f0] ss:$28 sps:$4 sm:$0xff]  }
  0x87   : > { %1571 = vmatmul.mubr.bf16.gmra.mrb[44].mxu0 %v4667_v38  ;;  %1700 = vmatmul.mubr.bf16.gmra.mrb[44].mxu1 %v4668_v39  ;;  %v4756_v38 = vld [vmem:[%s4877_s10 + $0x35c] ss:$28 sps:$4 sm:$0xff]   ;;  %v4758_v39 = vld [vmem:[%s4877_s10 + $0x328] ss:$28 sps:$4 sm:$0xff]  }
  0x88   : > { %1707 = vmatprep.mubr.bf16.mxu1 %v4669_v40  ;;  %1804 = vmatprep.mubr.bf16.mxu0 %v4673_v41  ;;  %v4763_v40 = vld [vmem:[%s6877_s4 + $0x10] sm:$0xff]  }
  0x8f   : > { %1708 = vmatmul.mubr.bf16.gmra.mrb[48].mxu1 %v4674_v43  ;;  %1805 = vmatmul.mubr.bf16.vlgmr.msra.gmra.mrb[48].mxu0 %v4671_v42 }
  0x90   : > { %1715 = vmatprep.mubr.bf16.mxu1 %v4676_v44  ;;  %1812 = vmatprep.mubr.bf16.mxu0 %v4678_v45  ;;  %v4759_v45 = vld [vmem:[%s4877_s10 + $0x358] ss:$28 sps:$4 sm:$0xff]  }
  0x97   : > { %1716 = vmatmul.mubr.bf16.gmra.mrb[52].mxu1 %v4680_v46  ;;  %1813 = vmatmul.mubr.bf16.gmra.mrb[52].mxu0 %v4681_v47  ;;  %v4760_v46 = vld [vmem:[%s4877_s10 + $0x360] ss:$28 sps:$4 sm:$0xff]  }
  0x98   : > { %1723 = vmatprep.mubr.bf16.mxu1 %v4682_v48  ;;  %1820 = vmatprep.mubr.bf16.mxu0 %v4684_v49 }
  0x9f   : > { %1724 = vmatmul.mubr.bf16.gmra.mrb[56].mxu1 %v4686_v50  ;;  %1821 = vmatmul.mubr.bf16.gmra.mrb[56].mxu0 %v4687_v51 }
  0xa0   : > { %1731 = vmatprep.mubr.bf16.mxu1 %v4689_v52  ;;  %1828 = vmatprep.mubr.bf16.mxu0 %v4691_v53 }
  0xa7   : > { %1732 = vmatmul.mubr.bf16.gmra.mrb[60].mxu1 %v4693_v54  ;;  %1829 = vmatmul.mubr.bf16.gmra.mrb[60].mxu0 %v4694_v55  ;;  %v4764_v55 = vld [vmem:[%s6877_s4 + $0x18] sm:$0xff]  }
  0xa8   : > { %1739 = vmatprep.mubr.bf16.mxu1 %v4695_v56  ;;  %1836 = vmatprep.mubr.bf16.mxu0 %v4697_v57 }
  0xaf   : > { %1740 = vmatmul.mubr.bf16.gmra.mrb[64].mxu1 %v4699_v58  ;;  %1837 = vmatmul.mubr.bf16.gmra.mrb[64].mxu0 %v4700_v59 }
  0xb0   : > { %1747 = vmatprep.mubr.bf16.mxu1 %v4702_v60  ;;  %1844 = vmatprep.mubr.bf16.mxu0 %v4704_v61 }
  0xb7   : > { %1748 = vmatmul.mubr.bf16.gmra.mrb[68].mxu1 %v4706_v62  ;;  %1845 = vmatmul.mubr.bf16.gmra.mrb[68].mxu0 %v4707_v63 }
  0xb8   : > { %1755 = vmatprep.mubr.bf16.mxu1 %v4708_v0  ;;  %1852 = vmatprep.mubr.bf16.mxu0 %v4710_v1 }
  0xbf   : > { %1756 = vmatmul.mubr.bf16.gmra.mrb[72].mxu1 %v4712_v2  ;;  %1853 = vmatmul.mubr.bf16.gmra.mrb[72].mxu0 %v4713_v3 }
  0xc0   : > { %1763 = vmatprep.mubr.bf16.mxu1 %v4715_v4  ;;  %1860 = vmatprep.mubr.bf16.mxu0 %v4717_v5  ;;  %v4765_v4 = vld [vmem:[%s6877_s4 + $0x20] sm:$0xff]   ;;  %v2126_v5 = vlaneseq }
  0xc7   : > { %1764 = vmatmul.mubr.bf16.gmra.mrb[76].mxu1 %v4719_v6  ;;  %1861 = vmatmul.mubr.bf16.gmra.mrb[76].mxu0 %v4720_v7 }
  0xc8   : > { %1868 = vmatprep.mubr.bf16.mxu0 %v4721_v8  ;;  %4392 = vmatprep.mubr.bf16.mxu1 %v4723_v9 }
  0xcf   : > { %1869 = vmatmul.mubr.bf16.gmra.mrb[80].mxu0 %v4724_v10  ;;  %4393 = vmatmul.mubr.bf16.vlgmr.msra.gmra.mrb[80].mxu1 %v4725_v11 }
  0xd0   : > { %1876 = vmatprep.mubr.bf16.mxu0 %v4726_v12  ;;  %4396 = vmatprep.mubr.bf16.mxu1 %v4728_v13 }
  0xd1   : > { %4425 = vmatpush3.bf16.msra.mxu1 %v4761_v30 }
  0xd2   : > { %4426 = vmatprep.subr.bf16.mxu1 %v4762_v35 }
  0xd5   : > { %4427 = vmatpush3.bf16.msra.mxu1 %v4762_v35 }
  0xd6   : > { %4428 = vmatprep.subr.bf16.mxu1 %v4763_v40 }
  0xd7   : > { %1877 = vmatmul.mubr.bf16.gmra.mrb[84].mxu0 %v4729_v14  ;;  %4397 = vmatmul.mubr.bf16.gmra.mrb[84].mxu1 %v4730_v15 }
  0xd8   : > { %1884 = vmatprep.mubr.bf16.mxu0 %v4731_v16  ;;  %4400 = vmatprep.mubr.bf16.mxu1 %v4733_v17  ;;  %v5167_v16 = vshrl.u32 %v2126_v5, 7 }
  0xd9   : > { %4429 = vmatpush3.bf16.msra.mxu1 %v4763_v40 }
  0xda   : > { %4430 = vmatprep.subr.bf16.mxu1 %v4764_v55 }
  0xdd   : > { %4431 = vmatpush3.bf16.msra.mxu1 %v4764_v55 }
  0xde   : > { %4432 = vmatprep.subr.bf16.mxu1 %v4765_v4 }
  0xdf   : > { %1885 = vmatmul.mubr.bf16.gmra.mrb[88].mxu0 %v4734_v18  ;;  %4401 = vmatmul.mubr.bf16.gmra.mrb[88].mxu1 %v4735_v19  ;;  %v4766_v19 = vld [vmem:[%s6877_s4 + $0x28] sm:$0xff]  }
  0xe0   : > { %1892 = vmatprep.mubr.bf16.mxu0 %v4736_v20  ;;  %4404 = vmatprep.mubr.bf16.mxu1 %v4738_v21  ;;  %v2128_v20 = vadd.s32 8, %v5167_v16 }
  0xe1   : > { %4433 = vmatpush3.bf16.msra.mxu1 %v4765_v4  ;;  %v5224_v4 = vstv %s290_s30 }
  0xe2   : > { %4434 = vmatprep.subr.bf16.mxu1 %v4766_v19 }
  0xe5   : > { %4435 = vmatpush3.bf16.msra.mxu1 %v4766_v19 }
  0xe7   : > { %1893 = vmatmul.mubr.bf16.gmra.mrb[92].mxu0 %v4739_v22  ;;  %4405 = vmatmul.mubr.bf16.gmra.mrb[92].mxu1 %v4740_v23 }
  0xe8   : > { %1900 = vmatprep.mubr.bf16.mxu0 %v4741_v24  ;;  %4408 = vmatprep.mubr.bf16.mxu1 %v4743_v25 }
  0xef   : > { %1901 = vmatmul.mubr.bf16.gmra.mrb[96].mxu0 %v4744_v26  ;;  %4409 = vmatmul.mubr.bf16.gmra.mrb[96].mxu1 %v4745_v27 }
  0xf0   : > { %1908 = vmatprep.mubr.bf16.mxu0 %v4746_v28  ;;  %4412 = vmatprep.mubr.bf16.mxu1 %v4748_v29 }
  0xf7   : > { %1909 = vmatmul.mubr.bf16.gmra.mrb[100].mxu0 %v4749_v31  ;;  %4413 = vmatmul.mubr.bf16.gmra.mrb[100].mxu1 %v4750_v32  ;;  %v5183_v31 = vand.u32 127, %v2126_v5  ;;  %v2161_v32 = vmul.u32 128, %v5167_v16  ;;  %v4768_v5 = vld [vmem:[%s6877_s4 + $0x38] sm:$0xff]  }
  0xf8   : > { %1916 = vmatprep.mubr.bf16.mxu0 %v4751_v33  ;;  %4416 = vmatprep.mubr.bf16.mxu1 %v4753_v34  ;;  %v2162_v33 = vmul.u32 128, %v2128_v20 }
  0xf9   : > { %v5205_v40 = vadd.s32 %v2161_v32, %v5183_v31 }
  0xfb   : > { %6918 = vst [vmem:[#allocation7_spill] sm:$0xff] %v5205_v40 }
  0xff   : > { %1917 = vmatmul.mubr.bf16.gmra.mrb[104].mxu0 %v4754_v36  ;;  %4417 = vmatmul.mubr.bf16.gmra.mrb[104].mxu1 %v4755_v37  ;;  %v2129_v36 = vadd.s32 16, %v5167_v16  ;;  %v4767_v37 = vld [vmem:[%s6877_s4 + $0x30] sm:$0xff]  }
 0x100   : > { %1924 = vmatprep.mubr.bf16.mxu0 %v4756_v38  ;;  %4420 = vmatprep.mubr.bf16.mxu1 %v4758_v39  ;;  %v2130_v38 = vadd.s32 24, %v5167_v16  ;;  %v5202_v39 = vld [vmem:[%s6876_s3] ss:$0 sm:$0xff] }
 0x101   : > { %4436 = vmatprep.subr.bf16.mxu1 %v4767_v37 }
 0x102   : > { %v3984_v41 = vpop.f32.mrb[0].mxu0  ;;  %v4056_v42 = vpop.f32.mrb[0].mxu1  ;;  %4437 = vmatpush3.bf16.msra.mxu1 %v4767_v37 }
 0x103   : > { %v3985_v43 = vpop.f32.mrb[1].mxu0  ;;  %v4057_v44 = vpop.f32.mrb[1].mxu1  ;;  %4438 = vmatprep.subr.bf16.mxu1 %v4768_v5 }
 0x104   : > { %v5141_v47 = vadd.f32 %v3985_v43, %v3984_v41  ;;  %v3987_v48 = vpop.f32.mrb[2].mxu0  ;;  %v5143_v49 = vadd.f32 %v4057_v44, %v4056_v42  ;;  %v4059_v50 = vpop.f32.mrb[2].mxu1  ;;  %v5208_v41 = vadd.s32 %v2162_v33, %v5183_v31 }
 0x105   : > { %v3988_v51 = vpop.f32.mrb[3].mxu0  ;;  %v4060_v52 = vpop.f32.mrb[3].mxu1 }
 0x106   : > { %v5145_v53 = vadd.f32 %v3988_v51, %v3987_v48  ;;  %v5147_v54 = vadd.f32 %v4060_v52, %v4059_v50  ;;  %6919 = vst [vmem:[#allocation8_spill] sm:$0xff] %v5208_v41  ;;  %v1485_v48 = vadd.f32 %v5141_v47, %v5202_v39  ;;  %4439 = vmatpush3.bf16.msra.mxu1 %v4768_v5  ;;  %v2133_v5 = vadd.s32 48, %v5167_v16 }
 0x107   : > { %1925 = vmatmul.mubr.bf16.gmra.mrb[108].mxu0 %v4759_v45  ;;  %4421 = vmatmul.mubr.bf16.gmra.mrb[108].mxu1 %v4760_v46  ;;  %v2163_v46 = vmul.u32 128, %v2129_v36 }
 0x10a   : > { %v3990_v56 = vpop.f32.mrb[4].mxu0  ;;  %v4062_v57 = vpop.f32.mrb[4].mxu1 }
 0x10b   : > { %v3991_v58 = vpop.f32.mrb[5].mxu0  ;;  %v4063_v59 = vpop.f32.mrb[5].mxu1 }
 0x10c   : > { %v5152_v60 = vadd.f32 %v3991_v58, %v3990_v56  ;;  %v3993_v61 = vpop.f32.mrb[6].mxu0  ;;  %v5154_v62 = vadd.f32 %v4063_v59, %v4062_v57  ;;  %v4065_v63 = vpop.f32.mrb[6].mxu1  ;;  %v2164_v56 = vmul.u32 128, %v2130_v38  ;;  %v1488_v57 = vadd.f32 %v5145_v53, %v5202_v39 }
 0x10d   : > { %v3994_v0 = vpop.f32.mrb[7].mxu0  ;;  %v4066_v1 = vpop.f32.mrb[7].mxu1  ;;  %v2131_v53 = vadd.s32 32, %v5167_v16 }
 0x10e   : > { %v5156_v2 = vadd.f32 %v3994_v0, %v3993_v61  ;;  %v5158_v3 = vadd.f32 %v4066_v1, %v4065_v63  ;;  %v2225_v61 = vadd.s32 2654435769, %v5205_v40  ;;  %v2226_v63 = vadd.s32 2654435769, %v5208_v41 }
 0x110   : > { %v1496_v32 = vadd.f32 %v5156_v2, %v5202_v39 }
 0x112   : > { %v3996_v6 = vpop.f32.mrb[8].mxu0  ;;  %v4068_v7 = vpop.f32.mrb[8].mxu1 }
 0x113   : > { %v3997_v8 = vpop.f32.mrb[9].mxu0  ;;  %v4069_v9 = vpop.f32.mrb[9].mxu1 }
 0x114   : > { %v5163_v10 = vadd.f32 %v3997_v8, %v3996_v6  ;;  %v3999_v11 = vpop.f32.mrb[10].mxu0  ;;  %v5165_v12 = vadd.f32 %v4069_v9, %v4068_v7  ;;  %v4071_v13 = vpop.f32.mrb[10].mxu1  ;;  %v5230_v6 = vadd.s32 %v2163_v46, %v5183_v31  ;;  %v5236_v8 = vadd.s32 %v2164_v56, %v5183_v31 }
 0x115   : > { %v4000_v14 = vpop.f32.mrb[11].mxu0  ;;  %v4072_v15 = vpop.f32.mrb[11].mxu1  ;;  %v2258_v9 = vxor.u32 %v5224_v4, %v2225_v61 }
 0x116   : > { %v5169_v17 = vadd.f32 %v4000_v14, %v3999_v11  ;;  %v5171_v18 = vadd.f32 %v4072_v15, %v4071_v13  ;;  %6920 = vst [vmem:[#allocation9_spill] sm:$0xff] %v5230_v6  ;;  %6921 = vst [vmem:[#allocation10_spill] sm:$0xff] %v5236_v8  ;;  %v2132_v11 = vadd.s32 40, %v5167_v16  ;;  %v2259_v15 = vxor.u32 %v5224_v4, %v2226_v63 }
 0x117   : > { %v2290_v37 = vshrl.u32 %v2258_v9, 16 }
 0x118   : > { %6915 = vst [vmem:[#allocation4_spill] sm:$0xff] %v5171_v18  ;;  %v2166_v38 = vmul.u32 128, %v2132_v11 }
 0x119   : > { %v2322_v2 = vxor.u32 %v2290_v37, %v2258_v9 }
 0x11a   : > { %v4002_v21 = vpop.f32.mrb[12].mxu0  ;;  %v4074_v22 = vpop.f32.mrb[12].mxu1 }
 0x11b   : > { %v4003_v23 = vpop.f32.mrb[13].mxu0  ;;  %v4075_v24 = vpop.f32.mrb[13].mxu1 }
 0x11c   : > { %v5179_v25 = vadd.f32 %v4003_v23, %v4002_v21  ;;  %v4005_v26 = vpop.f32.mrb[14].mxu0  ;;  %v5181_v27 = vadd.f32 %v4075_v24, %v4074_v22  ;;  %v4077_v28 = vpop.f32.mrb[14].mxu1  ;;  %v2227_v21 = vadd.s32 2654435769, %v5230_v6  ;;  %v2165_v22 = vmul.u32 128, %v2131_v53 }
 0x11d   : > { %v4006_v29 = vpop.f32.mrb[15].mxu0  ;;  %v4078_v30 = vpop.f32.mrb[15].mxu1  ;;  %v1493_v23 = vadd.f32 %v5152_v60, %v5202_v39  ;;  %v2291_v60 = vshrl.u32 %v2259_v15, 16 }
 0x11e   : > { %6916 = vst [vmem:[#allocation5_spill] sm:$0xff] %v5181_v27  ;;  %v5186_v34 = vadd.f32 %v4006_v29, %v4005_v26  ;;  %v5188_v35 = vadd.f32 %v4078_v30, %v4077_v28  ;;  %v2228_v30 = vadd.s32 2654435769, %v5236_v8  ;;  %v5255_v46 = vadd.s32 %v2165_v22, %v5183_v31 }
 0x120   : > { %6917 = vst [vmem:[#allocation6_spill] sm:$0xff] %v5188_v35  ;;  %6922 = vst [vmem:[#allocation11_spill] sm:$0xff] %v5255_v46 }
 0x122   : > { %v4008_v42 = vpop.f32.mrb[16].mxu0  ;;  %v4096_v43 = vpop.f32.mrb[16].mxu1 }
 0x123   : > { %v4009_v44 = vpop.f32.mrb[17].mxu0  ;;  %v4097_v45 = vpop.f32.mrb[17].mxu1 }
 0x124   : > { %v5214_v50 = vadd.f32 %v4009_v44, %v4008_v42  ;;  %v4098_v51 = vadd.f32 %v4097_v45, %v4096_v43  ;;  %v4011_v52 = vpop.f32.mrb[18].mxu0  ;;  %v4099_v55 = vpop.f32.mrb[18].mxu1  ;;  %v2260_v45 = vxor.u32 %v5224_v4, %v2227_v21  ;;  %v2354_v21 = vmul.u32 2246822507, %v2322_v2 }
 0x125   : > { %v4012_v58 = vpop.f32.mrb[19].mxu0  ;;  %v4100_v59 = vpop.f32.mrb[19].mxu1 }
 0x126   : > { %v5220_v0 = vadd.f32 %v4098_v51, %v1485_v48  ;;  %v5222_v1 = vadd.f32 %v4012_v58, %v4011_v52  ;;  %v4101_v47 = vadd.f32 %v4100_v59, %v4099_v55  ;;  %v2261_v51 = vxor.u32 %v5224_v4, %v2228_v30 }
 0x127   : > { %v5261_v52 = vadd.s32 %v2166_v38, %v5183_v31  ;;  %v1501_v58 = vadd.f32 %v5163_v10, %v5202_v39  ;;  %v2292_v63 = vshrl.u32 %v2260_v45, 16  ;;  %v2386_v37 = vshrl.u32 %v2354_v21, 13 }
 0x128   : > { %v5233_v7 = vadd.f32 %v4101_v47, %v1488_v57  ;;  %v5263_v57 = vxor.u32 %v2291_v60, %v2259_v15  ;;  %v2229_v47 = vadd.s32 2654435769, %v5255_v46  ;;  %v1504_v15 = vadd.f32 %v5169_v17, %v5202_v39 }
 0x129   : > { %6923 = vst [vmem:[#allocation12_spill] sm:$0xff] %v5261_v52  ;;  %v2230_v22 = vadd.s32 2654435769, %v5261_v52  ;;  %v2324_v30 = vxor.u32 %v2292_v63, %v2260_v45  ;;  %v2167_v17 = vmul.u32 128, %v2133_v5 }
 0x12a   : > { %v4014_v13 = vpop.f32.mrb[20].mxu0  ;;  %v4102_v14 = vpop.f32.mrb[20].mxu1 }
 0x12b   : > { %v4015_v19 = vpop.f32.mrb[21].mxu0  ;;  %v4103_v20 = vpop.f32.mrb[21].mxu1  ;;  %v2263_v38 = vxor.u32 %v5224_v4, %v2230_v22  ;;  %v2356_v45 = vmul.u32 2246822507, %v2324_v30  ;;  %v2136_v30 = vadd.s32 72, %v5167_v16 }
 0x12c   : > { %v5244_v24 = vadd.f32 %v4015_v19, %v4014_v13  ;;  %v4104_v26 = vadd.f32 %v4103_v20, %v4102_v14  ;;  %v4017_v28 = vpop.f32.mrb[22].mxu0  ;;  %v4105_v29 = vpop.f32.mrb[22].mxu1  ;;  %v2293_v14 = vshrl.u32 %v2261_v51, 16  ;;  %v2134_v19 = vadd.s32 56, %v5167_v16 }
 0x12d   : > { %v4018_v33 = vpop.f32.mrb[23].mxu0  ;;  %v4106_v36 = vpop.f32.mrb[23].mxu1 }
 0x12e   : > { %v5249_v42 = vadd.f32 %v4104_v26, %v1493_v23  ;;  %v5251_v43 = vadd.f32 %v4018_v33, %v4017_v28  ;;  %v4107_v44 = vadd.f32 %v4106_v36, %v4105_v29  ;;  %v2355_v29 = vmul.u32 2246822507, %v5263_v57 }
 0x12f   : > { %v5283_v36 = vxor.u32 %v2293_v14, %v2261_v51 }
 0x130   : > { %v5257_v48 = vadd.f32 %v4107_v44, %v1496_v32  ;;  %v2262_v32 = vxor.u32 %v5224_v4, %v2229_v47  ;;  %v2168_v44 = vmul.u32 128, %v2134_v19  ;;  %v5297_v19 = vxor.u32 %v2386_v37, %v2354_v21 }
 0x131   : > { %v1528_v6 = vadd.f32 %v5251_v43, %v5202_v39 }
 0x132   : > { %v4020_v55 = vpop.f32.mrb[24].mxu0  ;;  %v4108_v56 = vpop.f32.mrb[24].mxu1 }
 0x133   : > { %v4021_v59 = vpop.f32.mrb[25].mxu0  ;;  %v4109_v61 = vpop.f32.mrb[25].mxu1 }
 0x134   : > { %v5269_v53 = vadd.f32 %v4021_v59, %v4020_v55  ;;  %v4110_v9 = vadd.f32 %v4109_v61, %v4108_v56  ;;  %v4023_v11 = vpop.f32.mrb[26].mxu0  ;;  %v4111_v13 = vpop.f32.mrb[26].mxu1  ;;  %v2387_v55 = vshrl.u32 %v2355_v29, 13  ;;  %v1509_v56 = vadd.f32 %v5179_v25, %v5202_v39 }
 0x135   : > { %v4024_v20 = vpop.f32.mrb[27].mxu0  ;;  %v4112_v10 = vpop.f32.mrb[27].mxu1  ;;  %v2294_v59 = vshrl.u32 %v2262_v32, 16  ;;  %v2135_v61 = vadd.s32 64, %v5167_v16 }
 0x136   : > { %v5275_v23 = vadd.f32 %v4110_v9, %v1501_v58  ;;  %v5277_v26 = vadd.f32 %v4024_v20, %v4023_v11  ;;  %v4113_v28 = vadd.f32 %v4112_v10, %v4111_v13  ;;  %v2357_v9 = vmul.u32 2246822507, %v5283_v36 }
 0x137   : > { %v5293_v11 = vadd.s32 %v2167_v17, %v5183_v31  ;;  %v1512_v13 = vadd.f32 %v5186_v34, %v5202_v39  ;;  %v5300_v20 = vadd.s32 %v2168_v44, %v5183_v31  ;;  %v2388_v36 = vshrl.u32 %v2356_v45, 13 }
 0x138   : > { %v5281_v33 = vadd.f32 %v4113_v28, %v1504_v15  ;;  %v2295_v15 = vshrl.u32 %v2263_v38, 16  ;;  %v2326_v17 = vxor.u32 %v2294_v59, %v2262_v32 }
 0x139   : > { %6924 = vst [vmem:[#allocation13_spill] sm:$0xff] %v5293_v11  ;;  %6925 = vst [vmem:[#allocation14_spill] sm:$0xff] %v5300_v20  ;;  %v2231_v34 = vadd.s32 2654435769, %v5293_v11  ;;  %v2232_v37 = vadd.s32 2654435769, %v5300_v20 }
 0x13a   : > { %v4026_v60 = vpop.f32.mrb[28].mxu0  ;;  %v4114_v2 = vpop.f32.mrb[28].mxu1  ;;  %v2327_v21 = vxor.u32 %v2295_v15, %v2263_v38  ;;  %v2358_v32 = vmul.u32 2246822507, %v2326_v17  ;;  %v2137_v38 = vadd.s32 80, %v5167_v16 }
 0x13b   : > { %v4027_v58 = vpop.f32.mrb[29].mxu0  ;;  %v4115_v57 = vpop.f32.mrb[29].mxu1 }
 0x13c   : > { %v5289_v63 = vadd.f32 %v4027_v58, %v4026_v60  ;;  %v4116_v51 = vadd.f32 %v4115_v57, %v4114_v2  ;;  %v4029_v47 = vpop.f32.mrb[30].mxu0  ;;  %v4117_v5 = vpop.f32.mrb[30].mxu1  ;;  %v2169_v60 = vmul.u32 128, %v2135_v61  ;;  %v5311_v57 = vxor.u32 %v2387_v55, %v2355_v29 }
 0x13d   : > { %v4030_v25 = vpop.f32.mrb[31].mxu0  ;;  %v4118_v14 = vpop.f32.mrb[31].mxu1  ;;  %v1517_v61 = vadd.f32 %v5214_v50, %v5202_v39  ;;  %v2359_v17 = vmul.u32 2246822507, %v2327_v21 }
 0x13e   : > { %v5302_v10 = vadd.f32 %v4116_v51, %v1509_v56  ;;  %v5304_v22 = vadd.f32 %v4030_v25, %v4029_v47  ;;  %v4119_v28 = vadd.f32 %v4118_v14, %v4117_v5  ;;  %v2389_v51 = vshrl.u32 %v2357_v9, 13 }
 0x13f   : > { %v2170_v47 = vmul.u32 128, %v2136_v30  ;;  %v5314_v14 = vxor.u32 %v2388_v36, %v2356_v45  ;;  %v5317_v59 = vadd.s32 %v2169_v60, %v5183_v31  ;;  %v1520_v45 = vadd.f32 %v5222_v1, %v5202_v39 }
 0x140   : > { %v5307_v2 = vadd.f32 %v4119_v28, %v1512_v13  ;;  %v2264_v28 = vxor.u32 %v5224_v4, %v2231_v34  ;;  %v2265_v60 = vxor.u32 %v5224_v4, %v2232_v37  ;;  %v2138_v56 = vadd.s32 88, %v5167_v16 }
 0x141   : > { %6926 = vst [vmem:[#allocation15_spill] sm:$0xff] %v5317_v59  ;;  %v2390_v34 = vshrl.u32 %v2358_v32, 13  ;;  %v2233_v1 = vadd.s32 2654435769, %v5317_v59 }
 0x142   : > { %v4032_v58 = vpop.f32.mrb[32].mxu0  ;;  %v4120_v44 = vpop.f32.mrb[32].mxu1  ;;  %v2296_v37 = vshrl.u32 %v2264_v28, 16 }
 0x143   : > { %v4033_v5 = vpop.f32.mrb[33].mxu0  ;;  %v4121_v25 = vpop.f32.mrb[33].mxu1 }
 0x144   : > { %v5322_v13 = vadd.f32 %v4033_v5, %v4032_v58  ;;  %v4122_v29 = vadd.f32 %v4121_v25, %v4120_v44  ;;  %v4035_v55 = vpop.f32.mrb[34].mxu0  ;;  %v4123_v15 = vpop.f32.mrb[34].mxu1  ;;  %v5334_v44 = vadd.s32 %v2170_v47, %v5183_v31  ;;  %v5336_v5 = vxor.u32 %v2389_v51, %v2357_v9 }
 0x145   : > { %v4036_v30 = vpop.f32.mrb[35].mxu0  ;;  %v4124_v36 = vpop.f32.mrb[35].mxu1  ;;  %v2171_v25 = vmul.u32 128, %v2137_v38 }
 0x146   : > { %v5329_v20 = vadd.f32 %v4122_v29, %v1517_v61  ;;  %v5331_v50 = vadd.f32 %v4036_v30, %v4035_v55  ;;  %v4125_v58 = vadd.f32 %v4124_v36, %v4123_v15  ;;  %6927 = vst [vmem:[#allocation16_spill] sm:$0xff] %v5334_v44  ;;  %v6929_v61 = vmul.u32 3266489909, %v5297_v19 }
 0x147   : > { %v2391_v55 = vshrl.u32 %v2359_v17, 13  ;;  %v2297_v30 = vshrl.u32 %v2265_v60, 16  ;;  %v2172_v15 = vmul.u32 128, %v2138_v56  ;;  %v2234_v51 = vadd.s32 2654435769, %v5334_v44 }
 0x148   : > { %v5339_v11 = vadd.f32 %v4125_v58, %v1520_v45  ;;  %v2482_v29 = vshrl.u32 %v6929_v61, 16  ;;  %v5347_v45 = vxor.u32 %v2390_v34, %v2358_v32  ;;  %v2266_v58 = vxor.u32 %v5224_v4, %v2233_v1 }
 0x149   : > { %v5351_v21 = vadd.s32 %v2171_v25, %v5183_v31  ;;  %v1525_v56 = vadd.f32 %v5244_v24, %v5202_v39  ;;  %v2328_v44 = vxor.u32 %v2296_v37, %v2264_v28  ;;  %v5359_v34 = vxor.u32 %v2391_v55, %v2359_v17 }
 0x14a   : > { %6928 = vst [vmem:[#allocation17_spill] sm:$0xff] %v5339_v11  ;;  %v4038_v36 = vpop.f32.mrb[36].mxu0  ;;  %v4126_v47 = vpop.f32.mrb[36].mxu1  ;;  %v2329_v1 = vxor.u32 %v2297_v30, %v2265_v60  ;;  %v5362_v25 = vadd.s32 %v2172_v15, %v5183_v31  ;;  %v5371_v28 = vadd.f32 %v5143_v49, %v5202_v39  ;;  %v2454_v43 = vmul.u32 3266489909, %v5347_v45 }
 0x14b   : > { %v4039_v52 = vpop.f32.mrb[37].mxu0  ;;  %v4127_v59 = vpop.f32.mrb[37].mxu1  ;;  %6930 = vst [vmem:[#allocation18_spill] sm:$0xff] %v5351_v21  ;;  %v2298_v37 = vshrl.u32 %v2266_v58, 16  ;;  %v2235_v17 = vadd.s32 2654435769, %v5351_v21  ;;  %v5377_v60 = vadd.f32 %v5147_v54, %v5202_v39 }
 0x14c   : > { %v5355_v61 = vadd.f32 %v4039_v52, %v4038_v36  ;;  %v4128_v46 = vadd.f32 %v4127_v59, %v4126_v47  ;;  %v4041_v9 = vpop.f32.mrb[38].mxu0  ;;  %v4129_v8 = vpop.f32.mrb[38].mxu1  ;;  %6931 = vst [vmem:[#allocation19_spill] sm:$0xff] %v5362_v25  ;;  %v2267_v59 = vxor.u32 %v5224_v4, %v2234_v51  ;;  %v2360_v55 = vmul.u32 2246822507, %v2328_v44 }
 0x14d   : > { %v4042_v38 = vpop.f32.mrb[39].mxu0  ;;  %v4130_v32 = vpop.f32.mrb[39].mxu1  ;;  %v6935_v30 = vmul.u32 3266489909, %v5311_v57  ;;  %v6936_v15 = vmul.u32 3266489909, %v5314_v14  ;;  %v2330_v21 = vxor.u32 %v2298_v37, %v2266_v58 }
 0x14e   : > { %v5364_v41 = vadd.f32 %v4128_v46, %v1525_v56  ;;  %v5366_v24 = vadd.f32 %v4042_v38, %v4041_v9  ;;  %v4131_v52 = vadd.f32 %v4130_v32, %v4129_v8  ;;  %v5381_v46 = vadd.f32 %v5154_v62, %v5202_v39 }
 0x14f   : > { %v2483_v49 = vshrl.u32 %v6935_v30, 16  ;;  %v2484_v36 = vshrl.u32 %v6936_v15, 16  ;;  %v2361_v47 = vmul.u32 2246822507, %v2329_v1  ;;  %v2236_v9 = vadd.s32 2654435769, %v5362_v25 }
 0x150   : > { %6932 = vst [vmem:[#allocation20_spill] sm:$0xff] %v5364_v41  ;;  %6933 = vst [vmem:[#allocation21_spill] sm:$0xff] %v5381_v46  ;;  %v5383_v8 = vadd.f32 %v4131_v52, %v1528_v6  ;;  %v6937_v54 = vmul.u32 3266489909, %v5297_v19  ;;  %v6938_v62 = vmul.u32 3266489909, %v5336_v5  ;;  %v2268_v1 = vxor.u32 %v5224_v4, %v2235_v17 }
 0x151   : > { %v2455_v44 = vmul.u32 3266489909, %v5359_v34  ;;  %v2299_v56 = vshrl.u32 %v2267_v59, 16  ;;  %v2486_v30 = vshrl.u32 %v2454_v43, 16  ;;  %v2139_v15 = vadd.s32 96, %v5167_v16 }
 0x152   : > { %6934 = vst [vmem:[#allocation22_spill] sm:$0xff] %v5383_v8  ;;  %v4044_v51 = vpop.f32.mrb[40].mxu0  ;;  %v4132_v38 = vpop.f32.mrb[40].mxu1  ;;  %v5392_v45 = vxor.u32 %v2482_v29, %v6937_v54  ;;  %v2485_v6 = vshrl.u32 %v6938_v62, 16  ;;  %v1533_v25 = vadd.f32 %v5269_v53, %v5202_v39  ;;  %v2392_v62 = vshrl.u32 %v2360_v55, 13 }
 0x153   : > { %v4045_v32 = vpop.f32.mrb[41].mxu0  ;;  %v4133_v52 = vpop.f32.mrb[41].mxu1  ;;  %v1536_v34 = vadd.f32 %v5277_v26, %v5202_v39  ;;  %v2393_v8 = vshrl.u32 %v2361_v47, 13  ;;  %v2269_v58 = vxor.u32 %v5224_v4, %v2236_v9  ;;  %v2140_v37 = vadd.s32 104, %v5167_v16 }
 0x154   : > { %v5401_v19 = vadd.f32 %v4045_v32, %v4044_v51  ;;  %v4134_v29 = vadd.f32 %v4133_v52, %v4132_v38  ;;  %v4047_v54 = vpop.f32.mrb[42].mxu0  ;;  %v4135_v40 = vpop.f32.mrb[42].mxu1  ;;  %v2331_v51 = vxor.u32 %v2299_v56, %v2267_v59  ;;  %v2487_v38 = vshrl.u32 %v2455_v44, 16 }
 0x155   : > { %v4048_v35 = vpop.f32.mrb[43].mxu0  ;;  %v4136_v27 = vpop.f32.mrb[43].mxu1  ;;  %v2362_v32 = vmul.u32 2246822507, %v2330_v21  ;;  %v2300_v52 = vshrl.u32 %v2268_v1, 16  ;;  %v2173_v46 = vmul.u32 128, %v2139_v15  ;;  %v5413_v26 = vadd.f32 %v5158_v3, %v5202_v39 }
 0x156   : > { %v5407_v17 = vadd.f32 %v4134_v29, %v1533_v25  ;;  %v5409_v41 = vadd.f32 %v4048_v35, %v4047_v54  ;;  %v4137_v53 = vadd.f32 %v4136_v27, %v4135_v40  ;;  %v6939_v9 = vmul.u32 3266489909, %v5311_v57 }
 0x157   : > { %v5421_v25 = vxor.u32 %v2392_v62, %v2360_v55  ;;  %v5424_v27 = vxor.u32 %v2393_v8, %v2361_v47  ;;  %v2301_v40 = vshrl.u32 %v2269_v58, 16  ;;  %v2174_v21 = vmul.u32 128, %v2140_v37 }
 0x158   : > { %v5415_v18 = vadd.f32 %v4137_v53, %v1536_v34  ;;  %v5419_v11 = vxor.u32 %v2483_v49, %v6939_v9  ;;  %v6940_v15 = vmul.u32 3266489909, %v5314_v14  ;;  %v6941_v29 = vmul.u32 3266489909, %v5336_v5 }
 0x159   : > { %v5434_v57 = vxor.u32 %v2486_v30, %v2454_v43  ;;  %v2363_v55 = vmul.u32 2246822507, %v2331_v51  ;;  %v5436_v34 = vxor.u32 %v2487_v38, %v2455_v44  ;;  %v2394_v8 = vshrl.u32 %v2362_v32, 13 }
 0x15a   : > { %v4050_v59 = vpop.f32.mrb[44].mxu0  ;;  %v4138_v56 = vpop.f32.mrb[44].mxu1  ;;  %v5428_v3 = vxor.u32 %v2484_v36, %v6940_v15  ;;  %v5432_v54 = vxor.u32 %v2485_v6, %v6941_v29  ;;  %v2332_v47 = vxor.u32 %v2300_v52, %v2268_v1  ;;  %v5439_v37 = vadd.s32 %v2173_v46, %v5183_v31 }
 0x15b   : > { %6943 = vst [vmem:[#allocation24_spill] sm:$0xff] %v5434_v57  ;;  %v4051_v49 = vpop.f32.mrb[45].mxu0  ;;  %v4139_v62 = vpop.f32.mrb[45].mxu1  ;;  %6944 = vst [vmem:[#allocation25_spill] sm:$0xff] %v5436_v34  ;;  %v1541_v14 = vadd.f32 %v5289_v63, %v5202_v39  ;;  %v2456_v43 = vmul.u32 3266489909, %v5421_v25  ;;  %v1544_v30 = vadd.f32 %v5304_v22, %v5202_v39  ;;  %v5449_v38 = vxor.u32 %v2301_v40, %v2269_v58 }
 0x15c   : > { %6942 = vst [vmem:[#allocation23_spill] sm:$0xff] %v5432_v54  ;;  %6945 = vst [vmem:[#allocation26_spill] sm:$0xff] %v5439_v37  ;;  %v5443_v36 = vadd.f32 %v4051_v49, %v4050_v59  ;;  %v4140_v5 = vadd.f32 %v4139_v62, %v4138_v56  ;;  %v4053_v6 = vpop.f32.mrb[46].mxu0  ;;  %v4141_v53 = vpop.f32.mrb[46].mxu1  ;;  %v2457_v1 = vmul.u32 3266489909, %v5424_v27  ;;  %v5452_v46 = vadd.s32 %v2174_v21, %v5183_v31 }
 0x15d   : > { %v4054_v44 = vpop.f32.mrb[47].mxu0  ;;  %v4142_v51 = vpop.f32.mrb[47].mxu1  ;;  %v2395_v59 = vshrl.u32 %v2363_v55, 13  ;;  %v5459_v56 = vxor.u32 %v2394_v8, %v2362_v32  ;;  %v2364_v22 = vmul.u32 2246822507, %v2332_v47  ;;  %v2141_v40 = vadd.s32 112, %v5167_v16 }
 0x15e   : > { %6946 = vst [vmem:[#allocation27_spill] sm:$0xff] %v5452_v46  ;;  %v5454_v63 = vadd.f32 %v4140_v5, %v1541_v14  ;;  %v5456_v52 = vadd.f32 %v4054_v44, %v4053_v6  ;;  %v4143_v9 = vadd.f32 %v4142_v51, %v4141_v53  ;;  %v2237_v15 = vadd.s32 2654435769, %v5439_v37 }
 0x15f   : > { %v2365_v49 = vmul.u32 2246822507, %v5449_v38  ;;  %v2238_v62 = vadd.s32 2654435769, %v5452_v46  ;;  %v2142_v32 = vadd.s32 120, %v5167_v16  ;;  %v2488_v5 = vshrl.u32 %v2456_v43, 16 }
 0x160   : > { %v5462_v29 = vadd.f32 %v4143_v9, %v1544_v30  ;;  %v2489_v6 = vshrl.u32 %v2457_v1, 16  ;;  %v5472_v53 = vxor.u32 %v2395_v59, %v2363_v55  ;;  %v1549_v30 = vadd.f32 %v5322_v13, %v5202_v39 }
 0x161   : > { %v2396_v38 = vshrl.u32 %v2364_v22, 13  ;;  %v2270_v21 = vxor.u32 %v5224_v4, %v2237_v15  ;;  %v1552_v27 = vadd.f32 %v5331_v50, %v5202_v39  ;;  %v2175_v46 = vmul.u32 128, %v2141_v40 }
 0x162   : > { %6947 = vst [vmem:[#allocation28_spill] sm:$0xff] %v5462_v29  ;;  %v4144_v8 = vpop.f32.mrb[48].mxu1  ;;  %v4208_v47 = vpop.f32.mrb[48].mxu0  ;;  %v2397_v37 = vshrl.u32 %v2365_v49, 13  ;;  %v2271_v13 = vxor.u32 %v5224_v4, %v2238_v62  ;;  %v2176_v34 = vmul.u32 128, %v2142_v32  ;;  %v2143_v57 = vadd.s32 128, %v5167_v16 }
 0x163   : > { %v4145_v44 = vpop.f32.mrb[49].mxu1  ;;  %v4209_v51 = vpop.f32.mrb[49].mxu0  ;;  %v5487_v50 = vxor.u32 %v2488_v5, %v2456_v43  ;;  %v2302_v40 = vshrl.u32 %v2270_v21, 16  ;;  %v4770_v43 = vld [vmem:[%s6879_s6 + $0x8] sm:$0xff]   ;;  %v6954_v5 = vmul.u32 3266489909, %v5459_v56 }
 0x164   : > { %v4146_v58 = vadd.f32 %v4145_v44, %v4144_v8  ;;  %v4210_v25 = vadd.f32 %v4209_v51, %v4208_v47  ;;  %v4147_v14 = vpop.f32.mrb[50].mxu1  ;;  %v4211_v35 = vpop.f32.mrb[50].mxu0  ;;  %v5489_v8 = vxor.u32 %v2396_v38, %v2364_v22  ;;  %v2144_v47 = vadd.s32 136, %v5167_v16 }
 0x165   : > { %v4148_v55 = vpop.f32.mrb[51].mxu1  ;;  %v4212_v59 = vpop.f32.mrb[51].mxu0  ;;  %6949 = vst [vmem:[#allocation30_spill] sm:$0xff] %v5487_v50  ;;  %v2303_v22 = vshrl.u32 %v2271_v13, 16  ;;  %v5517_v51 = vxor.u32 %v2397_v37, %v2365_v49  ;;  %v4771_v37 = vld [vmem:[%s6879_s6 + $0x10] sm:$0xff]   ;;  %v2147_v50 = vadd.s32 160, %v5167_v16 }
 0x166   : > { %v5482_v9 = vadd.f32 %v4146_v58, %v1549_v30  ;;  %v4149_v29 = vadd.f32 %v4148_v55, %v4147_v14  ;;  %v4213_v15 = vadd.f32 %v4212_v59, %v4211_v35  ;;  %v5485_v54 = vadd.f32 %v4210_v25, %v5220_v0  ;;  %v4769_v0 = vld [vmem:[%s6879_s6] sm:$0xff]  }
 0x167   : > { %v5498_v58 = vadd.s32 %v2175_v46, %v5183_v31  ;;  %v2145_v35 = vadd.s32 144, %v5167_v16  ;;  %v5507_v25 = vxor.u32 %v2489_v6, %v2457_v1  ;;  %v1557_v46 = vadd.f32 %v5355_v61, %v5202_v39  ;;  %4472 = vmatprep.subr.bf16.mxu0 %v4769_v0 }
 0x168   : > { %6948 = vst [vmem:[#allocation29_spill] sm:$0xff] %v5482_v9  ;;  %v5492_v44 = vadd.f32 %v4149_v29, %v1552_v27  ;;  %v5495_v62 = vadd.f32 %v4213_v15, %v5233_v7  ;;  %v5510_v29 = vadd.s32 %v2176_v34, %v5183_v31  ;;  %v2177_v7 = vmul.u32 128, %v2143_v57  ;;  %4473 = vmatpush3.bf16.msra.mxu0 %v4769_v0 }
 0x169   : > { %6951 = vst [vmem:[#allocation32_spill] sm:$0xff] %v5498_v58  ;;  %6952 = vst [vmem:[#allocation33_spill] sm:$0xff] %v5507_v25  ;;  %v2490_v30 = vshrl.u32 %v6954_v5, 16  ;;  %v5520_v34 = vxor.u32 %v2302_v40, %v2270_v21  ;;  %v2178_v57 = vmul.u32 128, %v2144_v47  ;;  %v2146_v55 = vadd.s32 152, %v5167_v16  ;;  %4474 = vmatprep.subr.bf16.mxu0 %v4770_v43 }
 0x16a   : > { %6950 = vst [vmem:[#allocation31_spill] sm:$0xff] %v5492_v44  ;;  %6953 = vst [vmem:[#allocation34_spill] sm:$0xff] %v5510_v29  ;;  %v4150_v27 = vpop.f32.mrb[52].mxu1  ;;  %v4214_v32 = vpop.f32.mrb[52].mxu0  ;;  %v2239_v44 = vadd.s32 2654435769, %v5498_v58  ;;  %v1560_v21 = vadd.f32 %v5366_v24, %v5202_v39  ;;  %v5529_v47 = vxor.u32 %v2303_v22, %v2271_v13 }
 0x16b   : > { %v4151_v1 = vpop.f32.mrb[53].mxu1  ;;  %v4215_v6 = vpop.f32.mrb[53].mxu0  ;;  %v2179_v5 = vmul.u32 128, %v2145_v35  ;;  %v2240_v0 = vadd.s32 2654435769, %v5510_v29  ;;  %v5543_v58 = vadd.s32 %v2178_v57, %v5183_v31  ;;  %v2180_v13 = vmul.u32 128, %v2146_v55 }
 0x16c   : > { %v4152_v61 = vadd.f32 %v4151_v1, %v4150_v27  ;;  %v4216_v59 = vadd.f32 %v4215_v6, %v4214_v32  ;;  %v4153_v15 = vpop.f32.mrb[54].mxu1  ;;  %v4217_v14 = vpop.f32.mrb[54].mxu0  ;;  %v5533_v27 = vadd.s32 %v2177_v7, %v5183_v31  ;;  %v6901_v24 = vmul.u32 2246822507, %v5520_v34  ;;  %4475 = vmatpush3.bf16.msra.mxu0 %v4770_v43 }
 0x16d   : > { %v4154_v49 = vpop.f32.mrb[55].mxu1  ;;  %v4218_v40 = vpop.f32.mrb[55].mxu0  ;;  %6957 = vst [vmem:[#allocation37_spill] sm:$0xff] %v5543_v58  ;;  %4476 = vmatprep.subr.bf16.mxu0 %v4771_v37  ;;  %v2367_v55 = vmul.u32 2246822507, %v5529_v47  ;;  %v2273_v43 = vxor.u32 %v5224_v4, %v2240_v0  ;;  %v1565_v47 = vadd.f32 %v5401_v19, %v5202_v39  ;;  %v4773_v19 = vld [vmem:[%s6879_s6 + $0x20] sm:$0xff]  }
 0x16e   : > { %6955 = vst [vmem:[#allocation35_spill] sm:$0xff] %v5533_v27  ;;  %v5535_v32 = vadd.f32 %v4152_v61, %v1557_v46  ;;  %v4155_v35 = vadd.f32 %v4154_v49, %v4153_v15  ;;  %v4219_v1 = vadd.f32 %v4218_v40, %v4217_v14  ;;  %v5538_v6 = vadd.f32 %v4216_v59, %v5249_v42  ;;  %v4772_v42 = vld [vmem:[%s6879_s6 + $0x18] sm:$0xff]  }
 0x16f   : > { %v2272_v46 = vxor.u32 %v5224_v4, %v2239_v44  ;;  %v5552_v14 = vadd.s32 %v2179_v5, %v5183_v31  ;;  %v2241_v61 = vadd.s32 2654435769, %v5533_v27  ;;  %v6960_v44 = vmul.u32 3266489909, %v5472_v53 }
 0x170   : > { %6956 = vst [vmem:[#allocation36_spill] sm:$0xff] %v5535_v32  ;;  %v5545_v22 = vadd.f32 %v4155_v35, %v1560_v21  ;;  %v5548_v7 = vadd.f32 %v4219_v1, %v5257_v48  ;;  %v6961_v5 = vmul.u32 3266489909, %v5459_v56  ;;  %v6962_v40 = vmul.u32 3266489909, %v5489_v8  ;;  %4477 = vmatpush3.bf16.msra.mxu0 %v4771_v37 }
 0x171   : > { %6959 = vst [vmem:[#allocation39_spill] sm:$0xff] %v5552_v14  ;;  %v2491_v15 = vshrl.u32 %v6960_v44, 16  ;;  %v2398_v57 = vshrl.u32 %v6901_v24, 13  ;;  %v2242_v38 = vadd.s32 2654435769, %v5543_v58  ;;  %v5576_v44 = vadd.s32 %v2180_v13, %v5183_v31  ;;  %4478 = vmatprep.subr.bf16.mxu0 %v4772_v42 }
 0x172   : > { %6958 = vst [vmem:[#allocation38_spill] sm:$0xff] %v5545_v22  ;;  %v4156_v48 = vpop.f32.mrb[56].mxu1  ;;  %v4220_v59 = vpop.f32.mrb[56].mxu0  ;;  %v5565_v21 = vxor.u32 %v2490_v30, %v6961_v5  ;;  %v2492_v35 = vshrl.u32 %v6962_v40, 16  ;;  %v2304_v27 = vshrl.u32 %v2272_v46, 16  ;;  %v1568_v24 = vadd.f32 %v5409_v41, %v5202_v39 }
 0x173   : > { %v4157_v0 = vpop.f32.mrb[57].mxu1  ;;  %v4221_v1 = vpop.f32.mrb[57].mxu0  ;;  %6963 = vst [vmem:[#allocation40_spill] sm:$0xff] %v5576_v44  ;;  %v2243_v40 = vadd.s32 2654435769, %v5552_v14  ;;  %v2399_v13 = vshrl.u32 %v2367_v55, 13  ;;  %v2274_v37 = vxor.u32 %v5224_v4, %v2241_v61  ;;  %v2275_v25 = vxor.u32 %v5224_v4, %v2242_v38 }
 0x174   : > { %v4158_v56 = vadd.f32 %v4157_v0, %v4156_v48  ;;  %v4222_v30 = vadd.f32 %v4221_v1, %v4220_v59  ;;  %v4159_v5 = vpop.f32.mrb[58].mxu1  ;;  %v4223_v49 = vpop.f32.mrb[58].mxu0  ;;  %v2305_v22 = vshrl.u32 %v2273_v43, 16  ;;  %v6965_v14 = vmul.u32 3266489909, %v5472_v53  ;;  %4479 = vmatpush3.bf16.msra.mxu0 %v4772_v42  ;;  %v4774_v53 = vld [vmem:[%s6879_s6 + $0x28] sm:$0xff]  }
 0x175   : > { %v4160_v58 = vpop.f32.mrb[59].mxu1  ;;  %v4224_v29 = vpop.f32.mrb[59].mxu0  ;;  %v2244_v41 = vadd.s32 2654435769, %v5576_v44  ;;  %4480 = vmatprep.subr.bf16.mxu0 %v4773_v19 }
 0x176   : > { %v5585_v48 = vadd.f32 %v4158_v56, %v1565_v47  ;;  %v4161_v59 = vadd.f32 %v4160_v58, %v4159_v5  ;;  %v4225_v0 = vadd.f32 %v4224_v29, %v4223_v49  ;;  %v5588_v1 = vadd.f32 %v4222_v30, %v5275_v23 }
 0x177   : > { %v5592_v32 = vxor.u32 %v2491_v15, %v6965_v14  ;;  %v5602_v58 = vxor.u32 %v2304_v27, %v2272_v46  ;;  %v2276_v23 = vxor.u32 %v5224_v4, %v2243_v40  ;;  %v5609_v38 = vxor.u32 %v2305_v22, %v2273_v43 }
 0x178   : > { %6964 = vst [vmem:[#allocation41_spill] sm:$0xff] %v5585_v48  ;;  %v5597_v9 = vadd.f32 %v4161_v59, %v1568_v24  ;;  %v5600_v61 = vadd.f32 %v4225_v0, %v5281_v33  ;;  %v2306_v14 = vshrl.u32 %v2274_v37, 16  ;;  %v2148_v24 = vadd.s32 168, %v5167_v16  ;;  %4481 = vmatpush3.bf16.msra.mxu0 %v4773_v19 }
 0x179   : > { %v6967_v33 = vmul.u32 3266489909, %v5517_v51  ;;  %v6968_v46 = vmul.u32 3266489909, %v5489_v8  ;;  %v5622_v30 = vxor.u32 %v2399_v13, %v2367_v55  ;;  %v1573_v22 = vadd.f32 %v5443_v36, %v5202_v39  ;;  %4482 = vmatprep.subr.bf16.mxu0 %v4774_v53  ;;  %v4775_v55 = vld [vmem:[%s6879_s6 + $0x30] sm:$0xff]  }
 0x17a   : > { %6966 = vst [vmem:[#allocation42_spill] sm:$0xff] %v5597_v9  ;;  %v4162_v42 = vpop.f32.mrb[60].mxu1  ;;  %v4226_v15 = vpop.f32.mrb[60].mxu0  ;;  %v6969_v47 = vmul.u32 2246822507, %v5520_v34  ;;  %v2307_v40 = vshrl.u32 %v2275_v25, 16  ;;  %v2277_v59 = vxor.u32 %v5224_v4, %v2244_v41  ;;  %v1576_v36 = vadd.f32 %v5456_v52, %v5202_v39 }
 0x17b   : > { %v2493_v27 = vshrl.u32 %v6967_v33, 16  ;;  %v5616_v49 = vxor.u32 %v2492_v35, %v6968_v46  ;;  %v4163_v43 = vpop.f32.mrb[61].mxu1  ;;  %v4227_v5 = vpop.f32.mrb[61].mxu0  ;;  %v2181_v0 = vmul.u32 128, %v2147_v50  ;;  %v2368_v34 = vmul.u32 2246822507, %v5602_v58 }
 0x17c   : > { %v5620_v56 = vxor.u32 %v2398_v57, %v6969_v47  ;;  %v4164_v33 = vadd.f32 %v4163_v43, %v4162_v42  ;;  %v4228_v8 = vadd.f32 %v4227_v5, %v4226_v15  ;;  %v4165_v35 = vpop.f32.mrb[62].mxu1  ;;  %v4229_v46 = vpop.f32.mrb[62].mxu0  ;;  %v2308_v57 = vshrl.u32 %v2276_v23, 16  ;;  %4483 = vmatpush3.bf16.msra.mxu0 %v4774_v53 }
 0x17d   : > { %v4166_v13 = vpop.f32.mrb[63].mxu1  ;;  %v4230_v47 = vpop.f32.mrb[63].mxu0  ;;  %v2369_v50 = vmul.u32 2246822507, %v5609_v38  ;;  %v5634_v19 = vxor.u32 %v2306_v14, %v2274_v37  ;;  %v2182_v41 = vmul.u32 128, %v2148_v24  ;;  %v5642_v29 = vxor.u32 %v2307_v40, %v2275_v25  ;;  %4484 = vmatprep.subr.bf16.mxu0 %v4775_v55 }
 0x17e   : > { %v5636_v42 = vadd.f32 %v4164_v33, %v1573_v22  ;;  %v4167_v15 = vadd.f32 %v4166_v13, %v4165_v35  ;;  %v4231_v58 = vadd.f32 %v4230_v47, %v4229_v46  ;;  %v5639_v43 = vadd.f32 %v4228_v8, %v5302_v10  ;;  %v4776_v10 = vld [vmem:[%s6879_s6 + $0x38] sm:$0xff]  }
 0x17f   : > { %v2309_v44 = vshrl.u32 %v2277_v59, 16  ;;  %v5645_v52 = vadd.s32 %v2181_v0, %v5183_v31  ;;  %v5652_v14 = vxor.u32 %v2308_v57, %v2276_v23  ;;  %v2149_v24 = vadd.s32 176, %v5167_v16 }
 0x180   : > { %6970 = vst [vmem:[#allocation43_spill] sm:$0xff] %v5636_v42  ;;  %v5647_v38 = vadd.f32 %v4167_v15, %v1576_v36  ;;  %v5650_v37 = vadd.f32 %v4231_v58, %v5307_v2  ;;  %v2400_v22 = vshrl.u32 %v2368_v34, 13  ;;  %v5660_v40 = vadd.s32 %v2182_v41, %v5183_v31  ;;  %4485 = vmatpush3.bf16.msra.mxu0 %v4775_v55 }
 0x181   : > { %6971 = vst [vmem:[#allocation44_spill] sm:$0xff] %v5645_v52  ;;  %v2150_v53 = vadd.s32 184, %v5167_v16  ;;  %v5665_v2 = vadd.f32 %v5165_v12, %v5202_v39  ;;  %v2401_v8 = vshrl.u32 %v2369_v50, 13  ;;  %v2370_v35 = vmul.u32 2246822507, %v5634_v19  ;;  %4486 = vmatprep.subr.bf16.mxu0 %v4776_v10 }
 0x182   : > { %6972 = vst [vmem:[#allocation45_spill] sm:$0xff] %v5647_v38  ;;  %6973 = vst [vmem:[#allocation46_spill] sm:$0xff] %v5660_v40  ;;  %v4168_v23 = vpop.f32.mrb[64].mxu1  ;;  %v4232_v0 = vpop.f32.mrb[64].mxu0  ;;  %v6974_v36 = vmul.u32 3266489909, %v5517_v51  ;;  %v5674_v41 = vxor.u32 %v2309_v44, %v2277_v59 }
 0x183   : > { %v4169_v46 = vpop.f32.mrb[65].mxu1  ;;  %v4233_v57 = vpop.f32.mrb[65].mxu0  ;;  %v2371_v47 = vmul.u32 2246822507, %v5642_v29  ;;  %v2245_v12 = vadd.s32 2654435769, %v5645_v52 }
 0x184   : > { %v5671_v13 = vxor.u32 %v2493_v27, %v6974_v36  ;;  %v4170_v15 = vadd.f32 %v4169_v46, %v4168_v23  ;;  %v4234_v58 = vadd.f32 %v4233_v57, %v4232_v0  ;;  %v4171_v25 = vpop.f32.mrb[66].mxu1  ;;  %v4235_v33 = vpop.f32.mrb[66].mxu0  ;;  %v2372_v5 = vmul.u32 2246822507, %v5652_v14  ;;  %4487 = vmatpush3.bf16.msra.mxu0 %v4776_v10  ;;  %v6981_v10 = vld [vmem:[#allocation4_spill] sm:$0xff] }
 0x185   : > { %v2183_v19 = vmul.u32 128, %v2149_v24  ;;  %v4172_v38 = vpop.f32.mrb[67].mxu1  ;;  %v4236_v42 = vpop.f32.mrb[67].mxu0  ;;  %v5679_v27 = vxor.u32 %v2400_v22, %v2368_v34  ;;  %v2246_v44 = vadd.s32 2654435769, %v5660_v40  ;;  %v2184_v29 = vmul.u32 128, %v2150_v53 }
 0x186   : > { %v5683_v59 = vadd.f32 %v4170_v15, %v5371_v28  ;;  %v4173_v55 = vadd.f32 %v4172_v38, %v4171_v25  ;;  %v4237_v23 = vadd.f32 %v4236_v42, %v4235_v33  ;;  %v5686_v0 = vadd.f32 %v4234_v58, %v5329_v20  ;;  %v6977_v22 = vld [vmem:[#allocation17_spill] sm:$0xff] }
 0x187   : > { %v5688_v14 = vxor.u32 %v2401_v8, %v2369_v50  ;;  %v2402_v24 = vshrl.u32 %v2370_v35, 13  ;;  %v2373_v46 = vmul.u32 2246822507, %v5674_v41  ;;  %v2278_v57 = vxor.u32 %v5224_v4, %v2245_v12 }
 0x188   : > { %6975 = vst [vmem:[#allocation47_spill] sm:$0xff] %v5683_v59  ;;  %v5693_v34 = vadd.f32 %v4173_v55, %v5377_v60  ;;  %v5696_v53 = vadd.f32 %v4237_v23, %v6977_v22  ;;  %v2403_v28 = vshrl.u32 %v2371_v47, 13  ;;  %v5699_v42 = vadd.s32 %v2183_v19, %v5183_v31 }
 0x189   : > { %v2404_v50 = vshrl.u32 %v2372_v5, 13  ;;  %v2279_v38 = vxor.u32 %v5224_v4, %v2246_v44  ;;  %v5704_v25 = vadd.s32 %v2184_v29, %v5183_v31  ;;  %v5708_v33 = vadd.f32 %v6981_v10, %v5202_v39 }
 0x18a   : > { %6976 = vst [vmem:[#allocation48_spill] sm:$0xff] %v5693_v34  ;;  %6978 = vst [vmem:[#allocation17_spill] sm:$0xff] %v5696_v53  ;;  %v4174_v60 = vpop.f32.mrb[68].mxu1  ;;  %v4238_v8 = vpop.f32.mrb[68].mxu0  ;;  %v6982_v36 = vmul.u32 3266489909, %v5620_v56  ;;  %v5716_v29 = vxor.u32 %v2402_v24, %v2370_v35  ;;  %v5718_v40 = vxor.u32 %v2403_v28, %v2371_v47 }
 0x18b   : > { %6979 = vst [vmem:[#allocation49_spill] sm:$0xff] %v5699_v42  ;;  %6980 = vst [vmem:[#allocation50_spill] sm:$0xff] %v5704_v25  ;;  %v6983_v12 = vmul.u32 3266489909, %v5622_v30  ;;  %v2464_v58 = vmul.u32 3266489909, %v5679_v27  ;;  %v5721_v34 = vxor.u32 %v2404_v50, %v2372_v5 }
 0x18c   : > { %v2494_v41 = vshrl.u32 %v6982_v36, 16  ;;  %v4175_v19 = vpop.f32.mrb[69].mxu1  ;;  %v4239_v55 = vpop.f32.mrb[69].mxu0  ;;  %v2405_v23 = vshrl.u32 %v2373_v46, 13  ;;  %v2310_v22 = vshrl.u32 %v2278_v57, 16  ;;  %v2311_v27 = vshrl.u32 %v2279_v38, 16 }
 0x18d   : > { %v2495_v15 = vshrl.u32 %v6983_v12, 16  ;;  %v4176_v39 = vadd.f32 %v4175_v19, %v4174_v60  ;;  %v4240_v10 = vadd.f32 %v4239_v55, %v4238_v8  ;;  %v4177_v20 = vpop.f32.mrb[70].mxu1  ;;  %v4241_v51 = vpop.f32.mrb[70].mxu0  ;;  %v2247_v36 = vadd.s32 2654435769, %v5699_v42  ;;  %v6984_v24 = vld [vmem:[#allocation21_spill] sm:$0xff] }
 0x18e   : > { %v4178_v52 = vpop.f32.mrb[71].mxu1  ;;  %v4242_v12 = vpop.f32.mrb[71].mxu0  ;;  %v2248_v59 = vadd.s32 2654435769, %v5704_v25  ;;  %v2151_v35 = vadd.s32 192, %v5167_v16  ;;  %v6986_v19 = vld [vmem:[#allocation20_spill] sm:$0xff]  ;;  %v5733_v9 = vxor.u32 %v2405_v23, %v2373_v46  ;;  %v2342_v5 = vxor.u32 %v2310_v22, %v2278_v57 }
 0x18f   : > { %v5726_v44 = vadd.f32 %v4176_v39, %v6984_v24  ;;  %v4179_v60 = vadd.f32 %v4178_v52, %v4177_v20  ;;  %v4243_v8 = vadd.f32 %v4242_v12, %v4241_v51  ;;  %v5729_v55 = vadd.f32 %v4240_v10, %v6986_v19  ;;  %v6989_v25 = vld [vmem:[#allocation22_spill] sm:$0xff]  ;;  %v4777_v46 = vld [vmem:[%s6876_s3] ss:$0 sm:$0xff] }
 0x190   : > { %v2496_v47 = vshrl.u32 %v2464_v58, 16  ;;  %v6987_v28 = vmul.u32 3266489909, %v5688_v14  ;;  %v2280_v39 = vxor.u32 %v5224_v4, %v2247_v36  ;;  %v2152_v52 = vadd.s32 200, %v5167_v16 }
 0x191   : > { %6985 = vst [vmem:[#allocation4_spill] sm:$0xff] %v5726_v44  ;;  %v5736_v50 = vadd.f32 %v4179_v60, %v5413_v26  ;;  %v5739_v48 = vadd.f32 %v4243_v8, %v6989_v25  ;;  %v2466_v51 = vmul.u32 3266489909, %v5716_v29  ;;  %v5744_v20 = vxor.u32 %v2311_v27, %v2279_v38  ;;  %v6991_v26 = vld [vmem:[#allocation5_spill] sm:$0xff]  ;;  %v6992_v25 = vld [vmem:[#allocation6_spill] sm:$0xff] }
 0x192   : > { %v2497_v42 = vshrl.u32 %v6987_v28, 16  ;;  %v2281_v10 = vxor.u32 %v5224_v4, %v2248_v59  ;;  %v2185_v12 = vmul.u32 128, %v2151_v35  ;;  %v5751_v57 = vadd.f32 %v4777_v46, %v6991_v26  ;;  %v4180_v22 = vpop.f32.mrb[72].mxu1  ;;  %v4244_v36 = vpop.f32.mrb[72].mxu0 }
 0x193   : > { %6988 = vst [vmem:[#allocation21_spill] sm:$0xff] %v5736_v50  ;;  %6990 = vst [vmem:[#allocation20_spill] sm:$0xff] %v5739_v48  ;;  %v5754_v23 = vadd.f32 %v4777_v46, %v6992_v25  ;;  %v2467_v24 = vmul.u32 3266489909, %v5718_v40  ;;  %v2468_v38 = vmul.u32 3266489909, %v5721_v34  ;;  %v5767_v48 = vxor.u32 %v2496_v47, %v2464_v58 }
 0x194   : > { %v4181_v29 = vpop.f32.mrb[73].mxu1  ;;  %v4245_v27 = vpop.f32.mrb[73].mxu0  ;;  %v6993_v59 = vmul.u32 3266489909, %v5620_v56  ;;  %v6994_v60 = vmul.u32 3266489909, %v5622_v30  ;;  %v5771_v30 = vadd.s32 %v2185_v12, %v5183_v31 }
 0x195   : > { %v2469_v19 = vmul.u32 3266489909, %v5733_v9  ;;  %v2374_v28 = vmul.u32 2246822507, %v2342_v5  ;;  %v4182_v46 = vadd.f32 %v4181_v29, %v4180_v22  ;;  %v4246_v26 = vadd.f32 %v4245_v27, %v4244_v36  ;;  %v4183_v25 = vpop.f32.mrb[74].mxu1  ;;  %v4247_v50 = vpop.f32.mrb[74].mxu0 }
 0x196   : > { %v5760_v35 = vxor.u32 %v2494_v41, %v6993_v59  ;;  %v5764_v8 = vxor.u32 %v2495_v15, %v6994_v60  ;;  %v2312_v40 = vshrl.u32 %v2280_v39, 16  ;;  %v2186_v44 = vmul.u32 128, %v2152_v52  ;;  %v4184_v34 = vpop.f32.mrb[75].mxu1  ;;  %v4248_v53 = vpop.f32.mrb[75].mxu0  ;;  %6995 = vst [vmem:[#allocation22_spill] sm:$0xff] %v5771_v30 }
 0x197   : > { %v2375_v56 = vmul.u32 2246822507, %v5744_v20  ;;  %v2313_v41 = vshrl.u32 %v2281_v10, 16  ;;  %v5774_v15 = vadd.f32 %v4182_v46, %v5665_v2  ;;  %v4185_v9 = vadd.f32 %v4184_v34, %v4183_v25 }
 0x198   : > { %v4249_v5 = vadd.f32 %v4248_v53, %v4247_v50  ;;  %v5777_v22 = vadd.f32 %v4246_v26, %v5407_v17  ;;  %v2498_v36 = vshrl.u32 %v2466_v51, 16  ;;  %v2499_v52 = vshrl.u32 %v2467_v24, 16 }
 0x199   : > { %6996 = vst [vmem:[#allocation5_spill] sm:$0xff] %v5774_v15  ;;  %v2500_v29 = vshrl.u32 %v2468_v38, 16  ;;  %v2406_v27 = vshrl.u32 %v2374_v28, 13  ;;  %v5780_v58 = vadd.f32 %v4185_v9, %v5708_v33  ;;  %v5785_v20 = vxor.u32 %v2312_v40, %v2280_v39 }
 0x19a   : > { %v5783_v47 = vadd.f32 %v4249_v5, %v5415_v18  ;;  %v5788_v2 = vadd.s32 %v2186_v44, %v5183_v31  ;;  %v2501_v12 = vshrl.u32 %v2469_v19, 16  ;;  %v2407_v53 = vshrl.u32 %v2375_v56, 13  ;;  %v4186_v59 = vpop.f32.mrb[76].mxu1  ;;  %v4250_v60 = vpop.f32.mrb[76].mxu0 }
 0x19b   : > { %6997 = vst [vmem:[#allocation6_spill] sm:$0xff] %v5780_v58  ;;  %v5790_v50 = vxor.u32 %v2313_v41, %v2281_v10  ;;  %v2249_v17 = vadd.s32 2654435769, %v5771_v30  ;;  %v6999_v18 = vmul.u32 3266489909, %v5688_v14  ;;  %v4187_v44 = vpop.f32.mrb[77].mxu1  ;;  %v5800_v40 = vxor.u32 %v2498_v36, %v2466_v51 }
 0x19c   : > { %6998 = vst [vmem:[#allocation51_spill] sm:$0xff] %v5788_v2  ;;  %v4251_v25 = vpop.f32.mrb[77].mxu0  ;;  %v5802_v10 = vxor.u32 %v2499_v52, %v2467_v24  ;;  %v5804_v34 = vxor.u32 %v2500_v29, %v2468_v38  ;;  %v5806_v41 = vxor.u32 %v2406_v27, %v2374_v28  ;;  %v4188_v9 = vadd.f32 %v4187_v44, %v4186_v59  ;;  %v4189_v46 = vpop.f32.mrb[78].mxu1 }
 0x19d   : > { %v5797_v26 = vxor.u32 %v2497_v42, %v6999_v18  ;;  %v4252_v5 = vadd.f32 %v4251_v25, %v4250_v60  ;;  %v4253_v33 = vpop.f32.mrb[78].mxu0  ;;  %v2376_v14 = vmul.u32 2246822507, %v5785_v20  ;;  %v2250_v42 = vadd.s32 2654435769, %v5788_v2  ;;  %v4190_v18 = vpop.f32.mrb[79].mxu1 }
 0x19e   : > { %v4254_v39 = vpop.f32.mrb[79].mxu0  ;;  %v5810_v30 = vxor.u32 %v2501_v12, %v2469_v19  ;;  %v5812_v51 = vxor.u32 %v2407_v53, %v2375_v56  ;;  %v2377_v24 = vmul.u32 2246822507, %v5790_v50  ;;  %v2282_v38 = vxor.u32 %v5224_v4, %v2249_v17  ;;  %v7015_v60 = vld [vmem:[#allocation28_spill] sm:$0xff] }
 0x19f   : > { %v5817_v28 = vadd.f32 %v4188_v9, %v5751_v57  ;;  %v4191_v36 = vadd.f32 %v4190_v18, %v4189_v46  ;;  %v4255_v52 = vadd.f32 %v4254_v39, %v4253_v33  ;;  %v7001_v29 = vshrl.u32 %v5392_v45, 31  ;;  %v7010_v45 = vld [vmem:[#allocation23_spill] sm:$0xff] }
 0x1a0   : > { %v7004_v19 = vshrl.u32 %v5419_v11, 31  ;;  %v5832_v20 = vadd.f32 %v4252_v5, %v5454_v63  ;;  %v7007_v57 = vshrl.u32 %v5428_v3, 31  ;;  %v7011_v53 = vshrl.u32 %v7010_v45, 31 }
 0x1a1   : > { %7000 = vst [vmem:[#allocation52_spill] sm:$0xff] %v5817_v28  ;;  %vm5821_vm0 = vcmp.eq.s32.totalorder %v7001_v29, 0  ;;  %v6914_v17 = vmul.u32 3266489909, %v5806_v41  ;;  %v2153_v59 = vadd.s32 208, %v5167_v16  ;;  %v2154_v63 = vadd.s32 216, %v5167_v16 }
 0x1a2   : > { %vm5827_vm1 = vcmp.eq.s32.totalorder %v7004_v19, 0  ;;  %vm5836_vm2 = vcmp.eq.s32.totalorder %v7007_v57, 0  ;;  %vm5842_vm3 = vcmp.eq.s32.totalorder %v7011_v53, 0  ;;  %v5851_v3 = vadd.f32 %v4191_v36, %v5754_v23  ;;  %v4256_v18 = vpop.f32.mrb[80].mxu0  ;;  %v4394_v29 = vpop.f32.mrb[80].mxu1 }
 0x1a3   : > { %v5854_v46 = vadd.f32 %v4255_v52, %v7015_v60  ;;  %v2408_v33 = vshrl.u32 %v2376_v14, 13  ;;  %v5857_v39 = vxor.u32 %v5224_v4, %v2250_v42  ;;  %v2314_v5 = vshrl.u32 %v2282_v38, 16  ;;  %v4257_v57 = vpop.f32.mrb[81].mxu0  ;;  %v1967_v45 = vpop.f32.mrb[81].mxu1  ;;  %vm3861_vm8 = vmpackc.low %vm5827_vm1, %vm5821_vm0 }
 0x1a4   : > { %7014 = vst [vmem:[#allocation23_spill] sm:$0xff] %v5851_v3  ;;  %v2409_v36 = vshrl.u32 %v2377_v24, 13  ;;  %v1976_v52 = vadd.f32 %v4394_v29, %v5538_v6  ;;  %v2502_v42 = vshrl.u32 %v6914_v17, 16  ;;  %v2187_v53 = vmul.u32 128, %v2153_v59  ;;  %v4259_v44 = vpop.f32.mrb[82].mxu0  ;;  %v4395_v11 = vpop.f32.mrb[82].mxu1  ;;  %vm3864_vm9 = vmpackc.low %vm5842_vm3, %vm5836_vm2 }
 0x1a5   : > { %v2188_v60 = vmul.u32 128, %v2154_v63  ;;  %v4258_v25 = vadd.f32 %v4257_v57, %v4256_v18  ;;  %v1968_v9 = vadd.f32 %v1967_v45, %v5485_v54  ;;  %v5868_v2 = vxor.u32 %v2408_v33, %v2376_v14  ;;  %v4260_v3 = vpop.f32.mrb[83].mxu0  ;;  %v1970_v6 = vpop.f32.mrb[83].mxu1  ;;  %v7016_v54 = vld [vmem:[#allocation24_spill] sm:$0xff]  ;;  %v7020_v33 = vld [vmem:[#allocation25_spill] sm:$0xff] }
 0x1a6   : > { %v2315_v19 = vshrl.u32 %v5857_v39, 16  ;;  %v1979_v23 = vadd.f32 %v4395_v11, %v5548_v7  ;;  %v5872_v29 = vxor.u32 %v2314_v5, %v2282_v38  ;;  %v2155_v28 = vadd.s32 224, %v5167_v16  ;;  %v7024_v38 = vld [vmem:[#allocation29_spill] sm:$0xff] }
 0x1a7   : > { %v2156_v59 = vadd.s32 232, %v5167_v16  ;;  %v4261_v63 = vadd.f32 %v4260_v3, %v4259_v44  ;;  %v1971_v18 = vadd.f32 %v1970_v6, %v5495_v62  ;;  %v7017_v57 = vshrl.u32 %v7016_v54, 31  ;;  %v7026_v62 = vld [vmem:[#allocation30_spill] sm:$0xff] }
 0x1a8   : > { %v7021_v45 = vshrl.u32 %v7020_v33, 31  ;;  %v5890_v11 = vadd.f32 %v4258_v25, %v7024_v38  ;;  %v5892_v5 = vxor.u32 %v2409_v36, %v2377_v24  ;;  %v2096_v3 = vmax.f32 %v1976_v52, 0.0  ;;  %v7034_v36 = vld [vmem:[#allocation31_spill] sm:$0xff] }
 0x1a9   : > { %vm5879_vm4 = vcmp.eq.s32.totalorder %v7017_v57, 0  ;;  %v2097_v44 = vmax.f32 %v1979_v23, 0.0  ;;  %v7027_v6 = vshrl.u32 %v7026_v62, 31  ;;  %v7030_v57 = vld [vmem:[#allocation33_spill] sm:$0xff]  ;;  %v5910_v24 = vadd.s32 %v2188_v60, %v5183_v31 }
 0x1aa   : > { %vm5885_vm5 = vcmp.eq.s32.totalorder %v7021_v45, 0  ;;  %7025 = vst [vmem:[#allocation28_spill] sm:$0xff] %v5890_v11  ;;  %v7031_v17 = vshrl.u32 %v7030_v57, 31  ;;  %v5907_v45 = vadd.s32 %v2187_v53, %v5183_v31  ;;  %v2094_v25 = vmax.f32 %v1968_v9, 0.0  ;;  %v4262_v60 = vpop.f32.mrb[84].mxu0  ;;  %v4398_v58 = vpop.f32.mrb[84].mxu1 }
 0x1ab   : > { %vm5896_vm6 = vcmp.eq.s32.totalorder %v7027_v6, 0  ;;  %v2095_v23 = vmax.f32 %v1971_v18, 0.0  ;;  %v5913_v52 = vadd.f32 %v4261_v63, %v7034_v36  ;;  %v3865_v62 = vpack.c.bf16 %v2097_v44, %v2096_v3  ;;  %v1983_v44 = vpop.f32.mrb[85].mxu1  ;;  %vm3867_vm14 = vmpackc.low %vm5885_vm5, %vm5879_vm4 }
 0x1ac   : > { %vm5902_vm7 = vcmp.eq.s32.totalorder %v7031_v17, 0  ;;  %v2189_v17 = vmul.u32 128, %v2155_v28  ;;  %v2190_v6 = vmul.u32 128, %v2156_v59  ;;  %v2157_v53 = vadd.s32 240, %v5167_v16  ;;  %v4263_v59 = vpop.f32.mrb[85].mxu0  ;;  %v4399_v11 = vpop.f32.mrb[86].mxu1 }
 0x1ad   : > { %7035 = vst [vmem:[#allocation24_spill] sm:$0xff] %v5913_v52  ;;  %v3862_v57 = vpack.c.bf16 %v2095_v23, %v2094_v25  ;;  %v7036_v9 = vmul.u32 3266489909, %v5812_v51  ;;  %v2473_v18 = vmul.u32 3266489909, %v5892_v5  ;;  %v2158_v3 = vadd.s32 248, %v5167_v16  ;;  %vm3870_vm15 = vmpackc.low %vm5902_vm7, %vm5896_vm6 }
 0x1ae   : > { %v1992_v28 = vadd.f32 %v4398_v58, %v5639_v43  ;;  %v7037_v25 = vmul.u32 3266489909, %v5806_v41  ;;  %v2251_v36 = vadd.s32 2654435769, %v5907_v45  ;;  %v2252_v38 = vadd.s32 2654435769, %v5910_v24 }
 0x1af   : > { %v2503_v63 = vshrl.u32 %v7036_v9, 16  ;;  %v4264_v15 = vadd.f32 %v4263_v59, %v4262_v60  ;;  %v1984_v52 = vadd.f32 %v1983_v44, %v5588_v1  ;;  %v4265_v9 = vpop.f32.mrb[86].mxu0  ;;  %4440 = vmatprep.mubr.msk.bf16.mxu1 %vm3861_vm8, %v3862_v57  ;;  %v5943_v16 = vxor.u32 %v2315_v19, %v5857_v39 }
 0x1b0   : > { %v5932_v23 = vxor.u32 %v2502_v42, %v7037_v25  ;;  %v2378_v43 = vmul.u32 2246822507, %v5872_v29  ;;  %v1995_v58 = vadd.f32 %v4399_v11, %v5650_v37  ;;  %v4266_v41 = vpop.f32.mrb[87].mxu0  ;;  %v1986_v42 = vpop.f32.mrb[87].mxu1  ;;  %4441 = vmatmul.mubr.msk.bf16.vlgmr.msra.gmra.mrb[112].mxu1 %vm3864_vm9, %v3865_v62  ;;  %v5953_v1 = vadd.s32 %v2189_v17, %v5183_v31  ;;  %v7044_v62 = vld [vmem:[#allocation36_spill] sm:$0xff] }
 0x1b1   : > { %v5956_v27 = vadd.s32 %v2190_v6, %v5183_v31  ;;  %v2191_v56 = vmul.u32 128, %v2157_v53  ;;  %v4267_v39 = vadd.f32 %v4266_v41, %v4265_v9  ;;  %v1987_v19 = vadd.f32 %v1986_v42, %v5600_v61 }
 0x1b2   : > { %v7038_v37 = vshrl.u32 %v5565_v21, 31  ;;  %v7041_v12 = vshrl.u32 %v5592_v32, 31  ;;  %v5972_v17 = vadd.f32 %v4264_v15, %v7044_v62  ;;  %v2192_v6 = vmul.u32 128, %v2158_v3  ;;  %v4402_v41 = vpop.f32.mrb[88].mxu1 }
 0x1b3   : > { %v2100_v53 = vmax.f32 %v1992_v28, 0.0  ;;  %v2101_v57 = vmax.f32 %v1995_v58, 0.0  ;;  %v7045_v61 = vshrl.u32 %v5616_v49, 31  ;;  %v7048_v60 = vshrl.u32 %v5671_v13, 31  ;;  %v7051_v28 = vld [vmem:[#allocation38_spill] sm:$0xff] }
 0x1b4   : > { %vm5961_vm10 = vcmp.eq.s32.totalorder %v7038_v37, 0  ;;  %vm5967_vm11 = vcmp.eq.s32.totalorder %v7041_v12, 0  ;;  %v2284_v59 = vxor.u32 %v5224_v4, %v2251_v36  ;;  %v2285_v15 = vxor.u32 %v5224_v4, %v2252_v38  ;;  %v4268_v38 = vpop.f32.mrb[88].mxu0 }
 0x1b5   : > { %vm5976_vm12 = vcmp.eq.s32.totalorder %v7045_v61, 0  ;;  %vm5982_vm13 = vcmp.eq.s32.totalorder %v7048_v60, 0  ;;  %v2098_v44 = vmax.f32 %v1984_v52, 0.0  ;;  %v2099_v3 = vmax.f32 %v1987_v19, 0.0  ;;  %v4269_v62 = vpop.f32.mrb[89].mxu0  ;;  %vm3873_vm4 = vmpackc.low %vm5967_vm11, %vm5961_vm10 }
 0x1b6   : > { %v5989_v25 = vadd.f32 %v4267_v39, %v7051_v28  ;;  %v2379_v49 = vmul.u32 2246822507, %v5943_v16  ;;  %v3871_v9 = vpack.c.bf16 %v2101_v57, %v2100_v53  ;;  %v2253_v13 = vadd.s32 2654435769, %v5953_v1  ;;  %v1999_v53 = vpop.f32.mrb[89].mxu1  ;;  %vm3876_vm5 = vmpackc.low %vm5982_vm13, %vm5976_vm12 }
 0x1b7   : > { %v2254_v58 = vadd.s32 2654435769, %v5956_v27  ;;  %v5999_v36 = vadd.s32 %v2191_v56, %v5183_v31  ;;  %v3868_v52 = vpack.c.bf16 %v2099_v3, %v2098_v44  ;;  %v7052_v42 = vmul.u32 3266489909, %v5812_v51  ;;  %v4403_v3 = vpop.f32.mrb[90].mxu1 }
 0x1b8   : > { %v7053_v19 = vmul.u32 3266489909, %v5868_v2  ;;  %v6012_v12 = vadd.s32 %v2192_v6, %v5183_v31  ;;  %v2008_v56 = vadd.f32 %v4402_v41, %v5729_v55  ;;  %v2505_v57 = vshrl.u32 %v2473_v18, 16  ;;  %v7054_v6 = vld [vmem:[#allocation20_spill] sm:$0xff] }
 0x1b9   : > { %v6007_v39 = vxor.u32 %v2503_v63, %v7052_v42  ;;  %v2316_v61 = vshrl.u32 %v2284_v59, 16  ;;  %v2317_v60 = vshrl.u32 %v2285_v15, 16  ;;  %v4270_v44 = vadd.f32 %v4269_v62, %v4268_v38  ;;  %v4271_v63 = vpop.f32.mrb[90].mxu0  ;;  %4444 = vmatprep.mubr.msk.bf16.mxu1 %vm3867_vm14, %v3868_v52  ;;  %v2002_v38 = vpop.f32.mrb[91].mxu1  ;;  %v7055_v42 = vld [vmem:[#allocation17_spill] sm:$0xff] }
 0x1ba   : > { %v2504_v37 = vshrl.u32 %v7053_v19, 16  ;;  %v2000_v51 = vadd.f32 %v1999_v53, %v5686_v0  ;;  %v2410_v31 = vshrl.u32 %v2378_v43, 13  ;;  %v2411_v55 = vshrl.u32 %v2379_v49, 13  ;;  %v4272_v41 = vpop.f32.mrb[91].mxu0  ;;  %4445 = vmatmul.mubr.msk.bf16.gmra.mrb[116].mxu1 %vm3870_vm15, %v3871_v9  ;;  %v7062_v9 = vld [vmem:[#allocation41_spill] sm:$0xff] }
 0x1bb   : > { %v2011_v28 = vadd.f32 %v4403_v3, %v7054_v6  ;;  %v2286_v0 = vxor.u32 %v5224_v4, %v2253_v13  ;;  %v2287_v14 = vxor.u32 %v5224_v4, %v2254_v58  ;;  %v2255_v7 = vadd.s32 2654435769, %v5999_v36 }
 0x1bc   : > { %v4273_v52 = vadd.f32 %v4272_v41, %v4271_v63  ;;  %v2003_v19 = vadd.f32 %v2002_v38, %v7055_v42  ;;  %v7056_v62 = vshrl.u32 %v5760_v35, 31  ;;  %v7059_v33 = vshrl.u32 %v5764_v8, 31 }
 0x1bd   : > { %v6050_v13 = vadd.f32 %v4270_v44, %v7062_v9  ;;  %v2256_v58 = vadd.s32 2654435769, %v6012_v12  ;;  %v2104_v63 = vmax.f32 %v2008_v56, 0.0  ;;  %v2105_v3 = vmax.f32 %v2011_v28, 0.0  ;;  %v7069_v56 = vld [vmem:[#allocation42_spill] sm:$0xff] }
 0x1be   : > { %vm6039_vm0 = vcmp.eq.s32.totalorder %v7056_v62, 0  ;;  %vm6045_vm1 = vcmp.eq.s32.totalorder %v7059_v33, 0  ;;  %v7063_v6 = vshrl.u32 %v5767_v48, 31  ;;  %v7066_v41 = vshrl.u32 %v5797_v26, 31 }
 0x1bf   : > { %v6065_v38 = vxor.u32 %v2316_v61, %v2284_v59  ;;  %v6067_v44 = vxor.u32 %v2317_v60, %v2285_v15  ;;  %v2102_v42 = vmax.f32 %v2000_v51, 0.0  ;;  %v2103_v62 = vmax.f32 %v2003_v19, 0.0  ;;  %v4274_v60 = vpop.f32.mrb[92].mxu0  ;;  %v4406_v51 = vpop.f32.mrb[92].mxu1  ;;  %vm3879_vm10 = vmpackc.low %vm6045_vm1, %vm6039_vm0 }
 0x1c0   : > { %vm6055_vm2 = vcmp.eq.s32.totalorder %v7063_v6, 0  ;;  %vm6061_vm3 = vcmp.eq.s32.totalorder %v7066_v41, 0  ;;  %v6070_v28 = vadd.f32 %v4273_v52, %v7069_v56  ;;  %v6074_v48 = vxor.u32 %v2410_v31, %v2378_v43  ;;  %v4275_v9 = vpop.f32.mrb[93].mxu0  ;;  %v7098_v56 = vld [vmem:[#allocation21_spill] sm:$0xff] }
 0x1c1   : > { %v3877_v33 = vpack.c.bf16 %v2105_v3, %v2104_v63  ;;  %v2318_v26 = vshrl.u32 %v2286_v0, 16  ;;  %v2319_v59 = vshrl.u32 %v2287_v14, 16  ;;  %v2288_v15 = vxor.u32 %v5224_v4, %v2255_v7  ;;  %v2015_v7 = vpop.f32.mrb[93].mxu1  ;;  %vm3882_vm11 = vmpackc.low %vm6061_vm3, %vm6055_vm2 }
 0x1c2   : > { %v3874_v61 = vpack.c.bf16 %v2103_v62, %v2102_v42  ;;  %v2566_v29 = vshrl.u32 %v5932_v23, 31  ;;  %v7070_v43 = vmul.u32 3266489909, %v5868_v2  ;;  %v2289_v52 = vxor.u32 %v5224_v4, %v2256_v58  ;;  %v4277_v2 = vpop.f32.mrb[94].mxu0 }
 0x1c3   : > { %v2024_v19 = vadd.f32 %v4406_v51, %v5832_v20  ;;  %v6094_v63 = vxor.u32 %v2505_v57, %v2473_v18  ;;  %v2380_v3 = vmul.u32 2246822507, %v6065_v38  ;;  %v2381_v6 = vmul.u32 2246822507, %v6067_v44  ;;  %v4278_v57 = vpop.f32.mrb[95].mxu0 }
 0x1c4   : > { %v6088_v31 = vxor.u32 %v2504_v37, %v7070_v43  ;;  %v4276_v41 = vadd.f32 %v4275_v9, %v4274_v60  ;;  %v2016_v42 = vadd.f32 %v2015_v7, %v5777_v22  ;;  %v4407_v37 = vpop.f32.mrb[94].mxu1  ;;  %4448 = vmatprep.mubr.msk.bf16.mxu1 %vm3873_vm4, %v3874_v61  ;;  %v6106_v20 = vxor.u32 %v2411_v55, %v2379_v49  ;;  %v7071_v55 = vld [vmem:[#allocation43_spill] sm:$0xff]  ;;  %v7084_v60 = vld [vmem:[#allocation45_spill] sm:$0xff] }
 0x1c5   : > { %v2474_v5 = vmul.u32 3266489909, %v6074_v48  ;;  %v2027_v18 = vadd.f32 %v4407_v37, %v5854_v46  ;;  %v2018_v58 = vpop.f32.mrb[95].mxu1  ;;  %4449 = vmatmul.mubr.msk.bf16.gmra.mrb[120].mxu1 %vm3876_vm5, %v3877_v33  ;;  %v6115_v22 = vxor.u32 %v2318_v26, %v2286_v0  ;;  %v6117_v11 = vxor.u32 %v2319_v59, %v2287_v14 }
 0x1c6   : > { %v2320_v50 = vshrl.u32 %v2288_v15, 16  ;;  %v4279_v16 = vadd.f32 %v4278_v57, %v4277_v2  ;;  %v2019_v49 = vadd.f32 %v2018_v58, %v5783_v47  ;;  %v6121_v38 = vadd.f32 %v4276_v41, %v7071_v55  ;;  %v4280_v41 = vpop.f32.mrb[96].mxu0 }
 0x1c7   : > { %v7072_v46 = vshrl.u32 %v5800_v40, 31  ;;  %v7075_v21 = vshrl.u32 %v5802_v10, 31  ;;  %v2321_v0 = vshrl.u32 %v2289_v52, 16  ;;  %v2108_v14 = vmax.f32 %v2024_v19, 0.0  ;;  %v4281_v58 = vpop.f32.mrb[97].mxu0 }
 0x1c8   : > { %v2109_v62 = vmax.f32 %v2027_v18, 0.0  ;;  %v7078_v47 = vshrl.u32 %v5804_v34, 31  ;;  %v7081_v40 = vshrl.u32 %v5810_v30, 31  ;;  %v2412_v10 = vshrl.u32 %v2380_v3, 13 }
 0x1c9   : > { %vm6125_vm6 = vcmp.eq.s32.totalorder %v7072_v46, 0  ;;  %vm6131_vm7 = vcmp.eq.s32.totalorder %v7075_v21, 0  ;;  %v2413_v26 = vshrl.u32 %v2381_v6, 13  ;;  %v2106_v59 = vmax.f32 %v2016_v42, 0.0  ;;  %v4410_v42 = vpop.f32.mrb[96].mxu1  ;;  %v4283_v46 = vpop.f32.mrb[98].mxu0 }
 0x1ca   : > { %vm6137_vm8 = vcmp.eq.s32.totalorder %v7078_v47, 0  ;;  %vm6143_vm9 = vcmp.eq.s32.totalorder %v7081_v40, 0  ;;  %v2107_v61 = vmax.f32 %v2019_v49, 0.0  ;;  %v6148_v51 = vadd.f32 %v4279_v16, %v7084_v60  ;;  %v7085_v49 = vld [vmem:[#allocation28_spill] sm:$0xff]  ;;  %vm3885_vm13 = vmpackc.low %vm6131_vm7, %vm6125_vm6 }
 0x1cb   : > { %v2475_v43 = vmul.u32 3266489909, %v6106_v20  ;;  %v3883_v34 = vpack.c.bf16 %v2109_v62, %v2108_v14  ;;  %v2382_v30 = vmul.u32 2246822507, %v6115_v22  ;;  %v6157_v9 = vxor.u32 %v2320_v50, %v2288_v15  ;;  %v2031_v22 = vpop.f32.mrb[97].mxu1  ;;  %v7087_v62 = vld [vmem:[#allocation47_spill] sm:$0xff]  ;;  %vm3888_vm14 = vmpackc.low %vm6143_vm9, %vm6137_vm8 }
 0x1cc   : > { %v2383_v19 = vmul.u32 2246822507, %v6117_v11  ;;  %v3880_v7 = vpack.c.bf16 %v2107_v61, %v2106_v59  ;;  %v2567_v2 = vshrl.u32 %v6007_v39, 31  ;;  %v2568_v37 = vshrl.u32 %v6088_v31, 31  ;;  %v4411_v21 = vpop.f32.mrb[98].mxu1  ;;  %v7090_v60 = vld [vmem:[#allocation48_spill] sm:$0xff] }
 0x1cd   : > { %v6165_v18 = vxor.u32 %v2321_v0, %v2289_v52  ;;  %v2040_v57 = vadd.f32 %v4410_v42, %v5972_v17  ;;  %v2569_v15 = vshrl.u32 %v6094_v63, 31  ;;  %v6169_v11 = vxor.u32 %v2412_v10, %v2380_v3  ;;  %v4284_v52 = vpop.f32.mrb[99].mxu0  ;;  %v2034_v63 = vpop.f32.mrb[99].mxu1  ;;  %v7086_v0 = vld [vmem:[#allocation24_spill] sm:$0xff] }
 0x1ce   : > { %v6171_v50 = vxor.u32 %v2413_v26, %v2381_v6  ;;  %v4282_v16 = vadd.f32 %v4281_v58, %v4280_v41  ;;  %v2032_v55 = vadd.f32 %v2031_v22, %v7085_v49  ;;  %4452 = vmatprep.mubr.msk.bf16.mxu1 %vm3879_vm10, %v3880_v7  ;;  %v2506_v17 = vshrl.u32 %v2474_v5, 16 }
 0x1cf   : > { %v2507_v39 = vshrl.u32 %v2475_v43, 16  ;;  %v2043_v31 = vadd.f32 %v4411_v21, %v5989_v25  ;;  %4453 = vmatmul.mubr.msk.bf16.gmra.mrb[124].mxu1 %vm3882_vm11, %v3883_v34  ;;  %v2414_v54 = vshrl.u32 %v2382_v30, 13  ;;  %v2415_v53 = vshrl.u32 %v2383_v19, 13 }
 0x1d0   : > { %v2384_v3 = vmul.u32 2246822507, %v6157_v9  ;;  %v4285_v6 = vadd.f32 %v4284_v52, %v4283_v46  ;;  %v2035_v14 = vadd.f32 %v2034_v63, %v7086_v0  ;;  %v6192_v47 = vadd.f32 %v4282_v16, %v7087_v62 }
 0x1d1   : > { %vm6196_vm12 = vcmp.eq.s32.totalorder %v2566_v29, 0  ;;  %v2385_v35 = vmul.u32 2246822507, %v6165_v18  ;;  %v2112_v8 = vmax.f32 %v2040_v57, 0.0  ;;  %v2113_v40 = vmax.f32 %v2043_v31, 0.0  ;;  %v4286_v18 = vpop.f32.mrb[100].mxu0 }
 0x1d2   : > { %v2476_v10 = vmul.u32 3266489909, %v6169_v11  ;;  %v2477_v26 = vmul.u32 3266489909, %v6171_v50  ;;  %v2110_v59 = vmax.f32 %v2032_v55, 0.0  ;;  %v2111_v61 = vmax.f32 %v2035_v14, 0.0 }
 0x1d3   : > { %v6204_v34 = vadd.f32 %v4285_v6, %v7090_v60  ;;  %v6208_v23 = vxor.u32 %v2506_v17, %v2474_v5  ;;  %v3889_v29 = vpack.c.bf16 %v2113_v40, %v2112_v8  ;;  %v6214_v9 = vxor.u32 %v2414_v54, %v2382_v30  ;;  %v4414_v57 = vpop.f32.mrb[100].mxu1  ;;  %v4287_v58 = vpop.f32.mrb[101].mxu0 }
 0x1d4   : > { %v6216_v7 = vxor.u32 %v2415_v53, %v2383_v19  ;;  %v2416_v41 = vshrl.u32 %v2384_v3, 13  ;;  %v3886_v42 = vpack.c.bf16 %v2111_v61, %v2110_v59  ;;  %vm6222_vm15 = vcmp.eq.s32.totalorder %v2567_v2, 0  ;;  %v2047_v22 = vpop.f32.mrb[101].mxu1  ;;  %v4289_v55 = vpop.f32.mrb[102].mxu0 }
 0x1d5   : > { %vm6226_vm0 = vcmp.eq.s32.totalorder %v2568_v37, 0  ;;  %v2417_v30 = vshrl.u32 %v2385_v35, 13  ;;  %v2056_v19 = vadd.f32 %v4414_v57, %v6121_v38  ;;  %vm6231_vm1 = vcmp.eq.s32.totalorder %v2569_v15, 0  ;;  %v4415_v46 = vpop.f32.mrb[102].mxu1  ;;  %v4290_v21 = vpop.f32.mrb[103].mxu0  ;;  %vm3891_vm2 = vmpackc.low %vm6222_vm15, %vm6196_vm12 }
 0x1d6   : > { %v2508_v50 = vshrl.u32 %v2476_v10, 16  ;;  %v2509_v16 = vshrl.u32 %v2477_v26, 16  ;;  %v4288_v49 = vadd.f32 %v4287_v58, %v4286_v18  ;;  %v2048_v2 = vadd.f32 %v2047_v22, %v6050_v13  ;;  %4456 = vmatprep.mubr.msk.bf16.mxu1 %vm3885_vm13, %v3886_v42  ;;  %v2050_v17 = vpop.f32.mrb[103].mxu1  ;;  %vm3894_vm3 = vmpackc.low %vm6231_vm1, %vm6226_vm0  ;;  %v7116_v18 = vld [vmem:[#allocation8_spill] sm:$0xff] }
 0x1d7   : > { %v2539_v38 = vxor.u32 %v2507_v39, %v2475_v43  ;;  %v2570_v37 = vshrl.u32 %v6208_v23, 31  ;;  %v2059_v15 = vadd.f32 %v4415_v46, %v6148_v51  ;;  %4457 = vmatmul.mubr.msk.bf16.gmra.mrb[128].mxu1 %vm3888_vm14, %v3889_v29  ;;  %v2478_v13 = vmul.u32 3266489909, %v6214_v9  ;;  %v7097_v43 = vld [vmem:[#allocation4_spill] sm:$0xff]  ;;  %v4418_v59 = vpop.f32.mrb[104].mxu1 }
 0x1d8   : > { %v2479_v44 = vmul.u32 3266489909, %v6216_v7  ;;  %v2448_v32 = vxor.u32 %v2416_v41, %v2384_v3  ;;  %v4291_v31 = vadd.f32 %v4290_v21, %v4289_v55  ;;  %v2051_v20 = vadd.f32 %v2050_v17, %v6070_v28  ;;  %v2063_v60 = vpop.f32.mrb[105].mxu1 }
 0x1d9   : > { %v1911_v39 = vadd.f32 %v4288_v49, %v7097_v43  ;;  %v2449_v52 = vxor.u32 %v2417_v30, %v2385_v35  ;;  %v2116_v51 = vmax.f32 %v2056_v19, 0.0  ;;  %v2117_v63 = vmax.f32 %v2059_v15, 0.0  ;;  %v4292_v35 = vpop.f32.mrb[104].mxu0  ;;  %v4419_v42 = vpop.f32.mrb[106].mxu1  ;;  %v7108_v15 = vld [vmem:[#allocation6_spill] sm:$0xff] }
 0x1da   : > { %v2540_v54 = vxor.u32 %v2508_v50, %v2476_v10  ;;  %v2541_v53 = vxor.u32 %v2509_v16, %v2477_v26  ;;  %v2114_v33 = vmax.f32 %v2048_v2, 0.0  ;;  %v2115_v6 = vmax.f32 %v2051_v20, 0.0  ;;  %v4293_v61 = vpop.f32.mrb[105].mxu0  ;;  %v2066_v58 = vpop.f32.mrb[107].mxu1  ;;  %v7103_v16 = vld [vmem:[#allocation5_spill] sm:$0xff] }
 0x1db   : > { %v1914_v0 = vadd.f32 %v4291_v31, %v7098_v56  ;;  %v2571_v14 = vshrl.u32 %v2539_v38, 31  ;;  %v3895_v62 = vpack.c.bf16 %v2117_v63, %v2116_v51  ;;  %v2510_v3 = vshrl.u32 %v2478_v13, 16  ;;  %v4295_v41 = vpop.f32.mrb[106].mxu0  ;;  %v4422_v20 = vpop.f32.mrb[108].mxu1 }
 0x1dc   : > { %v2511_v28 = vshrl.u32 %v2479_v44, 16  ;;  %v2480_v8 = vmul.u32 3266489909, %v2448_v32  ;;  %v3892_v40 = vpack.c.bf16 %v2115_v6, %v2114_v33  ;;  %v2481_v10 = vmul.u32 3266489909, %v2449_v52  ;;  %v4296_v19 = vpop.f32.mrb[107].mxu0 }
 0x1dd   : > { %v2072_v26 = vadd.f32 %v4418_v59, %v1911_v39  ;;  %v2572_v23 = vshrl.u32 %v2540_v54, 31  ;;  %v2573_v29 = vshrl.u32 %v2541_v53, 31  ;;  %v4294_v9 = vadd.f32 %v4293_v61, %v4292_v35  ;;  %v4298_v31 = vpop.f32.mrb[108].mxu0  ;;  %v2079_v52 = vpop.f32.mrb[109].mxu1 }
 0x1de   : > { %v2064_v7 = vadd.f32 %v2063_v60, %v6192_v47  ;;  %4460 = vmatprep.mubr.msk.bf16.mxu1 %vm3891_vm2, %v3892_v40  ;;  %vm6269_vm4 = vcmp.eq.s32.totalorder %v2570_v37, 0  ;;  %vm6273_vm5 = vcmp.eq.s32.totalorder %v2571_v14, 0  ;;  %v2075_v30 = vadd.f32 %v4419_v42, %v1914_v0  ;;  %v4299_v39 = vpop.f32.mrb[109].mxu0  ;;  %v4423_v53 = vpop.f32.mrb[110].mxu1 }
 0x1df   : > { %4461 = vmatmul.mubr.msk.bf16.gmra.mrb[132].mxu1 %vm3894_vm3, %v3895_v62  ;;  %v2542_v47 = vxor.u32 %v2510_v3, %v2478_v13  ;;  %v2543_v25 = vxor.u32 %v2511_v28, %v2479_v44  ;;  %v2512_v48 = vshrl.u32 %v2480_v8, 16  ;;  %v4297_v22 = vadd.f32 %v4296_v19, %v4295_v41  ;;  %vm3897_vm8 = vmpackc.low %vm6273_vm5, %vm6269_vm4  ;;  %v4301_v54 = vpop.f32.mrb[110].mxu0  ;;  %v2082_v6 = vpop.f32.mrb[111].mxu1  ;;  %v7113_v62 = vld [vmem:[#allocation52_spill] sm:$0xff]  ;;  %v7115_v41 = vld [vmem:[#allocation7_spill] sm:$0xff] }
 0x1e0   : > { %v2067_v50 = vadd.f32 %v2066_v58, %v6204_v34  ;;  %v1919_v49 = vadd.f32 %v4294_v9, %v7103_v16  ;;  %v2513_v2 = vshrl.u32 %v2481_v10, 16  ;;  %v2120_v55 = vmax.f32 %v2072_v26, 0.0  ;;  %v4302_v33 = vpop.f32.mrb[111].mxu0 }
 0x1e1   : > { %v2121_v46 = vmax.f32 %v2075_v30, 0.0  ;;  %vm6284_vm6 = vcmp.eq.s32.totalorder %v2572_v23, 0  ;;  %vm6288_vm7 = vcmp.eq.s32.totalorder %v2573_v29, 0  ;;  %v2118_v5 = vmax.f32 %v2064_v7, 0.0  ;;  %v7117_v30 = vld [vmem:[#allocation9_spill] sm:$0xff] }
 0x1e2   : > { %v2119_v37 = vmax.f32 %v2067_v50, 0.0  ;;  %v1922_v21 = vadd.f32 %v4297_v22, %v7108_v15  ;;  %v2574_v34 = vshrl.u32 %v2542_v47, 31  ;;  %v2575_v13 = vshrl.u32 %v2543_v25, 31  ;;  %vm3900_vm9 = vmpackc.low %vm6288_vm7, %vm6284_vm6  ;;  %v7118_v25 = vld [vmem:[#allocation10_spill] sm:$0xff] }
 0x1e3   : > { %v3901_v17 = vpack.c.bf16 %v2121_v46, %v2120_v55  ;;  %v2544_v44 = vxor.u32 %v2512_v48, %v2480_v8  ;;  %v2545_v43 = vxor.u32 %v2513_v2, %v2481_v10  ;;  %v4300_v51 = vadd.f32 %v4299_v39, %v4298_v31  ;;  %v7114_v10 = vld [vmem:[#allocation23_spill] sm:$0xff]  ;;  %v7121_v39 = vld [vmem:[#allocation13_spill] sm:$0xff] }
 0x1e4   : > { %v3898_v32 = vpack.c.bf16 %v2119_v37, %v2118_v5  ;;  %v2080_v63 = vadd.f32 %v2079_v52, %v1919_v49  ;;  %vm6301_vm10 = vcmp.eq.s32.totalorder %v2574_v34, 0  ;;  %vm6305_vm11 = vcmp.eq.s32.totalorder %v2575_v13, 0  ;;  %v7119_v37 = vld [vmem:[#allocation11_spill] sm:$0xff] }
 0x1e5   : > { %v2576_v14 = vshrl.u32 %v2544_v44, 31  ;;  %v1927_v3 = vadd.f32 %v4300_v51, %v7113_v62  ;;  %v4303_v28 = vadd.f32 %v4302_v33, %v4301_v54  ;;  %v2083_v8 = vadd.f32 %v2082_v6, %v1922_v21  ;;  %vm3903_vm12 = vmpackc.low %vm6305_vm11, %vm6301_vm10  ;;  %v7120_v44 = vld [vmem:[#allocation12_spill] sm:$0xff] }
 0x1e6   : > { %4464 = vmatprep.mubr.msk.bf16.mxu1 %vm3897_vm8, %v3898_v32  ;;  %v2577_v40 = vshrl.u32 %v2545_v43, 31  ;;  %v2122_v59 = vmax.f32 %v2080_v63, 0.0  ;;  %v2922_v42 = vadd.s32 1013904242, %v7115_v41  ;;  %v2923_v57 = vadd.s32 1013904242, %v7116_v18 }
 0x1e7   : > { %4465 = vmatmul.mubr.msk.bf16.gmra.mrb[136].mxu1 %vm3900_vm9, %v3901_v17  ;;  %v2088_v35 = vadd.f32 %v4422_v20, %v1927_v3  ;;  %v1930_v26 = vadd.f32 %v4303_v28, %v7114_v10  ;;  %v2123_v61 = vmax.f32 %v2083_v8, 0.0  ;;  %vm2608_vm13 = vcmp.eq.s32.totalorder %v2576_v14, 0  ;;  %v7122_v63 = vld [vmem:[#allocation14_spill] sm:$0xff] }
 0x1e8   : > { %vm2609_vm14 = vcmp.eq.s32.totalorder %v2577_v40, 0  ;;  %v2924_v19 = vadd.s32 1013904242, %v7117_v30  ;;  %v2954_v58 = vxor.u32 %v2922_v42, %v5224_v4  ;;  %v2955_v47 = vxor.u32 %v2923_v57, %v5224_v4  ;;  %v7126_v42 = vld [vmem:[#allocation19_spill] sm:$0xff]  ;;  %v7127_v57 = vld [vmem:[#allocation26_spill] sm:$0xff] }
 0x1e9   : > { %v2091_v60 = vadd.f32 %v4423_v53, %v1930_v26  ;;  %v3904_v23 = vpack.c.bf16 %v2123_v61, %v2122_v59  ;;  %v2124_v29 = vmax.f32 %v2088_v35, 0.0  ;;  %vm3906_vm15 = vmpackc.low %vm2609_vm14, %vm2608_vm13  ;;  %v2925_v48 = vadd.s32 1013904242, %v7118_v25  ;;  %v7123_v26 = vld [vmem:[#allocation15_spill] sm:$0xff] }
 0x1ea   : > { %v2956_v22 = vxor.u32 %v2924_v19, %v5224_v4  ;;  %v2986_v50 = vshrl.u32 %v2954_v58, 16  ;;  %v2987_v16 = vshrl.u32 %v2955_v47, 16  ;;  %v2926_v15 = vadd.s32 1013904242, %v7119_v37 }
 0x1eb   : > { %v2125_v9 = vmax.f32 %v2091_v60, 0.0  ;;  %4468 = vmatprep.mubr.msk.bf16.mxu1 %vm3903_vm12, %v3904_v23  ;;  %v2957_v49 = vxor.u32 %v2925_v48, %v5224_v4  ;;  %v2927_v32 = vadd.s32 1013904242, %v7120_v44  ;;  %v2928_v52 = vadd.s32 1013904242, %v7121_v39  ;;  %v7124_v23 = vld [vmem:[#allocation16_spill] sm:$0xff] }
 0x1ec   : > { %v2988_v2 = vshrl.u32 %v2956_v22, 16  ;;  %v3018_v55 = vxor.u32 %v2986_v50, %v2954_v58  ;;  %v3019_v46 = vxor.u32 %v2987_v16, %v2955_v47  ;;  %v2958_v31 = vxor.u32 %v2926_v15, %v5224_v4  ;;  %v7128_v47 = vld [vmem:[#allocation27_spill] sm:$0xff] }
 0x1ed   : > { %v3907_v7 = vpack.c.bf16 %v2125_v9, %v2124_v29  ;;  %v2989_v38 = vshrl.u32 %v2957_v49, 16  ;;  %v2929_v54 = vadd.s32 1013904242, %v7122_v63  ;;  %v2959_v33 = vxor.u32 %v2927_v32, %v5224_v4  ;;  %v7125_v9 = vld [vmem:[#allocation18_spill] sm:$0xff] }
 0x1ee   : > { %v3020_v11 = vxor.u32 %v2988_v2, %v2956_v22  ;;  %v3050_v5 = vmul.u32 2246822507, %v3018_v55  ;;  %v3051_v21 = vmul.u32 2246822507, %v3019_v46  ;;  %v2990_v6 = vshrl.u32 %v2958_v31, 16  ;;  %v7129_v46 = vld [vmem:[#allocation32_spill] sm:$0xff] }
 0x1ef   : > { %4469 = vmatmul.mubr.msk.bf16.gmra.mrb[140].mxu1 %vm3906_vm15, %v3907_v7  ;;  %v3021_v17 = vxor.u32 %v2989_v38, %v2957_v49  ;;  %v2960_v14 = vxor.u32 %v2928_v52, %v5224_v4  ;;  %v2961_v3 = vxor.u32 %v2929_v54, %v5224_v4  ;;  %v2991_v8 = vshrl.u32 %v2959_v33, 16 }
 0x1f0   : > { %v3052_v34 = vmul.u32 2246822507, %v3020_v11  ;;  %v3082_v13 = vshrl.u32 %v3050_v5, 13  ;;  %v3083_v20 = vshrl.u32 %v3051_v21, 13  ;;  %v3022_v40 = vxor.u32 %v2990_v6, %v2958_v31 }
 0x1f1   : > { %v3053_v43 = vmul.u32 2246822507, %v3021_v17  ;;  %v2992_v10 = vshrl.u32 %v2960_v14, 16  ;;  %v2930_v61 = vadd.s32 1013904242, %v7123_v26  ;;  %v2993_v41 = vshrl.u32 %v2961_v3, 16 }
 0x1f2   : > { %v3084_v51 = vshrl.u32 %v3052_v34, 13  ;;  %v3114_v53 = vxor.u32 %v3082_v13, %v3050_v5  ;;  %v3115_v56 = vxor.u32 %v3083_v20, %v3051_v21  ;;  %v2931_v29 = vadd.s32 1013904242, %v7124_v23  ;;  %v7130_v13 = vld [vmem:[#allocation34_spill] sm:$0xff] }
 0x1f3   : > { %v3085_v0 = vshrl.u32 %v3053_v43, 13  ;;  %v2932_v7 = vadd.s32 1013904242, %v7125_v9  ;;  %v2933_v18 = vadd.s32 1013904242, %v7126_v42  ;;  %v3023_v19 = vxor.u32 %v2991_v8, %v2959_v33 }
 0x1f4   : > { %v3116_v62 = vxor.u32 %v3084_v51, %v3052_v34  ;;  %v3146_v28 = vmul.u32 3266489909, %v3114_v53  ;;  %v3147_v35 = vmul.u32 3266489909, %v3115_v56  ;;  %v2934_v30 = vadd.s32 1013904242, %v7127_v57 }
 0x1f5   : > { %v3117_v59 = vxor.u32 %v3085_v0, %v3053_v43  ;;  %v3054_v58 = vmul.u32 2246822507, %v3022_v40  ;;  %v2935_v25 = vadd.s32 1013904242, %v7128_v47  ;;  %v3024_v50 = vxor.u32 %v2992_v10, %v2960_v14 }
 0x1f6   : > { %v3148_v60 = vmul.u32 3266489909, %v3116_v62  ;;  %v3178_v48 = vshrl.u32 %v3146_v28, 16  ;;  %v2962_v16 = vxor.u32 %v2930_v61, %v5224_v4  ;;  %v3179_v49 = vshrl.u32 %v3147_v35, 16 }
 0x1f7   : > { %v3149_v22 = vmul.u32 3266489909, %v3117_v59  ;;  %v2963_v2 = vxor.u32 %v2931_v29, %v5224_v4  ;;  %v2964_v55 = vxor.u32 %v2932_v7, %v5224_v4  ;;  %v2936_v38 = vadd.s32 1013904242, %v7129_v46  ;;  %v7134_v46 = vld [vmem:[#allocation40_spill] sm:$0xff] }
 0x1f8   : > { %v3180_v11 = vshrl.u32 %v3148_v60, 16  ;;  %v3025_v5 = vxor.u32 %v2993_v41, %v2961_v3  ;;  %v2965_v37 = vxor.u32 %v2933_v18, %v5224_v4  ;;  %v2966_v15 = vxor.u32 %v2934_v30, %v5224_v4  ;;  %v7131_v30 = vld [vmem:[#allocation35_spill] sm:$0xff] }
 0x1f9   : > { %v3055_v21 = vmul.u32 2246822507, %v3023_v19  ;;  %v3086_v17 = vshrl.u32 %v3054_v58, 13  ;;  %v2967_v34 = vxor.u32 %v2935_v25, %v5224_v4  ;;  %v2937_v44 = vadd.s32 1013904242, %v7130_v13 }
 0x1fa   : > { %v6345_v32 = vxor.u32 %v3178_v48, %v3146_v28  ;;  %v3181_v31 = vshrl.u32 %v3149_v22, 16  ;;  %v3056_v20 = vmul.u32 2246822507, %v3024_v50  ;;  %v2994_v43 = vshrl.u32 %v2962_v16, 16  ;;  %v7133_v50 = vld [vmem:[#allocation39_spill] sm:$0xff] }
 0x1fb   : > { %v6347_v39 = vxor.u32 %v3179_v49, %v3147_v35  ;;  %v2995_v52 = vshrl.u32 %v2963_v2, 16  ;;  %v2996_v51 = vshrl.u32 %v2964_v55, 16  ;;  %v2968_v63 = vxor.u32 %v2936_v38, %v5224_v4 }
 0x1fc   : > { %v6350_v54 = vxor.u32 %v3180_v11, %v3148_v60  ;;  %v3057_v53 = vmul.u32 2246822507, %v3025_v5  ;;  %v2997_v33 = vshrl.u32 %v2965_v37, 16  ;;  %v2998_v6 = vshrl.u32 %v2966_v15, 16 }
 0x1fd   : > { %v3087_v56 = vshrl.u32 %v3055_v21, 13  ;;  %v6352_v0 = vxor.u32 %v3086_v17, %v3054_v58  ;;  %v2999_v14 = vshrl.u32 %v2967_v34, 16  ;;  %v2969_v62 = vxor.u32 %v2937_v44, %v5224_v4  ;;  %v7132_v58 = vld [vmem:[#allocation37_spill] sm:$0xff] }
 0x1fe   : > { %v3242_v3 = vshrl.u32 %v6345_v32, 31  ;;  %v6356_v28 = vxor.u32 %v3181_v31, %v3149_v22  ;;  %v3088_v8 = vshrl.u32 %v3056_v20, 13  ;;  %v3026_v40 = vxor.u32 %v2994_v43, %v2962_v16 }
 0x1ff   : > { %v3243_v35 = vshrl.u32 %v6347_v39, 31  ;;  %v3027_v59 = vxor.u32 %v2995_v52, %v2963_v2  ;;  %v3028_v10 = vxor.u32 %v2996_v51, %v2964_v55  ;;  %v3000_v26 = vshrl.u32 %v2968_v63, 16 }
 0x200   : > { %v3244_v61 = vshrl.u32 %v6350_v54, 31  ;;  %v3089_v60 = vshrl.u32 %v3057_v53, 13  ;;  %v3029_v23 = vxor.u32 %v2997_v33, %v2965_v37  ;;  %v3030_v29 = vxor.u32 %v2998_v6, %v2966_v15  ;;  %v6428_v54 = vld [vmem:[%s6878_s5] ss:$0 sm:$0xff] }
 0x201   : > { %v3119_v9 = vxor.u32 %v3087_v56, %v3055_v21  ;;  %v3150_v7 = vmul.u32 3266489909, %v6352_v0  ;;  %v3031_v41 = vxor.u32 %v2999_v14, %v2967_v34  ;;  %v3001_v42 = vshrl.u32 %v2969_v62, 16 }
 0x202   : > { %v3120_v18 = vxor.u32 %v3088_v8, %v3056_v20  ;;  %v3058_v57 = vmul.u32 2246822507, %v3026_v40  ;;  %v2938_v19 = vadd.s32 1013904242, %v7131_v30  ;;  %v2939_v47 = vadd.s32 1013904242, %v7132_v58 }
 0x203   : > { %v3059_v25 = vmul.u32 2246822507, %v3027_v59  ;;  %v3060_v48 = vmul.u32 2246822507, %v3028_v10  ;;  %v3032_v22 = vxor.u32 %v3000_v26, %v2968_v63  ;;  %v2940_v16 = vadd.s32 1013904242, %v7133_v50 }
 0x204   : > { %v3121_v49 = vxor.u32 %v3089_v60, %v3057_v53  ;;  %v3061_v2 = vmul.u32 2246822507, %v3029_v23  ;;  %v3062_v55 = vmul.u32 2246822507, %v3030_v29  ;;  %v2941_v38 = vadd.s32 1013904242, %v7134_v46 }
 0x205   : > { %v3245_v11 = vshrl.u32 %v6356_v28, 31  ;;  %v3151_v5 = vmul.u32 3266489909, %v3119_v9  ;;  %v3063_v37 = vmul.u32 2246822507, %v3031_v41  ;;  %v3033_v15 = vxor.u32 %v3001_v42, %v2969_v62 }
 0x206   : > { %v3152_v21 = vmul.u32 3266489909, %v3120_v18  ;;  %v3090_v17 = vshrl.u32 %v3058_v57, 13  ;;  %v2970_v34 = vxor.u32 %v2938_v19, %v5224_v4  ;;  %v2971_v13 = vxor.u32 %v2939_v47, %v5224_v4 }
 0x207   : > { %v3091_v44 = vshrl.u32 %v3059_v25, 13  ;;  %v3092_v31 = vshrl.u32 %v3060_v48, 13  ;;  %v3064_v20 = vmul.u32 2246822507, %v3032_v22  ;;  %v2972_v43 = vxor.u32 %v2940_v16, %v5224_v4 }
 0x208   : > { %v3153_v52 = vmul.u32 3266489909, %v3121_v49  ;;  %v3093_v51 = vshrl.u32 %v3061_v2, 13  ;;  %v3094_v63 = vshrl.u32 %v3062_v55, 13  ;;  %v2973_v53 = vxor.u32 %v2941_v38, %v5224_v4 }
 0x209   : > { %v3182_v33 = vshrl.u32 %v3150_v7, 16  ;;  %v3183_v6 = vshrl.u32 %v3151_v5, 16  ;;  %v3095_v56 = vshrl.u32 %v3063_v37, 13  ;;  %v3065_v0 = vmul.u32 2246822507, %v3033_v15 }
 0x20a   : > { %v3184_v14 = vshrl.u32 %v3152_v21, 16  ;;  %v3122_v62 = vxor.u32 %v3090_v17, %v3058_v57  ;;  %v3002_v8 = vshrl.u32 %v2970_v34, 16  ;;  %v3003_v40 = vshrl.u32 %v2971_v13, 16 }
 0x20b   : > { %v3123_v59 = vxor.u32 %v3091_v44, %v3059_v25  ;;  %v3124_v10 = vxor.u32 %v3092_v31, %v3060_v48  ;;  %v3096_v26 = vshrl.u32 %v3064_v20, 13  ;;  %v3004_v60 = vshrl.u32 %v2972_v43, 16 }
 0x20c   : > { %v3185_v23 = vshrl.u32 %v3153_v52, 16  ;;  %v3125_v29 = vxor.u32 %v3093_v51, %v3061_v2  ;;  %v3126_v9 = vxor.u32 %v3094_v63, %v3062_v55  ;;  %v3005_v41 = vshrl.u32 %v2973_v53, 16 }
 0x20d   : > { %v6370_v42 = vxor.u32 %v3182_v33, %v3150_v7  ;;  %v6372_v18 = vxor.u32 %v3183_v6, %v3151_v5  ;;  %v3127_v30 = vxor.u32 %v3095_v56, %v3063_v37  ;;  %v3097_v19 = vshrl.u32 %v3065_v0, 13  ;;  %v7135_v5 = vld [vmem:[#allocation44_spill] sm:$0xff]  ;;  %v7136_v37 = vld [vmem:[#allocation46_spill] sm:$0xff] }
 0x20e   : > { %v6374_v58 = vxor.u32 %v3184_v14, %v3152_v21  ;;  %v3154_v47 = vmul.u32 3266489909, %v3122_v62  ;;  %v3034_v57 = vxor.u32 %v3002_v8, %v2970_v34  ;;  %v3035_v22 = vxor.u32 %v3003_v40, %v2971_v13 }
 0x20f   : > { %v3155_v50 = vmul.u32 3266489909, %v3123_v59  ;;  %v3156_v25 = vmul.u32 3266489909, %v3124_v10  ;;  %v3128_v48 = vxor.u32 %v3096_v26, %v3064_v20  ;;  %v3036_v16 = vxor.u32 %v3004_v60, %v2972_v43 }
 0x210   : > { %v6376_v49 = vxor.u32 %v3185_v23, %v3153_v52  ;;  %v3157_v2 = vmul.u32 3266489909, %v3125_v29  ;;  %v3158_v55 = vmul.u32 3266489909, %v3126_v9  ;;  %v3037_v46 = vxor.u32 %v3005_v41, %v2973_v53  ;;  %v7137_v41 = vld [vmem:[#allocation49_spill] sm:$0xff] }
 0x211   : > { %v3159_v7 = vmul.u32 3266489909, %v3127_v30  ;;  %v3129_v38 = vxor.u32 %v3097_v19, %v3065_v0  ;;  %v2942_v15 = vadd.s32 1013904242, %v7135_v5  ;;  %v2943_v17 = vadd.s32 1013904242, %v7136_v37 }
 0x212   : > { %v3246_v21 = vshrl.u32 %v6370_v42, 31  ;;  %v3186_v44 = vshrl.u32 %v3154_v47, 16  ;;  %v3066_v34 = vmul.u32 2246822507, %v3034_v57  ;;  %v3067_v13 = vmul.u32 2246822507, %v3035_v22 }
 0x213   : > { %v3247_v31 = vshrl.u32 %v6372_v18, 31  ;;  %v3187_v20 = vshrl.u32 %v3155_v50, 16  ;;  %v3160_v43 = vmul.u32 3266489909, %v3128_v48  ;;  %v3068_v52 = vmul.u32 2246822507, %v3036_v16 }
 0x214   : > { %v3248_v51 = vshrl.u32 %v6374_v58, 31  ;;  %v3249_v63 = vshrl.u32 %v6376_v49, 31  ;;  %v3188_v53 = vshrl.u32 %v3156_v25, 16  ;;  %v3069_v33 = vmul.u32 2246822507, %v3037_v46  ;;  %v7138_v19 = vld [vmem:[#allocation50_spill] sm:$0xff] }
 0x215   : > { %v3189_v6 = vshrl.u32 %v3157_v2, 16  ;;  %v3161_v56 = vmul.u32 3266489909, %v3129_v38  ;;  %v2974_v0 = vxor.u32 %v2942_v15, %v5224_v4  ;;  %v2975_v14 = vxor.u32 %v2943_v17, %v5224_v4 }
 0x216   : > { %v6386_v62 = vxor.u32 %v3186_v44, %v3154_v47  ;;  %v3190_v8 = vshrl.u32 %v3158_v55, 16  ;;  %v3098_v40 = vshrl.u32 %v3066_v34, 13  ;;  %v3099_v59 = vshrl.u32 %v3067_v13, 13 }
 0x217   : > { %v6388_v10 = vxor.u32 %v3187_v20, %v3155_v50  ;;  %v3191_v26 = vshrl.u32 %v3159_v7, 16  ;;  %v3192_v60 = vshrl.u32 %v3160_v43, 16  ;;  %v3100_v23 = vshrl.u32 %v3068_v52, 13 }
 0x218   : > { %v6390_v29 = vxor.u32 %v3188_v53, %v3156_v25  ;;  %v3101_v9 = vshrl.u32 %v3069_v33, 13  ;;  %v2944_v30 = vadd.s32 1013904242, %v7137_v41  ;;  %v2945_v57 = vadd.s32 1013904242, %v7138_v19 }
 0x219   : > { %vm6396_vm0 = vcmp.eq.s32.totalorder %v3242_v3, 0  ;;  %vm6402_vm1 = vcmp.eq.s32.totalorder %v3243_v35, 0  ;;  %v6406_v50 = vxor.u32 %v3189_v6, %v3157_v2  ;;  %v3193_v25 = vshrl.u32 %v3161_v56, 16 }
 0x21a   : > { %v3006_v48 = vshrl.u32 %v2974_v0, 16  ;;  %v3007_v16 = vshrl.u32 %v2975_v14, 16  ;;  %vm6410_vm2 = vcmp.eq.s32.totalorder %v3244_v61, 0  ;;  %vm6416_vm3 = vcmp.eq.s32.totalorder %v3245_v11, 0  ;;  %vm3918_vm8 = vmpackc.low %vm6402_vm1, %vm6396_vm0 }
 0x21b   : > { %v3250_v39 = vshrl.u32 %v6386_v62, 31  ;;  %v6421_v3 = vxor.u32 %v3190_v8, %v3158_v55  ;;  %v3130_v35 = vxor.u32 %v3098_v40, %v3066_v34  ;;  %v6423_v2 = vxor.u32 %v3099_v59, %v3067_v13  ;;  %vm3921_vm9 = vmpackc.low %vm6416_vm3, %vm6410_vm2 }
 0x21c   : > { %v3251_v61 = vshrl.u32 %v6388_v10, 31  ;;  %v6431_v38 = vxor.u32 %v3191_v26, %v3159_v7  ;;  %v6433_v28 = vxor.u32 %v3192_v60, %v3160_v43  ;;  %v6435_v11 = vxor.u32 %v3100_v23, %v3068_v52 }
 0x21d   : > { %v3252_v5 = vshrl.u32 %v6390_v29, 31  ;;  %v6438_v55 = vxor.u32 %v3101_v9, %v3069_v33  ;;  %v2976_v15 = vxor.u32 %v2944_v30, %v5224_v4  ;;  %v2977_v37 = vxor.u32 %v2945_v57, %v5224_v4 }
 0x21e   : > { %v3253_v44 = vshrl.u32 %v6406_v50, 31  ;;  %v6443_v34 = vxor.u32 %v3193_v25, %v3161_v56  ;;  %v6445_v13 = vxor.u32 %v3006_v48, %v2974_v0  ;;  %v6447_v7 = vxor.u32 %v3007_v16, %v2975_v14 }
 0x21f   : > { %v3254_v52 = vshrl.u32 %v6421_v3, 31  ;;  %v3162_v53 = vmul.u32 3266489909, %v3130_v35  ;;  %v3163_v33 = vmul.u32 3266489909, %v6423_v2  ;;  %v3255_v40 = vshrl.u32 %v6431_v38, 31 }
 0x220   : > { %v3256_v56 = vshrl.u32 %v6433_v28, 31  ;;  %v3164_v0 = vmul.u32 3266489909, %v6435_v11  ;;  %v3165_v26 = vmul.u32 3266489909, %v6438_v55  ;;  %v3008_v60 = vshrl.u32 %v2976_v15, 16 }
 0x221   : > { %v3009_v23 = vshrl.u32 %v2977_v37, 16  ;;  %vm6461_vm4 = vcmp.eq.s32.totalorder %v3246_v21, 0  ;;  %vm6467_vm5 = vcmp.eq.s32.totalorder %v3247_v31, 0  ;;  %v3257_v19 = vshrl.u32 %v6443_v34, 31  ;;  %v7155_v11 = vld [vmem:[#allocation22_spill] sm:$0xff] }
 0x222   : > { %v3070_v57 = vmul.u32 2246822507, %v6445_v13  ;;  %v3071_v25 = vmul.u32 2246822507, %v6447_v7  ;;  %vm6476_vm6 = vcmp.eq.s32.totalorder %v3248_v51, 0  ;;  %vm6482_vm7 = vcmp.eq.s32.totalorder %v3249_v63, 0  ;;  %vm3924_vm14 = vmpackc.low %vm6467_vm5, %vm6461_vm4 }
 0x223   : > { %v3194_v21 = vshrl.u32 %v3162_v53, 16  ;;  %v3195_v31 = vshrl.u32 %v3163_v33, 16  ;;  %v2946_v55 = vadd.s32 1013904242, %v7155_v11  ;;  %v3196_v58 = vshrl.u32 %v3164_v0, 16  ;;  %vm3927_vm15 = vmpackc.low %vm6482_vm7, %vm6476_vm6 }
 0x224   : > { %v6492_v49 = vxor.u32 %v3008_v60, %v2976_v15  ;;  %v6494_v51 = vxor.u32 %v3009_v23, %v2977_v37  ;;  %v2948_v15 = vadd.s32 1013904242, %v5907_v45  ;;  %v2949_v37 = vadd.s32 1013904242, %v5910_v24 }
 0x225   : > { %v6521_v24 = vxor.u32 %v3196_v58, %v3164_v0  ;;  %vm6528_vm10 = vcmp.eq.s32.totalorder %v3250_v39, 0  ;;  %vm6534_vm11 = vcmp.eq.s32.totalorder %v3251_v61, 0  ;;  %vm6546_vm12 = vcmp.eq.s32.totalorder %v3252_v5, 0 }
 0x226   : > { %v3072_v47 = vmul.u32 2246822507, %v6492_v49  ;;  %v3073_v22 = vmul.u32 2246822507, %v6494_v51  ;;  %vm6552_vm13 = vcmp.eq.s32.totalorder %v3253_v44, 0  ;;  %v2980_v39 = vxor.u32 %v2948_v15, %v5224_v4  ;;  %vm3930_vm4 = vmpackc.low %vm6534_vm11, %vm6528_vm10 }
 0x227   : > { %v2981_v61 = vxor.u32 %v2949_v37, %v5224_v4  ;;  %v2950_v41 = vadd.s32 1013904242, %v5953_v1  ;;  %vm6596_vm0 = vcmp.eq.s32.totalorder %v3254_v52, 0  ;;  %vm6602_vm1 = vcmp.eq.s32.totalorder %v3255_v40, 0  ;;  %vm3933_vm5 = vmpackc.low %vm6552_vm13, %vm6546_vm12 }
 0x228   : > { %v3104_v5 = vshrl.u32 %v3072_v47, 13  ;;  %v3105_v49 = vshrl.u32 %v3073_v22, 13  ;;  %v2952_v1 = vadd.s32 1013904242, %v5999_v36  ;;  %vm6612_vm2 = vcmp.eq.s32.totalorder %v3256_v56, 0  ;;  %vm3936_vm10 = vmpackc.low %vm6602_vm1, %vm6596_vm0 }
 0x229   : > { %vm6618_vm3 = vcmp.eq.s32.totalorder %v3257_v19, 0  ;;  %v2982_v19 = vxor.u32 %v2950_v41, %v5224_v4 }
 0x22a   : > { %v6589_v30 = vxor.u32 %v3104_v5, %v3072_v47  ;;  %v6606_v18 = vxor.u32 %v3105_v49, %v3073_v22  ;;  %vm3939_vm11 = vmpackc.low %vm6618_vm3, %vm6612_vm2 }
 0x22b   : > { %v3014_v46 = vshrl.u32 %v2982_v19, 16 }
 0x22c   : > { %v3168_v34 = vmul.u32 3266489909, %v6589_v30 }
 0x283   : > { %v4442_v17 = vpop.f32.mrb[112].mxu1 }
 0x284   : > { %v2772_v20 = vadd.f32 %v4442_v17, %v6428_v54  ;;  %v2763_v43 = vpop.f32.mrb[113].mxu1  ;;  %v7156_v17 = vld [vmem:[#allocation51_spill] sm:$0xff] }
 0x285   : > { %v2764_v6 = vadd.f32 %v6428_v54, %v2763_v43  ;;  %v4443_v8 = vpop.f32.mrb[114].mxu1  ;;  %v2947_v13 = vadd.s32 1013904242, %v7156_v17  ;;  %v3197_v43 = vshrl.u32 %v3165_v26, 16 }
 0x286   : > { %v2775_v14 = vadd.f32 %v4443_v8, %v6428_v54  ;;  %v2766_v59 = vpop.f32.mrb[115].mxu1  ;;  %v2892_v48 = vmax.f32 %v2772_v20, 0.0  ;;  %v3103_v8 = vshrl.u32 %v3071_v25, 13 }
 0x287   : > { %v2767_v9 = vadd.f32 %v6428_v54, %v2766_v59  ;;  %v2890_v35 = vmax.f32 %v2764_v6, 0.0  ;;  %v3102_v6 = vshrl.u32 %v3070_v57, 13  ;;  %v6538_v32 = vxor.u32 %v3197_v43, %v3165_v26 }
 0x288   : > { %v2893_v16 = vmax.f32 %v2775_v14, 0.0  ;;  %v3012_v43 = vshrl.u32 %v2980_v39, 16 }
 0x289   : > { %v2891_v2 = vmax.f32 %v2767_v9, 0.0  ;;  %v6501_v9 = vxor.u32 %v3194_v21, %v3162_v53  ;;  %v2979_v53 = vxor.u32 %v2947_v13, %v5224_v4  ;;  %v6540_v0 = vxor.u32 %v3102_v6, %v3070_v57 }
 0x28a   : > { %v3922_v7 = vpack.c.bf16 %v2893_v16, %v2892_v48  ;;  %v6511_v48 = vxor.u32 %v3195_v31, %v3163_v33  ;;  %v2978_v16 = vxor.u32 %v2946_v55, %v5224_v4  ;;  %v3261_v58 = vshrl.u32 %v6538_v32, 31 }
 0x28b   : > { %v3919_v63 = vpack.c.bf16 %v2891_v2, %v2890_v35  ;;  %v6542_v35 = vxor.u32 %v3103_v8, %v3071_v25  ;;  %v3011_v55 = vshrl.u32 %v2979_v53, 16  ;;  %v3258_v29 = vshrl.u32 %v6501_v9, 31 }
 0x28c   : > { %v3010_v25 = vshrl.u32 %v2978_v16, 16  ;;  %v3259_v50 = vshrl.u32 %v6511_v48, 31  ;;  %v3013_v6 = vshrl.u32 %v2981_v61, 16  ;;  %v6622_v52 = vxor.u32 %v3012_v43, %v2980_v39 }
 0x28d   : > { %v4446_v20 = vpop.f32.mrb[116].mxu1  ;;  %4488 = vmatprep.mubr.msk.bf16.mxu0 %vm3918_vm8, %v3919_v63  ;;  %v6581_v37 = vxor.u32 %v3011_v55, %v2979_v53  ;;  %v3169_v39 = vmul.u32 3266489909, %v6606_v18  ;;  %vm6664_vm6 = vcmp.eq.s32.totalorder %v3258_v29, 0  ;;  %v6696_v32 = vxor.u32 %v3014_v46, %v2982_v19 }
 0x28e   : > { %v2788_v14 = vadd.f32 %v4446_v20, %v6428_v54  ;;  %v2779_v59 = vpop.f32.mrb[117].mxu1  ;;  %4489 = vmatmul.mubr.msk.bf16.vlgmr.msra.gmra.mrb[112].mxu0 %vm3921_vm9, %v3922_v7  ;;  %v3260_v7 = vshrl.u32 %v6521_v24, 31  ;;  %v3166_v20 = vmul.u32 3266489909, %v6540_v0  ;;  %v6579_v15 = vxor.u32 %v3010_v25, %v2978_v16 }
 0x28f   : > { %v2780_v60 = vadd.f32 %v6428_v54, %v2779_v59  ;;  %v4447_v23 = vpop.f32.mrb[118].mxu1  ;;  %v3167_v59 = vmul.u32 3266489909, %v6542_v35  ;;  %v6624_v40 = vxor.u32 %v3013_v6, %v2981_v61  ;;  %v3075_v28 = vmul.u32 2246822507, %v6581_v37 }
 0x290   : > { %v2791_v21 = vadd.f32 %v4447_v23, %v6428_v54  ;;  %v2782_v45 = vpop.f32.mrb[119].mxu1  ;;  %v2896_v2 = vmax.f32 %v2788_v14, 0.0  ;;  %v3074_v22 = vmul.u32 2246822507, %v6579_v15  ;;  %v2984_v61 = vxor.u32 %v2952_v1, %v5224_v4 }
 0x291   : > { %v2783_v33 = vadd.f32 %v6428_v54, %v2782_v45  ;;  %v2894_v26 = vmax.f32 %v2780_v60, 0.0  ;;  %v3198_v55 = vshrl.u32 %v3166_v20, 16  ;;  %v3077_v5 = vmul.u32 2246822507, %v6624_v40 }
 0x292   : > { %v2897_v11 = vmax.f32 %v2791_v21, 0.0  ;;  %v2951_v21 = vadd.s32 1013904242, %v5956_v27  ;;  %v2953_v27 = vadd.s32 1013904242, %v6012_v12  ;;  %v3106_v49 = vshrl.u32 %v3074_v22, 13 }
 0x293   : > { %v2895_v57 = vmax.f32 %v2783_v33, 0.0  ;;  %v3200_v6 = vshrl.u32 %v3168_v34, 16  ;;  %vm6670_vm7 = vcmp.eq.s32.totalorder %v3259_v50, 0  ;;  %v3201_v62 = vshrl.u32 %v3169_v39, 16 }
 0x294   : > { %v3928_v17 = vpack.c.bf16 %v2897_v11, %v2896_v2  ;;  %v2983_v33 = vxor.u32 %v2951_v21, %v5224_v4  ;;  %v3016_v10 = vshrl.u32 %v2984_v61, 16  ;;  %vm6676_vm8 = vcmp.eq.s32.totalorder %v3260_v7, 0  ;;  %vm3942_vm12 = vmpackc.low %vm6670_vm7, %vm6664_vm6 }
 0x295   : > { %v3925_v44 = vpack.c.bf16 %v2895_v57, %v2894_v26  ;;  %v2985_v26 = vxor.u32 %v2953_v27, %v5224_v4  ;;  %v3199_v4 = vshrl.u32 %v3167_v59, 16  ;;  %vm6682_vm9 = vcmp.eq.s32.totalorder %v3261_v58, 0 }
 0x296   : > { %v3109_v29 = vshrl.u32 %v3077_v5, 13  ;;  %v6686_v21 = vxor.u32 %v3106_v49, %v3074_v22  ;;  %v3230_v24 = vxor.u32 %v3198_v55, %v3166_v20  ;;  %v3232_v20 = vxor.u32 %v3200_v6, %v3168_v34  ;;  %vm3945_vm13 = vmpackc.low %vm6682_vm9, %vm6676_vm8 }
 0x297   : > { %4492 = vmatprep.mubr.msk.bf16.mxu0 %vm3924_vm14, %v3925_v44  ;;  %v3017_v37 = vshrl.u32 %v2985_v26, 16  ;;  %v3231_v27 = vxor.u32 %v3199_v4, %v3167_v59  ;;  %v3078_v42 = vmul.u32 2246822507, %v6696_v32 }
 0x298   : > { %v4450_v13 = vpop.f32.mrb[120].mxu1  ;;  %4493 = vmatmul.mubr.msk.bf16.gmra.mrb[116].mxu0 %vm3927_vm15, %v3928_v17  ;;  %v3076_v17 = vmul.u32 2246822507, %v6622_v52  ;;  %v3170_v35 = vmul.u32 3266489909, %v6686_v21  ;;  %v3262_v34 = vshrl.u32 %v3230_v24, 31 }
 0x299   : > { %v2804_v51 = vadd.f32 %v4450_v13, %v6428_v54  ;;  %v2795_v63 = vpop.f32.mrb[121].mxu1 }
 0x29a   : > { %v2796_v8 = vadd.f32 %v6428_v54, %v2795_v63  ;;  %v4451_v14 = vpop.f32.mrb[122].mxu1  ;;  %v3108_v48 = vshrl.u32 %v3076_v17, 13  ;;  %vm6733_vm14 = vcmp.eq.s32.totalorder %v3262_v34, 0 }
 0x29b   : > { %v2807_v60 = vadd.f32 %v4451_v14, %v6428_v54  ;;  %v2798_v23 = vpop.f32.mrb[123].mxu1  ;;  %v2900_v45 = vmax.f32 %v2804_v51, 0.0  ;;  %v3107_v51 = vshrl.u32 %v3075_v28, 13 }
 0x29c   : > { %v2799_v16 = vadd.f32 %v6428_v54, %v2798_v23  ;;  %v2898_v36 = vmax.f32 %v2796_v8, 0.0  ;;  %v3015_v8 = vshrl.u32 %v2983_v33, 16  ;;  %v3140_v40 = vxor.u32 %v3108_v48, %v3076_v17 }
 0x29d   : > { %v2901_v47 = vmax.f32 %v2807_v60, 0.0  ;;  %v3264_v17 = vshrl.u32 %v3232_v20, 31 }
 0x29e   : > { %v2899_v12 = vmax.f32 %v2799_v16, 0.0  ;;  %v6688_v16 = vxor.u32 %v3107_v51, %v3075_v28  ;;  %v6698_v7 = vxor.u32 %v3015_v8, %v2983_v33  ;;  %v3233_v28 = vxor.u32 %v3201_v62, %v3169_v39 }
 0x29f   : > { %v3934_v56 = vpack.c.bf16 %v2901_v47, %v2900_v45  ;;  %v3048_v45 = vxor.u32 %v3016_v10, %v2984_v61  ;;  %v3049_v47 = vxor.u32 %v3017_v37, %v2985_v26  ;;  %vm6747_vm0 = vcmp.eq.s32.totalorder %v3264_v17, 0 }
 0x2a0   : > { %v3931_v2 = vpack.c.bf16 %v2899_v12, %v2898_v36  ;;  %v3141_v36 = vxor.u32 %v3109_v29, %v3077_v5  ;;  %v3171_v59 = vmul.u32 3266489909, %v6688_v16  ;;  %v3079_v53 = vmul.u32 2246822507, %v6698_v7 }
 0x2a1   : > { %v3081_v39 = vmul.u32 2246822507, %v3049_v47  ;;  %v3265_v3 = vshrl.u32 %v3233_v28, 31 }
 0x2a2   : > { %v4454_v11 = vpop.f32.mrb[124].mxu1  ;;  %4496 = vmatprep.mubr.msk.bf16.mxu0 %vm3930_vm4, %v3931_v2  ;;  %v3263_v2 = vshrl.u32 %v3231_v27, 31  ;;  %v3111_v4 = vshrl.u32 %v3079_v53, 13 }
 0x2a3   : > { %v2820_v57 = vadd.f32 %v4454_v11, %v6428_v54  ;;  %v2811_v25 = vpop.f32.mrb[125].mxu1  ;;  %4497 = vmatmul.mubr.msk.bf16.gmra.mrb[120].mxu0 %vm3933_vm5, %v3934_v56  ;;  %v3080_v11 = vmul.u32 2246822507, %v3048_v45  ;;  %v3113_v6 = vshrl.u32 %v3081_v39, 13  ;;  %vm6751_vm1 = vcmp.eq.s32.totalorder %v3265_v3, 0 }
 0x2a4   : > { %v2812_v44 = vadd.f32 %v6428_v54, %v2811_v25  ;;  %v4455_v13 = vpop.f32.mrb[126].mxu1  ;;  %v3173_v25 = vmul.u32 3266489909, %v3141_v36  ;;  %vm6743_vm15 = vcmp.eq.s32.totalorder %v3263_v2, 0  ;;  %v3143_v21 = vxor.u32 %v3111_v4, %v3079_v53  ;;  %vm3951_vm3 = vmpackc.low %vm6751_vm1, %vm6747_vm0 }
 0x2a5   : > { %v2823_v63 = vadd.f32 %v4455_v13, %v6428_v54  ;;  %v2814_v43 = vpop.f32.mrb[127].mxu1  ;;  %v2904_v60 = vmax.f32 %v2820_v57, 0.0  ;;  %v3172_v57 = vmul.u32 3266489909, %v3140_v40  ;;  %v3110_v13 = vshrl.u32 %v3078_v42, 13  ;;  %vm3948_vm2 = vmpackc.low %vm6743_vm15, %vm6733_vm14 }
 0x2a6   : > { %v2815_v31 = vadd.f32 %v6428_v54, %v2814_v43  ;;  %v2902_v50 = vmax.f32 %v2812_v44, 0.0  ;;  %v3202_v44 = vshrl.u32 %v3170_v35, 16  ;;  %v3112_v43 = vshrl.u32 %v3080_v11, 13 }
 0x2a7   : > { %v2905_v23 = vmax.f32 %v2823_v63, 0.0  ;;  %v3203_v63 = vshrl.u32 %v3171_v59, 16  ;;  %v3204_v62 = vshrl.u32 %v3172_v57, 16  ;;  %v3205_v10 = vshrl.u32 %v3173_v25, 16 }
 0x2a8   : > { %v2903_v41 = vmax.f32 %v2815_v31, 0.0  ;;  %v3234_v14 = vxor.u32 %v3202_v44, %v3170_v35  ;;  %v3142_v15 = vxor.u32 %v3110_v13, %v3078_v42  ;;  %v3144_v24 = vxor.u32 %v3112_v43, %v3080_v11 }
 0x2a9   : > { %v3940_v18 = vpack.c.bf16 %v2905_v23, %v2904_v60  ;;  %v3145_v32 = vxor.u32 %v3113_v6, %v3081_v39  ;;  %v3237_v27 = vxor.u32 %v3205_v10, %v3173_v25 }
 0x2aa   : > { %v3937_v58 = vpack.c.bf16 %v2903_v41, %v2902_v50  ;;  %v4458_v1 = vpop.f32.mrb[128].mxu1  ;;  %v3266_v30 = vshrl.u32 %v3234_v14, 31  ;;  %v3174_v9 = vmul.u32 3266489909, %v3142_v15 }
 0x2ab   : > { %v2836_v52 = vadd.f32 %v4458_v1, %v6428_v54  ;;  %v2827_v0 = vpop.f32.mrb[129].mxu1  ;;  %v3236_v1 = vxor.u32 %v3204_v62, %v3172_v57 }
 0x2ac   : > { %v2828_v12 = vadd.f32 %v6428_v54, %v2827_v0  ;;  %v4459_v22 = vpop.f32.mrb[130].mxu1  ;;  %4500 = vmatprep.mubr.msk.bf16.mxu0 %vm3936_vm10, %v3937_v58  ;;  %v3175_v0 = vmul.u32 3266489909, %v3143_v21  ;;  %vm6778_vm4 = vcmp.eq.s32.totalorder %v3266_v30, 0  ;;  %v3206_v2 = vshrl.u32 %v3174_v9, 16 }
 0x2ad   : > { %v2839_v56 = vadd.f32 %v4459_v22, %v6428_v54  ;;  %v2830_v19 = vpop.f32.mrb[131].mxu1  ;;  %4501 = vmatmul.mubr.msk.bf16.gmra.mrb[124].mxu0 %vm3939_vm11, %v3940_v18  ;;  %v2908_v61 = vmax.f32 %v2836_v52, 0.0  ;;  %v3235_v18 = vxor.u32 %v3203_v63, %v3171_v59  ;;  %v3177_v22 = vmul.u32 3266489909, %v3145_v32  ;;  %v6799_v21 = vld [vmem:[%s6880_s7] ss:$0 sm:$0xff] }
 0x2ae   : > { %v2831_v33 = vadd.f32 %v6428_v54, %v2830_v19  ;;  %v2906_v55 = vmax.f32 %v2828_v12, 0.0  ;;  %v3176_v12 = vmul.u32 3266489909, %v3144_v24  ;;  %v3268_v59 = vshrl.u32 %v3236_v1, 31 }
 0x2af   : > { %v2909_v26 = vmax.f32 %v2839_v56, 0.0  ;;  %v3267_v36 = vshrl.u32 %v3235_v18, 31  ;;  %v3269_v56 = vshrl.u32 %v3237_v27, 31  ;;  %v3207_v11 = vshrl.u32 %v3175_v0, 16 }
 0x2b0   : > { %v2907_v38 = vmax.f32 %v2831_v33, 0.0  ;;  %v3209_v57 = vshrl.u32 %v3177_v22, 16  ;;  %vm3300_vm6 = vcmp.eq.s32.totalorder %v3268_v59, 0 }
 0x2b1   : > { %v3946_v5 = vpack.c.bf16 %v2909_v26, %v2908_v61  ;;  %vm6783_vm5 = vcmp.eq.s32.totalorder %v3267_v36, 0  ;;  %v3208_v26 = vshrl.u32 %v3176_v12, 16  ;;  %vm3301_vm7 = vcmp.eq.s32.totalorder %v3269_v56, 0 }
 0x2b2   : > { %v3943_v49 = vpack.c.bf16 %v2907_v38, %v2906_v55  ;;  %v4462_v51 = vpop.f32.mrb[132].mxu1  ;;  %vm3954_vm8 = vmpackc.low %vm6783_vm5, %vm6778_vm4  ;;  %v3239_v44 = vxor.u32 %v3207_v11, %v3175_v0 }
 0x2b3   : > { %v2852_v46 = vadd.f32 %v4462_v51, %v6428_v54  ;;  %v2843_v8 = vpop.f32.mrb[133].mxu1  ;;  %vm3957_vm9 = vmpackc.low %vm3301_vm7, %vm3300_vm6  ;;  %v3240_v4 = vxor.u32 %v3208_v26, %v3176_v12 }
 0x2b4   : > { %v2844_v37 = vadd.f32 %v6428_v54, %v2843_v8  ;;  %v4463_v60 = vpop.f32.mrb[134].mxu1  ;;  %4504 = vmatprep.mubr.msk.bf16.mxu0 %vm3942_vm12, %v3943_v49  ;;  %v3241_v49 = vxor.u32 %v3209_v57, %v3177_v22  ;;  %v3271_v43 = vshrl.u32 %v3239_v44, 31 }
 0x2b5   : > { %v2855_v50 = vadd.f32 %v4463_v60, %v6428_v54  ;;  %v2846_v41 = vpop.f32.mrb[135].mxu1  ;;  %4505 = vmatmul.mubr.msk.bf16.gmra.mrb[128].mxu0 %vm3945_vm13, %v3946_v5  ;;  %v2912_v7 = vmax.f32 %v2852_v46, 0.0  ;;  %v3238_v5 = vxor.u32 %v3206_v2, %v3174_v9  ;;  %v3272_v8 = vshrl.u32 %v3240_v4, 31 }
 0x2b6   : > { %v2847_v16 = vadd.f32 %v6428_v54, %v2846_v41  ;;  %v2910_v45 = vmax.f32 %v2844_v37, 0.0  ;;  %v3273_v31 = vshrl.u32 %v3241_v49, 31  ;;  %vm3303_vm11 = vcmp.eq.s32.totalorder %v3271_v43, 0 }
 0x2b7   : > { %v2913_v58 = vmax.f32 %v2855_v50, 0.0  ;;  %v3270_v63 = vshrl.u32 %v3238_v5, 31  ;;  %vm3304_vm12 = vcmp.eq.s32.totalorder %v3272_v8, 0 }
 0x2b8   : > { %v2911_v47 = vmax.f32 %v2847_v16, 0.0  ;;  %vm3305_vm13 = vcmp.eq.s32.totalorder %v3273_v31, 0 }
 0x2b9   : > { %v3952_v52 = vpack.c.bf16 %v2913_v58, %v2912_v7  ;;  %vm3302_vm10 = vcmp.eq.s32.totalorder %v3270_v63, 0  ;;  %vm3963_vm15 = vmpackc.low %vm3305_vm13, %vm3304_vm12 }
 0x2ba   : > { %v3949_v20 = vpack.c.bf16 %v2911_v47, %v2910_v45  ;;  %v4466_v40 = vpop.f32.mrb[136].mxu1  ;;  %vm3960_vm14 = vmpackc.low %vm3303_vm11, %vm3302_vm10 }
 0x2bb   : > { %v2868_v28 = vadd.f32 %v4466_v40, %v6428_v54  ;;  %v2859_v35 = vpop.f32.mrb[137].mxu1 }
 0x2bc   : > { %v2860_v19 = vadd.f32 %v6428_v54, %v2859_v35  ;;  %v4467_v34 = vpop.f32.mrb[138].mxu1  ;;  %4508 = vmatprep.mubr.msk.bf16.mxu0 %vm3948_vm2, %v3949_v20 }
 0x2bd   : > { %v2871_v42 = vadd.f32 %v4467_v34, %v6428_v54  ;;  %v2862_v53 = vpop.f32.mrb[139].mxu1  ;;  %4509 = vmatmul.mubr.msk.bf16.gmra.mrb[132].mxu0 %vm3951_vm3, %v3952_v52  ;;  %v2916_v25 = vmax.f32 %v2868_v28, 0.0 }
 0x2be   : > { %v2863_v39 = vadd.f32 %v6428_v54, %v2862_v53  ;;  %v2914_v38 = vmax.f32 %v2860_v19, 0.0 }
 0x2bf   : > { %v2917_v55 = vmax.f32 %v2871_v42, 0.0 }
 0x2c0   : > { %v2915_v17 = vmax.f32 %v2863_v39, 0.0 }
 0x2c1   : > { %v3958_v3 = vpack.c.bf16 %v2917_v55, %v2916_v25 }
 0x2c2   : > { %v3955_v13 = vpack.c.bf16 %v2915_v17, %v2914_v38  ;;  %v4470_v51 = vpop.f32.mrb[140].mxu1 }
 0x2c3   : > { %v2884_v6 = vadd.f32 %v4470_v51, %v6428_v54  ;;  %v2875_v46 = vpop.f32.mrb[141].mxu1 }
 0x2c4   : > { %4512 = vmatprep.mubr.msk.bf16.mxu0 %vm3954_vm8, %v3955_v13  ;;  %v2876_v62 = vadd.f32 %v6428_v54, %v2875_v46  ;;  %v4471_v10 = vpop.f32.mrb[142].mxu1 }
 0x2c5   : > { %4513 = vmatmul.mubr.msk.bf16.gmra.mrb[136].mxu0 %vm3957_vm9, %v3958_v3  ;;  %v2887_v37 = vadd.f32 %v4471_v10, %v6428_v54  ;;  %v2878_v60 = vpop.f32.mrb[143].mxu1  ;;  %v2920_v48 = vmax.f32 %v2884_v6, 0.0 }
 0x2c6   : > { %v2879_v23 = vadd.f32 %v6428_v54, %v2878_v60  ;;  %v2918_v50 = vmax.f32 %v2876_v62, 0.0 }
 0x2c7   : > { %v2921_v29 = vmax.f32 %v2887_v37, 0.0 }
 0x2c8   : > { %v2919_v41 = vmax.f32 %v2879_v23, 0.0 }
 0x2c9   : > { %v3964_v14 = vpack.c.bf16 %v2921_v29, %v2920_v48 }
 0x2ca   : > { %v3961_v15 = vpack.c.bf16 %v2919_v41, %v2918_v50 }
 0x2cc   : > { %4516 = vmatprep.mubr.msk.bf16.mxu0 %vm3960_vm14, %v3961_v15 }
 0x2cd   : > { %4517 = vmatmul.mubr.msk.bf16.gmra.mrb[140].mxu0 %vm3963_vm15, %v3964_v14 }
 0x361   : > { %v4490_v54 = vpop.f32.mrb[112].mxu0 }
 0x362   : > { %v3468_v16 = vadd.f32 %v4490_v54, %v6799_v21  ;;  %v3459_v18 = vpop.f32.mrb[113].mxu0 }
 0x363   : > { %v3460_v24 = vadd.f32 %v6799_v21, %v3459_v18  ;;  %v4491_v32 = vpop.f32.mrb[114].mxu0 }
 0x364   : > { %3588 = vst [vmem:[%s6804_s14 + $0x10] sm:$0xff] %v3468_v16  ;;  %v3471_v7 = vadd.f32 %v4491_v32, %v6799_v21  ;;  %v3462_v58 = vpop.f32.mrb[115].mxu0 }
 0x365   : > { %3586 = vst [vmem:[%s6804_s14] sm:$0xff] %v3460_v24  ;;  %v3463_v1 = vadd.f32 %v6799_v21, %v3462_v58 }
 0x366   : > { %3589 = vst [vmem:[%s6804_s14 + $0x18] sm:$0xff] %v3471_v7 }
 0x367   : > { %3587 = vst [vmem:[%s6804_s14 + $0x8] sm:$0xff] %v3463_v1 }
 0x36b   : > { %v4494_v27 = vpop.f32.mrb[116].mxu0 }
 0x36c   : > { %v3484_v45 = vadd.f32 %v4494_v27, %v6799_v21  ;;  %v3475_v47 = vpop.f32.mrb[117].mxu0 }
 0x36d   : > { %v3476_v52 = vadd.f32 %v6799_v21, %v3475_v47  ;;  %v4495_v30 = vpop.f32.mrb[118].mxu0 }
 0x36e   : > { %3592 = vst [vmem:[%s6804_s14 + $0x30] sm:$0xff] %v3484_v45  ;;  %v3487_v9 = vadd.f32 %v4495_v30, %v6799_v21  ;;  %v3478_v0 = vpop.f32.mrb[119].mxu0 }
 0x36f   : > { %3590 = vst [vmem:[%s6804_s14 + $0x20] sm:$0xff] %v3476_v52  ;;  %v3479_v20 = vadd.f32 %v6799_v21, %v3478_v0 }
 0x370   : > { %3593 = vst [vmem:[%s6804_s14 + $0x38] sm:$0xff] %v3487_v9 }
 0x371   : > { %3591 = vst [vmem:[%s6804_s14 + $0x28] sm:$0xff] %v3479_v20 }
 0x376   : > { %v4498_v40 = vpop.f32.mrb[120].mxu0 }
 0x377   : > { %v3500_v36 = vadd.f32 %v4498_v40, %v6799_v21  ;;  %v3491_v12 = vpop.f32.mrb[121].mxu0 }
 0x378   : > { %v3492_v22 = vadd.f32 %v6799_v21, %v3491_v12  ;;  %v4499_v28 = vpop.f32.mrb[122].mxu0 }
 0x379   : > { %3596 = vst [vmem:[%s6804_s14 + $0x50] sm:$0xff] %v3500_v36  ;;  %v3503_v35 = vadd.f32 %v4499_v28, %v6799_v21  ;;  %v3494_v59 = vpop.f32.mrb[123].mxu0 }
 0x37a   : > { %3594 = vst [vmem:[%s6804_s14 + $0x40] sm:$0xff] %v3492_v22  ;;  %v3495_v56 = vadd.f32 %v6799_v21, %v3494_v59 }
 0x37b   : > { %3597 = vst [vmem:[%s6804_s14 + $0x58] sm:$0xff] %v3503_v35 }
 0x37c   : > { %3595 = vst [vmem:[%s6804_s14 + $0x48] sm:$0xff] %v3495_v56 }
 0x380   : > { %v4502_v19 = vpop.f32.mrb[124].mxu0 }
 0x381   : > { %v3516_v34 = vadd.f32 %v4502_v19, %v6799_v21  ;;  %v3507_v42 = vpop.f32.mrb[125].mxu0 }
 0x382   : > { %v3508_v53 = vadd.f32 %v6799_v21, %v3507_v42  ;;  %v4503_v33 = vpop.f32.mrb[126].mxu0 }
 0x383   : > { %3600 = vst [vmem:[%s6804_s14 + $0x70] sm:$0xff] %v3516_v34  ;;  %v3519_v2 = vadd.f32 %v4503_v33, %v6799_v21  ;;  %v3510_v11 = vpop.f32.mrb[127].mxu0 }
 0x384   : > { %3598 = vst [vmem:[%s6804_s14 + $0x60] sm:$0xff] %v3508_v53  ;;  %v3511_v39 = vadd.f32 %v6799_v21, %v3510_v11 }
 0x385   : > { %3601 = vst [vmem:[%s6804_s14 + $0x78] sm:$0xff] %v3519_v2 }
 0x386   : > { %3599 = vst [vmem:[%s6804_s14 + $0x68] sm:$0xff] %v3511_v39 }
 0x388   : > { %v4506_v61 = vpop.f32.mrb[128].mxu0 }
 0x389   : > { %v3532_v26 = vadd.f32 %v4506_v61, %v6799_v21  ;;  %v3523_v57 = vpop.f32.mrb[129].mxu0 }
 0x38a   : > { %v3524_v25 = vadd.f32 %v6799_v21, %v3523_v57  ;;  %v4507_v55 = vpop.f32.mrb[130].mxu0 }
 0x38b   : > { %3604 = vst [vmem:[%s6804_s14 + $0x90] sm:$0xff] %v3532_v26  ;;  %v3535_v38 = vadd.f32 %v4507_v55, %v6799_v21  ;;  %v3526_v17 = vpop.f32.mrb[131].mxu0 }
 0x38c   : > { %3602 = vst [vmem:[%s6804_s14 + $0x80] sm:$0xff] %v3524_v25  ;;  %v3527_v3 = vadd.f32 %v6799_v21, %v3526_v17 }
 0x38d   : > { %3605 = vst [vmem:[%s6804_s14 + $0x98] sm:$0xff] %v3535_v38 }
 0x38e   : > { %3603 = vst [vmem:[%s6804_s14 + $0x88] sm:$0xff] %v3527_v3 }
 0x390   : > { %v4510_v5 = vpop.f32.mrb[132].mxu0 }
 0x391   : > { %v3548_v44 = vadd.f32 %v4510_v5, %v6799_v21  ;;  %v3539_v13 = vpop.f32.mrb[133].mxu0 }
 0x392   : > { %v3540_v4 = vadd.f32 %v6799_v21, %v3539_v13  ;;  %v4511_v49 = vpop.f32.mrb[134].mxu0 }
 0x393   : > { %3608 = vst [vmem:[%s6804_s14 + $0xb0] sm:$0xff] %v3548_v44  ;;  %v3551_v51 = vadd.f32 %v4511_v49, %v6799_v21  ;;  %v3542_v63 = vpop.f32.mrb[135].mxu0 }
 0x394   : > { %3606 = vst [vmem:[%s6804_s14 + $0xa0] sm:$0xff] %v3540_v4  ;;  %v3543_v43 = vadd.f32 %v6799_v21, %v3542_v63 }
 0x395   : > { %3609 = vst [vmem:[%s6804_s14 + $0xb8] sm:$0xff] %v3551_v51 }
 0x396   : > { %3607 = vst [vmem:[%s6804_s14 + $0xa8] sm:$0xff] %v3543_v43 }
 0x398   : > { %v4514_v6 = vpop.f32.mrb[136].mxu0 }
 0x399   : > { %v3564_v46 = vadd.f32 %v4514_v6, %v6799_v21  ;;  %v3555_v8 = vpop.f32.mrb[137].mxu0 }
 0x39a   : > { %v3556_v31 = vadd.f32 %v6799_v21, %v3555_v8  ;;  %v4515_v62 = vpop.f32.mrb[138].mxu0 }
 0x39b   : > { %3612 = vst [vmem:[%s6804_s14 + $0xd0] sm:$0xff] %v3564_v46  ;;  %v3567_v10 = vadd.f32 %v4515_v62, %v6799_v21  ;;  %v3558_v37 = vpop.f32.mrb[139].mxu0 }
 0x39c   : > { %3610 = vst [vmem:[%s6804_s14 + $0xc0] sm:$0xff] %v3556_v31  ;;  %v3559_v60 = vadd.f32 %v6799_v21, %v3558_v37 }
 0x39d   : > { %3613 = vst [vmem:[%s6804_s14 + $0xd8] sm:$0xff] %v3567_v10 }
 0x39e   : > { %3611 = vst [vmem:[%s6804_s14 + $0xc8] sm:$0xff] %v3559_v60 }
 0x3a0   : > { %v4518_v23 = vpop.f32.mrb[140].mxu0 }
 0x3a1   : > { %v3580_v48 = vadd.f32 %v4518_v23, %v6799_v21  ;;  %v3571_v29 = vpop.f32.mrb[141].mxu0 }
 0x3a2   : > { %v3572_v50 = vadd.f32 %v6799_v21, %v3571_v29  ;;  %v4519_v41 = vpop.f32.mrb[142].mxu0 }
 0x3a3   : > { %3616 = vst [vmem:[%s6804_s14 + $0xf0] sm:$0xff] %v3580_v48  ;;  %v3583_v14 = vadd.f32 %v4519_v41, %v6799_v21  ;;  %v3574_v15 = vpop.f32.mrb[143].mxu0 }
 0x3a4   : > { %3614 = vst [vmem:[%s6804_s14 + $0xe0] sm:$0xff] %v3572_v50  ;;  %v3575_v54 = vadd.f32 %v6799_v21, %v3574_v15 }
 0x3a5   : > { %3617 = vst [vmem:[%s6804_s14 + $0xf8] sm:$0xff] %v3583_v14 }
 0x3a6   : > { %3615 = vst [vmem:[%s6804_s14 + $0xe8] sm:$0xff] %v3575_v54 }
 0x3a7 PF: > { %s19_s29 = sadd.s32 1, %s4784_s29  }
 0x3a8   : > { %p16_p4 = scmp.ge.s32.totalorder %s19_s29, 4  }
 0x3aa   :  { %18 = sbr.rel (!%p16_p4) target bundleno = 2 (0x2), region = 78 }

</bundles_post_ra>
